<compile_context>
chip_gen: v5e
topology: v5e:2x2
jax: 0.10.0
libtpu: 0.0.40
codegen_flags: <defaults>
</compile_context>

<pallas_src>
import jax
import jax.numpy as jnp
from jax.experimental import pallas as pl
from jax.experimental.pallas import tpu as pltpu

H_PAD = 128                       # lane-dense padded feature / hidden width
BN_EPS = 1e-5


def _round_up(x, m):
    return ((x + m - 1) // m) * m


def _vmem_limit(working_set_bytes):
    """Double-buffer headroom over the per-step working set, clamped to 32 MiB
    (v7x-safe; v5e/v6e have 128 MiB physical so this is always conservative)."""
    return int(min(max(4 * working_set_bytes + (4 << 20), 8 << 20), 32 << 20))


# ------------------------- BN apply (tiny one-pass kernel) -------------------------

def bn_apply_bf16(x, scale, shift, *, tm):
    """x_bn = x*scale + shift, emitted as bf16 for the next layer's aggregation."""
    n_pad = x.shape[0]
    assert n_pad % tm == 0
    n_rt = n_pad // tm

    def kernel(x_ref, sc_ref, sh_ref, o_ref):
        o_ref[...] = (x_ref[...] * sc_ref[...] + sh_ref[...]).astype(jnp.bfloat16)

    ws = tm * H_PAD * (4 + 2) + 2 * H_PAD * 4
    return pl.pallas_call(
        kernel,
        out_shape=jax.ShapeDtypeStruct((n_pad, H_PAD), jnp.bfloat16),
        grid=(n_rt,),
        in_specs=[pl.BlockSpec((tm, H_PAD), lambda i: (i, 0)),
                  pl.BlockSpec((1, H_PAD), lambda i: (0, 0)),
                  pl.BlockSpec((1, H_PAD), lambda i: (0, 0))],
        out_specs=pl.BlockSpec((tm, H_PAD), lambda i: (i, 0)),
        compiler_params=pltpu.CompilerParams(
            dimension_semantics=("parallel",),
            vmem_limit_bytes=_vmem_limit(ws)),
    )(x, scale, shift)


# ------------------------- GIN layer kernel (pre-BN) -------------------------

def gin_layer_pre_bn(a_bf16, x_bf16, w1, b1, w2, b2, *, n_valid, tm):
    """One GIN layer up to (but not including) its own BatchNorm.

    x_bf16 already has the previous layer's BN folded in (or is the raw feature
    for layer 0).  The node-feature matrix stays resident in VMEM; each grid
    step consumes one (tm, n_pad) row stripe of A_norm.  Returns the pre-BN
    activations and packed per-row-tile BN partial stats (row 0 = sum,
    row 1 = sum of squares).
    """
    n_pad = a_bf16.shape[0]
    assert n_pad % tm == 0
    n_rt = n_pad // tm

    def kernel(a_ref, xfull_ref, xi_ref, w1_ref, b1_ref, w2_ref, b2_ref,
               h_ref, stat_ref):
        i = pl.program_id(0)
        # mean aggregation: single (tm, n_pad) x (n_pad, 128) bf16 MXU pass.
        agg = jnp.dot(a_ref[...], xfull_ref[...],
                      preferred_element_type=jnp.float32)
        h = xi_ref[...].astype(jnp.float32) + agg      # (1+eps)*h_v + mean, eps=0
        h = jnp.dot(h.astype(jnp.bfloat16), w1_ref[...],
                    preferred_element_type=jnp.float32) + b1_ref[...]
        h = jnp.maximum(h, 0.0)
        h = jnp.dot(h.astype(jnp.bfloat16), w2_ref[...],
                    preferred_element_type=jnp.float32) + b2_ref[...]
        h = jnp.maximum(h, 0.0)                        # F.relu(conv(.))
        # mask layout-padding rows so BN stats / the next layer stay exact
        rows = i * tm + jax.lax.broadcasted_iota(jnp.int32, h.shape, 0)
        h = jnp.where(rows < n_valid, h, 0.0)
        h_ref[...] = h
        # packed BN partial statistics: row 0 = sum, row 1 = sum of squares
        s1 = jnp.sum(h, axis=0, keepdims=True)
        s2 = jnp.sum(h * h, axis=0, keepdims=True)
        ridx = jax.lax.broadcasted_iota(jnp.int32, stat_ref.shape, 0)
        stat_ref[...] = jnp.where(ridx == 0, s1, 0.0) + jnp.where(ridx == 1, s2, 0.0)

    flops = 2 * n_pad * n_pad * H_PAD + 4 * n_pad * H_PAD * H_PAD
    bytes_accessed = (n_pad * n_pad * 2                # A_norm stream (bf16)
                      + 2 * n_pad * H_PAD * 2          # x resident + self-term tiles
                      + 2 * H_PAD * H_PAD * 2 + 2 * H_PAD * 4   # weights / biases
                      + n_pad * H_PAD * 4              # pre-BN h writeback
                      + n_rt * 8 * H_PAD * 4)          # packed stats
    ws = (tm * n_pad * 2 + n_pad * H_PAD * 2 + tm * H_PAD * 2
          + 2 * H_PAD * H_PAD * 2 + 2 * H_PAD * 4
          + tm * H_PAD * 4 + 8 * H_PAD * 4)

    return pl.pallas_call(
        kernel,
        out_shape=(
            jax.ShapeDtypeStruct((n_pad, H_PAD), jnp.float32),     # pre-BN h
            jax.ShapeDtypeStruct((n_rt * 8, H_PAD), jnp.float32),  # packed stats
        ),
        grid=(n_rt,),
        in_specs=[
            pl.BlockSpec((tm, n_pad), lambda i: (i, 0)),        # A_norm row stripe
            pl.BlockSpec((n_pad, H_PAD), lambda i: (0, 0)),     # x_bn (VMEM-resident)
            pl.BlockSpec((tm, H_PAD), lambda i: (i, 0)),        # x_bn self-term tile
            pl.BlockSpec((H_PAD, H_PAD), lambda i: (0, 0)),     # W1 (bf16)
            pl.BlockSpec((1, H_PAD), lambda i: (0, 0)),         # b1
            pl.BlockSpec((H_PAD, H_PAD), lambda i: (0, 0)),     # W2 (bf16)
            pl.BlockSpec((1, H_PAD), lambda i: (0, 0)),         # b2
        ],
        out_specs=(
            pl.BlockSpec((tm, H_PAD), lambda i: (i, 0)),
            pl.BlockSpec((8, H_PAD), lambda i: (i, 0)),
        ),
        compiler_params=pltpu.CompilerParams(
            dimension_semantics=("parallel",),
            vmem_limit_bytes=_vmem_limit(ws)),
        cost_estimate=pl.CostEstimate(flops=flops, transcendentals=0,
                                      bytes_accessed=bytes_accessed),
    )(a_bf16, x_bf16, x_bf16, w1, b1, w2, b2)


# ------------------------- BN fold (tiny JAX glue) -------------------------

def bn_scale_shift(stats, gamma, beta, n_valid):
    """Reduce packed per-tile stats and fold BN1d (biased var) into one FMA."""
    st = stats.reshape(-1, 8, H_PAD)
    s = st[:, 0, :].sum(axis=0)
    sq = st[:, 1, :].sum(axis=0)
    mean = s / n_valid
    var = jnp.maximum(sq / n_valid - mean * mean, 0.0)
    scale = gamma * jax.lax.rsqrt(var + BN_EPS)
    shift = beta - mean * scale
    return scale, shift                      # both (1, H_PAD)


# --------------- finalize kernel: BN apply + concat + avg pool ---------------

def finalize(pool_pad, h_pres, scales, shifts, *, tm):
    n_layer = len(h_pres)
    n_pad = h_pres[0].shape[0]
    b_pad = pool_pad.shape[0]
    assert n_pad % tm == 0
    n_rt = n_pad // tm
    d_out = n_layer * H_PAD

    def kernel(pool_ref, *args):
        local_ref = args[3 * n_layer]
        glob_ref = args[3 * n_layer + 1]          # per-row-tile pooled partial
        pool = pool_ref[...]
        for l in range(n_layer):
            y = args[3 * l][...] * args[3 * l + 1][...] + args[3 * l + 2][...]
            # static 128-wide lane slices: free ref views, unmasked stores
            local_ref[:, l * H_PAD:(l + 1) * H_PAD] = y
            glob_ref[:, l * H_PAD:(l + 1) * H_PAD] = jnp.dot(
                pool, y, preferred_element_type=jnp.float32)

    in_specs = [pl.BlockSpec((b_pad, tm), lambda i: (0, i))]
    flat = [pool_pad]
    for l in range(n_layer):
        in_specs += [pl.BlockSpec((tm, H_PAD), lambda i: (i, 0)),
                     pl.BlockSpec((1, H_PAD), lambda i: (0, 0)),
                     pl.BlockSpec((1, H_PAD), lambda i: (0, 0))]
        flat += [h_pres[l], scales[l], shifts[l]]

    ws = (b_pad * tm * 4 + n_layer * (tm * H_PAD * 4 + 2 * H_PAD * 4)
          + tm * d_out * 4 + b_pad * d_out * 4)

    local_pad, glob_part = pl.pallas_call(
        kernel,
        out_shape=(jax.ShapeDtypeStruct((n_pad, d_out), jnp.float32),
                   jax.ShapeDtypeStruct((n_rt, b_pad, d_out), jnp.float32)),
        grid=(n_rt,),
        in_specs=in_specs,
        out_specs=(pl.BlockSpec((tm, d_out), lambda i: (i, 0)),
                   pl.BlockSpec((None, b_pad, d_out), lambda i: (i, 0, 0))),
        compiler_params=pltpu.CompilerParams(
            dimension_semantics=("parallel",),
            vmem_limit_bytes=_vmem_limit(ws)),
    )(*flat)
    glob_pad = glob_part.sum(axis=0)          # tiny (n_rt, B_pad, d_out) reduce
    return local_pad, glob_pad


# ------------------------- forward -------------------------

def gin_encoder_forward(a_bf16, pool_pad, feat_bf16, params, *, n_valid, tm):
    """Returns padded (global_emb [B_pad, L*128], local_emb [N_pad, L*128])."""
    x_bf16 = feat_bf16                        # layer 0 consumes raw features
    h_pres, scales, shifts = [], [], []
    for li, (w1, b1, w2, b2, gamma, beta) in enumerate(params):
        h_pre, stats = gin_layer_pre_bn(a_bf16, x_bf16, w1, b1, w2, b2,
                                        n_valid=n_valid, tm=tm)
        scale, shift = bn_scale_shift(stats, gamma, beta, n_valid)
        h_pres.append(h_pre)
        scales.append(scale)
        shifts.append(shift)
        if li + 1 < len(params):              # fold this layer's BN once (bf16)
            x_bf16 = bn_apply_bf16(h_pre, scale, shift, tm=tm)
    local_pad, glob_pad = finalize(pool_pad, h_pres, scales, shifts, tm=tm)
    return glob_pad, local_pad


# ------------------------- deterministic parameters & graph -------------------------

def init_params(key, in_dim, hid_dim, n_layer):
    """PyTorch-default Linear/BN init, zero-padded to the lane-dense layout."""
    assert in_dim <= H_PAD and hid_dim <= H_PAD
    params = []
    for i in range(n_layer):
        n_in = in_dim if i == 0 else hid_dim
        key, k1, k2, k3, k4 = jax.random.split(key, 5)
        lim1 = 1.0 / float(n_in) ** 0.5
        lim2 = 1.0 / float(hid_dim) ** 0.5
        w1 = jax.random.uniform(k1, (n_in, hid_dim), jnp.float32, -lim1, lim1)
        b1 = jax.random.uniform(k2, (hid_dim,), jnp.float32, -lim1, lim1)
        w2 = jax.random.uniform(k3, (hid_dim, hid_dim), jnp.float32, -lim2, lim2)
        b2 = jax.random.uniform(k4, (hid_dim,), jnp.float32, -lim2, lim2)
        w1p = jnp.zeros((H_PAD, H_PAD), jnp.float32).at[:n_in, :hid_dim].set(w1)
        w2p = jnp.zeros((H_PAD, H_PAD), jnp.float32).at[:hid_dim, :hid_dim].set(w2)
        b1p = jnp.zeros((1, H_PAD), jnp.float32).at[0, :hid_dim].set(b1)
        b2p = jnp.zeros((1, H_PAD), jnp.float32).at[0, :hid_dim].set(b2)
        gamma = jnp.ones((1, H_PAD), jnp.float32)     # BatchNorm1d default weight
        beta = jnp.zeros((1, H_PAD), jnp.float32)     # BatchNorm1d default bias
        params.append((w1p.astype(jnp.bfloat16), b1p,
                       w2p.astype(jnp.bfloat16), b2p, gamma, beta))
    return params


def build_graph(key, nodes_per_graph, n_graphs, n_pad, b_pad, edge_prob=0.4):
    """Block-diagonal random batch; returns padded (A_norm bf16 [N_pad,N_pad],
    pool_mat f32 [B_pad, N_pad])."""
    n = nodes_per_graph * n_graphs
    adj = jnp.zeros((n, n), jnp.float32)
    for g in range(n_graphs):
        key, sub = jax.random.split(key)
        blk = (jax.random.uniform(sub, (nodes_per_graph, nodes_per_graph))
               < edge_prob).astype(jnp.float32)
        s = g * nodes_per_graph
        adj = adj.at[s:s + nodes_per_graph, s:s + nodes_per_graph].set(blk)
    # adj[v, u] = 1 if edge u -> v ; 'mean' aggregator => row-normalize by in-deg
    in_deg = adj.sum(axis=1, keepdims=True)
    a_norm = adj / jnp.maximum(in_deg, 1.0)
    a_pad = (jnp.zeros((n_pad, n_pad), jnp.float32)
             .at[:n, :n].set(a_norm).astype(jnp.bfloat16))
    pool = jnp.zeros((b_pad, n_pad), jnp.float32)
    for g in range(n_graphs):
        s = g * nodes_per_graph
        pool = pool.at[g, s:s + nodes_per_graph].set(1.0 / nodes_per_graph)
    return a_pad, pool


# ------------------------- main -------------------------

if __name__ == "__main__":
    in_dim, hid_dim, n_layer = 8, 32, 3
    nodes_per_graph, n_graphs = 40, 4
    n_nodes = nodes_per_graph * n_graphs          # 160 real nodes
    TM = 128                                      # row tile -> 2 "parallel" tiles
    n_pad = _round_up(n_nodes, 128)               # 256
    b_pad = _round_up(n_graphs, 8)                # 8  (sublane-dense pooling rows)

    key = jax.random.PRNGKey(0)
    key, k_feat, k_graph, k_params = jax.random.split(key, 4)

    feat = jax.random.normal(k_feat, (n_nodes, in_dim), jnp.float32)
    feat_pad = jnp.zeros((n_pad, H_PAD), jnp.float32).at[:n_nodes, :in_dim].set(feat)
    feat_bf16 = feat_pad.astype(jnp.bfloat16)     # layer-0 MXU operand
    a_pad, pool_pad = build_graph(k_graph, nodes_per_graph, n_graphs, n_pad, b_pad)
    params = init_params(k_params, in_dim, hid_dim, n_layer)

    fwd = jax.jit(gin_encoder_forward, static_argnames=("n_valid", "tm"))
    glob_pad, local_pad = fwd(a_pad, pool_pad, feat_bf16, params,
                              n_valid=n_nodes, tm=TM)
    jax.block_until_ready((glob_pad, local_pad))

    # strip layout padding back to the reference shapes
    cols = jnp.concatenate([l * H_PAD + jnp.arange(hid_dim) for l in range(n_layer)])
    global_emb = glob_pad[:n_graphs, :][:, cols]
    local_emb = local_pad[:n_nodes, :][:, cols]

    assert global_emb.shape == (n_graphs, n_layer * hid_dim)
    assert local_emb.shape == (n_nodes, n_layer * hid_dim)
    assert bool(jnp.all(jnp.isfinite(global_emb)))
    assert bool(jnp.all(jnp.isfinite(local_emb)))
    print("KERNEL_OK")
</pallas_src>

<mosaic_0001>
module attributes {stable_mosaic.version = 11 : i64} {
  func.func @kernel(%arg0: i32, %arg1: memref<128x128xf32, #tpu.memory_space<vmem>>, %arg2: memref<1x128xf32, #tpu.memory_space<vmem>>, %arg3: memref<1x128xf32, #tpu.memory_space<vmem>>, %arg4: memref<128x128xbf16, #tpu.memory_space<vmem>>) attributes {dimension_semantics = [#tpu.dimension_semantics<parallel>], iteration_bounds = array<i64: 2>, scalar_prefetch = 0 : i64, scratch_operands = 0 : i64, tpu.core_type = #tpu.core_type<tc>, window_params = [{transform_indices = @transform_0, window_bounds = array<i64: 128, 128>}, {pipeline_mode = #tpu.pipeline_mode<synchronous>, transform_indices = @transform_1, window_bounds = array<i64: 1, 128>}, {pipeline_mode = #tpu.pipeline_mode<synchronous>, transform_indices = @transform_2, window_bounds = array<i64: 1, 128>}, {transform_indices = @transform_3, window_bounds = array<i64: 128, 128>}]} {
    %c0 = arith.constant 0 : index
    %c0_0 = arith.constant 0 : index
    %0 = vector.load %arg1[%c0, %c0_0] : memref<128x128xf32, #tpu.memory_space<vmem>>, vector<128x128xf32>
    %c0_1 = arith.constant 0 : index
    %c0_2 = arith.constant 0 : index
    %1 = vector.load %arg2[%c0_1, %c0_2] : memref<1x128xf32, #tpu.memory_space<vmem>>, vector<1x128xf32>
    %2 = vector.broadcast %1 : vector<1x128xf32> to vector<128x128xf32>
    %3 = arith.mulf %0, %2 : vector<128x128xf32>
    %c0_3 = arith.constant 0 : index
    %c0_4 = arith.constant 0 : index
    %4 = vector.load %arg3[%c0_3, %c0_4] : memref<1x128xf32, #tpu.memory_space<vmem>>, vector<1x128xf32>
    %5 = vector.broadcast %4 : vector<1x128xf32> to vector<128x128xf32>
    %6 = arith.addf %3, %5 : vector<128x128xf32>
    %7 = arith.truncf %6 : vector<128x128xf32> to vector<128x128xbf16>
    %c0_5 = arith.constant 0 : index
    %c0_6 = arith.constant 0 : index
    %8 = vector.load %arg4[%c0_5, %c0_6] : memref<128x128xbf16, #tpu.memory_space<vmem>>, vector<128x128xbf16>
    tpu.vector_store %arg4[%c0_5, %c0_6], %7 {strides = array<i32>} : memref<128x128xbf16, #tpu.memory_space<vmem>>, vector<128x128xbf16>,
    return
  }
  func.func @transform_0(%arg0: i32) -> (i32, i32) {
    %c0_i32 = arith.constant 0 : i32
    %c0_i32_0 = arith.constant 0 : i32
    return %arg0, %c0_i32 : i32, i32
  }
  func.func @transform_1(%arg0: i32) -> (i32, i32) {
    %c0_i32 = arith.constant 0 : i32
    %c0_i32_0 = arith.constant 0 : i32
    %c0_i32_1 = arith.constant 0 : i32
    return %c0_i32, %c0_i32_0 : i32, i32
  }
  func.func @transform_2(%arg0: i32) -> (i32, i32) {
    %c0_i32 = arith.constant 0 : i32
    %c0_i32_0 = arith.constant 0 : i32
    %c0_i32_1 = arith.constant 0 : i32
    return %c0_i32, %c0_i32_0 : i32, i32
  }
  func.func @transform_3(%arg0: i32) -> (i32, i32) {
    %c0_i32 = arith.constant 0 : i32
    %c0_i32_0 = arith.constant 0 : i32
    return %arg0, %c0_i32 : i32, i32
  }
}

module attributes {stable_mosaic.version = 11 : i64} {
  func.func @kernel(%arg0: i32, %arg1: memref<128x256xbf16, #tpu.memory_space<vmem>>, %arg2: memref<256x128xbf16, #tpu.memory_space<vmem>>, %arg3: memref<128x128xbf16, #tpu.memory_space<vmem>>, %arg4: memref<128x128xbf16, #tpu.memory_space<vmem>>, %arg5: memref<1x128xf32, #tpu.memory_space<vmem>>, %arg6: memref<128x128xbf16, #tpu.memory_space<vmem>>, %arg7: memref<1x128xf32, #tpu.memory_space<vmem>>, %arg8: memref<128x128xf32, #tpu.memory_space<vmem>>, %arg9: memref<8x128xf32, #tpu.memory_space<vmem>>) attributes {dimension_semantics = [#tpu.dimension_semantics<parallel>], iteration_bounds = array<i64: 2>, scalar_prefetch = 0 : i64, scratch_operands = 0 : i64, tpu.core_type = #tpu.core_type<tc>, window_params = [{transform_indices = @transform_0, window_bounds = array<i64: 128, 256>}, {pipeline_mode = #tpu.pipeline_mode<synchronous>, transform_indices = @transform_1, window_bounds = array<i64: 256, 128>}, {transform_indices = @transform_2, window_bounds = array<i64: 128, 128>}, {pipeline_mode = #tpu.pipeline_mode<synchronous>, transform_indices = @transform_3, window_bounds = array<i64: 128, 128>}, {pipeline_mode = #tpu.pipeline_mode<synchronous>, transform_indices = @transform_4, window_bounds = array<i64: 1, 128>}, {pipeline_mode = #tpu.pipeline_mode<synchronous>, transform_indices = @transform_5, window_bounds = array<i64: 128, 128>}, {pipeline_mode = #tpu.pipeline_mode<synchronous>, transform_indices = @transform_6, window_bounds = array<i64: 1, 128>}, {transform_indices = @transform_7, window_bounds = array<i64: 128, 128>}, {transform_indices = @transform_8, window_bounds = array<i64: 8, 128>}]} {
    %c0 = arith.constant 0 : index
    %c0_0 = arith.constant 0 : index
    %0 = vector.load %arg1[%c0, %c0_0] : memref<128x256xbf16, #tpu.memory_space<vmem>>, vector<128x256xbf16>
    %c0_1 = arith.constant 0 : index
    %c0_2 = arith.constant 0 : index
    %1 = vector.load %arg2[%c0_1, %c0_2] : memref<256x128xbf16, #tpu.memory_space<vmem>>, vector<256x128xbf16>
    %cst = arith.constant dense<0.000000e+00> : vector<128x128xf32>
    %2 = tpu.matmul %0, %1, %cst {dimension_numbers = #tpu.dot_dimension_numbers<[1], [0], [0], [1], [0, 0, 1, 1], [], []>} : vector<128x256xbf16>, vector<256x128xbf16>, vector<128x128xf32> -> vector<128x128xf32>
    %c0_3 = arith.constant 0 : index
    %c0_4 = arith.constant 0 : index
    %3 = vector.load %arg3[%c0_3, %c0_4] : memref<128x128xbf16, #tpu.memory_space<vmem>>, vector<128x128xbf16>
    %4 = arith.extf %3 : vector<128x128xbf16> to vector<128x128xf32>
    %5 = arith.addf %4, %2 : vector<128x128xf32>
    %6 = arith.truncf %5 : vector<128x128xf32> to vector<128x128xbf16>
    %c0_5 = arith.constant 0 : index
    %c0_6 = arith.constant 0 : index
    %7 = vector.load %arg4[%c0_5, %c0_6] : memref<128x128xbf16, #tpu.memory_space<vmem>>, vector<128x128xbf16>
    %cst_7 = arith.constant dense<0.000000e+00> : vector<128x128xf32>
    %8 = tpu.matmul %6, %7, %cst_7 {dimension_numbers = #tpu.dot_dimension_numbers<[1], [0], [0], [1], [0, 0, 1, 1], [], []>} : vector<128x128xbf16>, vector<128x128xbf16>, vector<128x128xf32> -> vector<128x128xf32>
    %c0_8 = arith.constant 0 : index
    %c0_9 = arith.constant 0 : index
    %9 = vector.load %arg5[%c0_8, %c0_9] : memref<1x128xf32, #tpu.memory_space<vmem>>, vector<1x128xf32>
    %10 = vector.broadcast %9 : vector<1x128xf32> to vector<128x128xf32>
    %11 = arith.addf %8, %10 : vector<128x128xf32>
    %cst_10 = arith.constant 0.000000e+00 : f32
    %12 = vector.broadcast %cst_10 : f32 to vector<128x128xf32>
    %13 = arith.maximumf %11, %12 : vector<128x128xf32>
    %14 = arith.truncf %13 : vector<128x128xf32> to vector<128x128xbf16>
    %c0_11 = arith.constant 0 : index
    %c0_12 = arith.constant 0 : index
    %15 = vector.load %arg6[%c0_11, %c0_12] : memref<128x128xbf16, #tpu.memory_space<vmem>>, vector<128x128xbf16>
    %cst_13 = arith.constant dense<0.000000e+00> : vector<128x128xf32>
    %16 = tpu.matmul %14, %15, %cst_13 {dimension_numbers = #tpu.dot_dimension_numbers<[1], [0], [0], [1], [0, 0, 1, 1], [], []>} : vector<128x128xbf16>, vector<128x128xbf16>, vector<128x128xf32> -> vector<128x128xf32>
    %c0_14 = arith.constant 0 : index
    %c0_15 = arith.constant 0 : index
    %17 = vector.load %arg7[%c0_14, %c0_15] : memref<1x128xf32, #tpu.memory_space<vmem>>, vector<1x128xf32>
    %18 = vector.broadcast %17 : vector<1x128xf32> to vector<128x128xf32>
    %19 = arith.addf %16, %18 : vector<128x128xf32>
    %cst_16 = arith.constant 0.000000e+00 : f32
    %20 = vector.broadcast %cst_16 : f32 to vector<128x128xf32>
    %21 = arith.maximumf %19, %20 : vector<128x128xf32>
    %c128_i32 = arith.constant 128 : i32
    %22 = arith.muli %arg0, %c128_i32 : i32
    %23 = tpu.iota {dimensions = array<i32: 0>} : vector<128x128xi32>
    %24 = vector.broadcast %22 : i32 to vector<128x128xi32>
    %25 = arith.addi %24, %23 : vector<128x128xi32>
    %c160_i32 = arith.constant 160 : i32
    %26 = vector.broadcast %c160_i32 : i32 to vector<128x128xi32>
    %27 = arith.cmpi slt, %25, %26 : vector<128x128xi32>
    %cst_17 = arith.constant 0.000000e+00 : f32
    %28 = vector.broadcast %cst_17 : f32 to vector<128x128xf32>
    %29 = arith.select %27, %21, %28 : vector<128x128xi1>, vector<128x128xf32>
    %c0_18 = arith.constant 0 : index
    %c0_19 = arith.constant 0 : index
    %30 = vector.load %arg8[%c0_18, %c0_19] : memref<128x128xf32, #tpu.memory_space<vmem>>, vector<128x128xf32>
    tpu.vector_store %arg8[%c0_18, %c0_19], %29 {strides = array<i32>} : memref<128x128xf32, #tpu.memory_space<vmem>>, vector<128x128xf32>,
    %cst_20 = arith.constant dense<0.000000e+00> : vector<128xf32>
    %31 = vector.multi_reduction <add>, %29, %cst_20 [0] : vector<128x128xf32> to vector<128xf32>
    %32 = vector.shape_cast %31 : vector<128xf32> to vector<1x128xf32>
    %33 = arith.mulf %29, %29 : vector<128x128xf32>
    %cst_21 = arith.constant dense<0.000000e+00> : vector<128xf32>
    %34 = vector.multi_reduction <add>, %33, %cst_21 [0] : vector<128x128xf32> to vector<128xf32>
    %35 = vector.shape_cast %34 : vector<128xf32> to vector<1x128xf32>
    %36 = tpu.iota {dimensions = array<i32: 0>} : vector<8x128xi32>
    %c0_i32 = arith.constant 0 : i32
    %37 = vector.broadcast %c0_i32 : i32 to vector<8x128xi32>
    %38 = arith.cmpi eq, %36, %37 : vector<8x128xi32>
    %cst_22 = arith.constant 0.000000e+00 : f32
    %39 = vector.shape_cast %32 : vector<1x128xf32> to vector<1x128xf32>
    %40 = vector.broadcast %39 : vector<1x128xf32> to vector<8x128xf32>
    %41 = vector.broadcast %cst_22 : f32 to vector<8x128xf32>
    %42 = arith.select %38, %40, %41 : vector<8x128xi1>, vector<8x128xf32>
    %c1_i32 = arith.constant 1 : i32
    %43 = vector.broadcast %c1_i32 : i32 to vector<8x128xi32>
    %44 = arith.cmpi eq, %36, %43 : vector<8x128xi32>
    %cst_23 = arith.constant 0.000000e+00 : f32
    %45 = vector.shape_cast %35 : vector<1x128xf32> to vector<1x128xf32>
    %46 = vector.broadcast %45 : vector<1x128xf32> to vector<8x128xf32>
    %47 = vector.broadcast %cst_23 : f32 to vector<8x128xf32>
    %48 = arith.select %44, %46, %47 : vector<8x128xi1>, vector<8x128xf32>
    %49 = arith.addf %42, %48 : vector<8x128xf32>
    %c0_24 = arith.constant 0 : index
    %c0_25 = arith.constant 0 : index
    %50 = vector.load %arg9[%c0_24, %c0_25] : memref<8x128xf32, #tpu.memory_space<vmem>>, vector<8x128xf32>
    tpu.vector_store %arg9[%c0_24, %c0_25], %49 {strides = array<i32>} : memref<8x128xf32, #tpu.memory_space<vmem>>, vector<8x128xf32>,
    return
  }
  func.func @transform_0(%arg0: i32) -> (i32, i32) {
    %c0_i32 = arith.constant 0 : i32
    %c0_i32_0 = arith.constant 0 : i32
    return %arg0, %c0_i32 : i32, i32
  }
  func.func @transform_1(%arg0: i32) -> (i32, i32) {
    %c0_i32 = arith.constant 0 : i32
    %c0_i32_0 = arith.constant 0 : i32
    %c0_i32_1 = arith.constant 0 : i32
    return %c0_i32, %c0_i32_0 : i32, i32
  }
  func.func @transform_2(%arg0: i32) -> (i32, i32) {
    %c0_i32 = arith.constant 0 : i32
    %c0_i32_0 = arith.constant 0 : i32
    return %arg0, %c0_i32 : i32, i32
  }
  func.func @transform_3(%arg0: i32) -> (i32, i32) {
    %c0_i32 = arith.constant 0 : i32
    %c0_i32_0 = arith.constant 0 : i32
    %c0_i32_1 = arith.constant 0 : i32
    return %c0_i32, %c0_i32_0 : i32, i32
  }
  func.func @transform_4(%arg0: i32) -> (i32, i32) {
    %c0_i32 = arith.constant 0 : i32
    %c0_i32_0 = arith.constant 0 : i32
    %c0_i32_1 = arith.constant 0 : i32
    return %c0_i32, %c0_i32_0 : i32, i32
  }
  func.func @transform_5(%arg0: i32) -> (i32, i32) {
    %c0_i32 = arith.constant 0 : i32
    %c0_i32_0 = arith.constant 0 : i32
    %c0_i32_1 = arith.constant 0 : i32
    return %c0_i32, %c0_i32_0 : i32, i32
  }
  func.func @transform_6(%arg0: i32) -> (i32, i32) {
    %c0_i32 = arith.constant 0 : i32
    %c0_i32_0 = arith.constant 0 : i32
    %c0_i32_1 = arith.constant 0 : i32
    return %c0_i32, %c0_i32_0 : i32, i32
  }
  func.func @transform_7(%arg0: i32) -> (i32, i32) {
    %c0_i32 = arith.constant 0 : i32
    %c0_i32_0 = arith.constant 0 : i32
    return %arg0, %c0_i32 : i32, i32
  }
  func.func @transform_8(%arg0: i32) -> (i32, i32) {
    %c0_i32 = arith.constant 0 : i32
    %c0_i32_0 = arith.constant 0 : i32
    return %arg0, %c0_i32 : i32, i32
  }
}

module attributes {stable_mosaic.version = 11 : i64} {
  func.func @kernel(%arg0: i32, %arg1: memref<8x128xf32, #tpu.memory_space<vmem>>, %arg2: memref<128x128xf32, #tpu.memory_space<vmem>>, %arg3: memref<1x128xf32, #tpu.memory_space<vmem>>, %arg4: memref<1x128xf32, #tpu.memory_space<vmem>>, %arg5: memref<128x128xf32, #tpu.memory_space<vmem>>, %arg6: memref<1x128xf32, #tpu.memory_space<vmem>>, %arg7: memref<1x128xf32, #tpu.memory_space<vmem>>, %arg8: memref<128x128xf32, #tpu.memory_space<vmem>>, %arg9: memref<1x128xf32, #tpu.memory_space<vmem>>, %arg10: memref<1x128xf32, #tpu.memory_space<vmem>>, %arg11: memref<128x384xf32, #tpu.memory_space<vmem>>, %arg12: memref<1x8x384xf32, #tpu.memory_space<vmem>>) attributes {dimension_semantics = [#tpu.dimension_semantics<parallel>], iteration_bounds = array<i64: 2>, scalar_prefetch = 0 : i64, scratch_operands = 0 : i64, tpu.core_type = #tpu.core_type<tc>, window_params = [{transform_indices = @transform_0, window_bounds = array<i64: 8, 128>}, {transform_indices = @transform_1, window_bounds = array<i64: 128, 128>}, {pipeline_mode = #tpu.pipeline_mode<synchronous>, transform_indices = @transform_2, window_bounds = array<i64: 1, 128>}, {pipeline_mode = #tpu.pipeline_mode<synchronous>, transform_indices = @transform_3, window_bounds = array<i64: 1, 128>}, {transform_indices = @transform_4, window_bounds = array<i64: 128, 128>}, {pipeline_mode = #tpu.pipeline_mode<synchronous>, transform_indices = @transform_5, window_bounds = array<i64: 1, 128>}, {pipeline_mode = #tpu.pipeline_mode<synchronous>, transform_indices = @transform_6, window_bounds = array<i64: 1, 128>}, {transform_indices = @transform_7, window_bounds = array<i64: 128, 128>}, {pipeline_mode = #tpu.pipeline_mode<synchronous>, transform_indices = @transform_8, window_bounds = array<i64: 1, 128>}, {pipeline_mode = #tpu.pipeline_mode<synchronous>, transform_indices = @transform_9, window_bounds = array<i64: 1, 128>}, {transform_indices = @transform_10, window_bounds = array<i64: 128, 384>}, {transform_indices = @transform_11, window_bounds = array<i64: 1, 8, 384>}]} {
    %c0 = arith.constant 0 : index
    %c0_0 = arith.constant 0 : index
    %0 = vector.load %arg1[%c0, %c0_0] : memref<8x128xf32, #tpu.memory_space<vmem>>, vector<8x128xf32>
    %c0_1 = arith.constant 0 : index
    %c0_2 = arith.constant 0 : index
    %1 = vector.load %arg2[%c0_1, %c0_2] : memref<128x128xf32, #tpu.memory_space<vmem>>, vector<128x128xf32>
    %c0_3 = arith.constant 0 : index
    %c0_4 = arith.constant 0 : index
    %2 = vector.load %arg3[%c0_3, %c0_4] : memref<1x128xf32, #tpu.memory_space<vmem>>, vector<1x128xf32>
    %3 = vector.broadcast %2 : vector<1x128xf32> to vector<128x128xf32>
    %4 = arith.mulf %1, %3 : vector<128x128xf32>
    %c0_5 = arith.constant 0 : index
    %c0_6 = arith.constant 0 : index
    %5 = vector.load %arg4[%c0_5, %c0_6] : memref<1x128xf32, #tpu.memory_space<vmem>>, vector<1x128xf32>
    %6 = vector.broadcast %5 : vector<1x128xf32> to vector<128x128xf32>
    %7 = arith.addf %4, %6 : vector<128x128xf32>
    %c0_7 = arith.constant 0 : index
    %c0_8 = arith.constant 0 : index
    %8 = vector.load %arg11[%c0_7, %c0_8] : memref<128x384xf32, #tpu.memory_space<vmem>>, vector<128x128xf32>
    tpu.vector_store %arg11[%c0_7, %c0_8], %7 {strides = array<i32>} : memref<128x384xf32, #tpu.memory_space<vmem>>, vector<128x128xf32>,
    %cst = arith.constant dense<0.000000e+00> : vector<8x128xf32>
    %9 = tpu.matmul %0, %7, %cst {dimension_numbers = #tpu.dot_dimension_numbers<[1], [0], [0], [1], [0, 0, 1, 1], [], []>} : vector<8x128xf32>, vector<128x128xf32>, vector<8x128xf32> -> vector<8x128xf32>
    %c0_9 = arith.constant 0 : index
    %c0_10 = arith.constant 0 : index
    %c0_11 = arith.constant 0 : index
    %10 = vector.load %arg12[%c0_9, %c0_10, %c0_11] : memref<1x8x384xf32, #tpu.memory_space<vmem>>, vector<1x8x128xf32>
    %11 = vector.shape_cast %10 : vector<1x8x128xf32> to vector<8x128xf32>
    %12 = vector.shape_cast %9 : vector<8x128xf32> to vector<1x8x128xf32>
    tpu.vector_store %arg12[%c0_9, %c0_10, %c0_11], %12 {strides = array<i32>} : memref<1x8x384xf32, #tpu.memory_space<vmem>>, vector<1x8x128xf32>,
    %c0_12 = arith.constant 0 : index
    %c0_13 = arith.constant 0 : index
    %13 = vector.load %arg5[%c0_12, %c0_13] : memref<128x128xf32, #tpu.memory_space<vmem>>, vector<128x128xf32>
    %c0_14 = arith.constant 0 : index
    %c0_15 = arith.constant 0 : index
    %14 = vector.load %arg6[%c0_14, %c0_15] : memref<1x128xf32, #tpu.memory_space<vmem>>, vector<1x128xf32>
    %15 = vector.broadcast %14 : vector<1x128xf32> to vector<128x128xf32>
    %16 = arith.mulf %13, %15 : vector<128x128xf32>
    %c0_16 = arith.constant 0 : index
    %c0_17 = arith.constant 0 : index
    %17 = vector.load %arg7[%c0_16, %c0_17] : memref<1x128xf32, #tpu.memory_space<vmem>>, vector<1x128xf32>
    %18 = vector.broadcast %17 : vector<1x128xf32> to vector<128x128xf32>
    %19 = arith.addf %16, %18 : vector<128x128xf32>
    %c0_18 = arith.constant 0 : index
    %c128 = arith.constant 128 : index
    %20 = vector.load %arg11[%c0_18, %c128] : memref<128x384xf32, #tpu.memory_space<vmem>>, vector<128x128xf32>
    tpu.vector_store %arg11[%c0_18, %c128], %19 {strides = array<i32>} : memref<128x384xf32, #tpu.memory_space<vmem>>, vector<128x128xf32>,
    %cst_19 = arith.constant dense<0.000000e+00> : vector<8x128xf32>
    %21 = tpu.matmul %0, %19, %cst_19 {dimension_numbers = #tpu.dot_dimension_numbers<[1], [0], [0], [1], [0, 0, 1, 1], [], []>} : vector<8x128xf32>, vector<128x128xf32>, vector<8x128xf32> -> vector<8x128xf32>
    %c0_20 = arith.constant 0 : index
    %c0_21 = arith.constant 0 : index
    %c128_22 = arith.constant 128 : index
    %22 = vector.load %arg12[%c0_20, %c0_21, %c128_22] : memref<1x8x384xf32, #tpu.memory_space<vmem>>, vector<1x8x128xf32>
    %23 = vector.shape_cast %22 : vector<1x8x128xf32> to vector<8x128xf32>
    %24 = vector.shape_cast %21 : vector<8x128xf32> to vector<1x8x128xf32>
    tpu.vector_store %arg12[%c0_20, %c0_21, %c128_22], %24 {strides = array<i32>} : memref<1x8x384xf32, #tpu.memory_space<vmem>>, vector<1x8x128xf32>,
    %c0_23 = arith.constant 0 : index
    %c0_24 = arith.constant 0 : index
    %25 = vector.load %arg8[%c0_23, %c0_24] : memref<128x128xf32, #tpu.memory_space<vmem>>, vector<128x128xf32>
    %c0_25 = arith.constant 0 : index
    %c0_26 = arith.constant 0 : index
    %26 = vector.load %arg9[%c0_25, %c0_26] : memref<1x128xf32, #tpu.memory_space<vmem>>, vector<1x128xf32>
    %27 = vector.broadcast %26 : vector<1x128xf32> to vector<128x128xf32>
    %28 = arith.mulf %25, %27 : vector<128x128xf32>
    %c0_27 = arith.constant 0 : index
    %c0_28 = arith.constant 0 : index
    %29 = vector.load %arg10[%c0_27, %c0_28] : memref<1x128xf32, #tpu.memory_space<vmem>>, vector<1x128xf32>
    %30 = vector.broadcast %29 : vector<1x128xf32> to vector<128x128xf32>
    %31 = arith.addf %28, %30 : vector<128x128xf32>
    %c0_29 = arith.constant 0 : index
    %c256 = arith.constant 256 : index
    %32 = vector.load %arg11[%c0_29, %c256] : memref<128x384xf32, #tpu.memory_space<vmem>>, vector<128x128xf32>
    tpu.vector_store %arg11[%c0_29, %c256], %31 {strides = array<i32>} : memref<128x384xf32, #tpu.memory_space<vmem>>, vector<128x128xf32>,
    %cst_30 = arith.constant dense<0.000000e+00> : vector<8x128xf32>
    %33 = tpu.matmul %0, %31, %cst_30 {dimension_numbers = #tpu.dot_dimension_numbers<[1], [0], [0], [1], [0, 0, 1, 1], [], []>} : vector<8x128xf32>, vector<128x128xf32>, vector<8x128xf32> -> vector<8x128xf32>
    %c0_31 = arith.constant 0 : index
    %c0_32 = arith.constant 0 : index
    %c256_33 = arith.constant 256 : index
    %34 = vector.load %arg12[%c0_31, %c0_32, %c256_33] : memref<1x8x384xf32, #tpu.memory_space<vmem>>, vector<1x8x128xf32>
    %35 = vector.shape_cast %34 : vector<1x8x128xf32> to vector<8x128xf32>
    %36 = vector.shape_cast %33 : vector<8x128xf32> to vector<1x8x128xf32>
    tpu.vector_store %arg12[%c0_31, %c0_32, %c256_33], %36 {strides = array<i32>} : memref<1x8x384xf32, #tpu.memory_space<vmem>>, vector<1x8x128xf32>,
    return
  }
  func.func @transform_0(%arg0: i32) -> (i32, i32) {
    %c0_i32 = arith.constant 0 : i32
    %c0_i32_0 = arith.constant 0 : i32
    return %c0_i32, %arg0 : i32, i32
  }
  func.func @transform_1(%arg0: i32) -> (i32, i32) {
    %c0_i32 = arith.constant 0 : i32
    %c0_i32_0 = arith.constant 0 : i32
    return %arg0, %c0_i32 : i32, i32
  }
  func.func @transform_2(%arg0: i32) -> (i32, i32) {
    %c0_i32 = arith.constant 0 : i32
    %c0_i32_0 = arith.constant 0 : i32
    %c0_i32_1 = arith.constant 0 : i32
    return %c0_i32, %c0_i32_0 : i32, i32
  }
  func.func @transform_3(%arg0: i32) -> (i32, i32) {
    %c0_i32 = arith.constant 0 : i32
    %c0_i32_0 = arith.constant 0 : i32
    %c0_i32_1 = arith.constant 0 : i32
    return %c0_i32, %c0_i32_0 : i32, i32
  }
  func.func @transform_4(%arg0: i32) -> (i32, i32) {
    %c0_i32 = arith.constant 0 : i32
    %c0_i32_0 = arith.constant 0 : i32
    return %arg0, %c0_i32 : i32, i32
  }
  func.func @transform_5(%arg0: i32) -> (i32, i32) {
    %c0_i32 = arith.constant 0 : i32
    %c0_i32_0 = arith.constant 0 : i32
    %c0_i32_1 = arith.constant 0 : i32
    return %c0_i32, %c0_i32_0 : i32, i32
  }
  func.func @transform_6(%arg0: i32) -> (i32, i32) {
    %c0_i32 = arith.constant 0 : i32
    %c0_i32_0 = arith.constant 0 : i32
    %c0_i32_1 = arith.constant 0 : i32
    return %c0_i32, %c0_i32_0 : i32, i32
  }
  func.func @transform_7(%arg0: i32) -> (i32, i32) {
    %c0_i32 = arith.constant 0 : i32
    %c0_i32_0 = arith.constant 0 : i32
    return %arg0, %c0_i32 : i32, i32
  }
  func.func @transform_8(%arg0: i32) -> (i32, i32) {
    %c0_i32 = arith.constant 0 : i32
    %c0_i32_0 = arith.constant 0 : i32
    %c0_i32_1 = arith.constant 0 : i32
    return %c0_i32, %c0_i32_0 : i32, i32
  }
  func.func @transform_9(%arg0: i32) -> (i32, i32) {
    %c0_i32 = arith.constant 0 : i32
    %c0_i32_0 = arith.constant 0 : i32
    %c0_i32_1 = arith.constant 0 : i32
    return %c0_i32, %c0_i32_0 : i32, i32
  }
  func.func @transform_10(%arg0: i32) -> (i32, i32) {
    %c0_i32 = arith.constant 0 : i32
    %c0_i32_0 = arith.constant 0 : i32
    return %arg0, %c0_i32 : i32, i32
  }
  func.func @transform_11(%arg0: i32) -> (i32, i32, i32) {
    %c0_i32 = arith.constant 0 : i32
    %c0_i32_0 = arith.constant 0 : i32
    %c0_i32_1 = arith.constant 0 : i32
    return %arg0, %c0_i32, %c0_i32_0 : i32, i32, i32
  }
}

module attributes {stable_mosaic.version = 11 : i64} {
  func.func @kernel(%arg0: i32, %arg1: memref<128x256xbf16, #tpu.memory_space<vmem>>, %arg2: memref<256x128xbf16, #tpu.memory_space<vmem>>, %arg3: memref<128x128xbf16, #tpu.memory_space<vmem>>, %arg4: memref<128x128xbf16, #tpu.memory_space<vmem>>, %arg5: memref<1x128xf32, #tpu.memory_space<vmem>>, %arg6: memref<128x128xbf16, #tpu.memory_space<vmem>>, %arg7: memref<1x128xf32, #tpu.memory_space<vmem>>, %arg8: memref<128x128xf32, #tpu.memory_space<vmem>>, %arg9: memref<8x128xf32, #tpu.memory_space<vmem>>) attributes {dimension_semantics = [#tpu.dimension_semantics<parallel>], iteration_bounds = array<i64: 2>, scalar_prefetch = 0 : i64, scratch_operands = 0 : i64, tpu.core_type = #tpu.core_type<tc>, window_params = [{transform_indices = @transform_0, window_bounds = array<i64: 128, 256>}, {pipeline_mode = #tpu.pipeline_mode<synchronous>, transform_indices = @transform_1, window_bounds = array<i64: 256, 128>}, {transform_indices = @transform_2, window_bounds = array<i64: 128, 128>}, {pipeline_mode = #tpu.pipeline_mode<synchronous>, transform_indices = @transform_3, window_bounds = array<i64: 128, 128>}, {pipeline_mode = #tpu.pipeline_mode<synchronous>, transform_indices = @transform_4, window_bounds = array<i64: 1, 128>}, {pipeline_mode = #tpu.pipeline_mode<synchronous>, transform_indices = @transform_5, window_bounds = array<i64: 128, 128>}, {pipeline_mode = #tpu.pipeline_mode<synchronous>, transform_indices = @transform_6, window_bounds = array<i64: 1, 128>}, {transform_indices = @transform_7, window_bounds = array<i64: 128, 128>}, {transform_indices = @transform_8, window_bounds = array<i64: 8, 128>}]} {
    %c0 = arith.constant 0 : index
    %c0_0 = arith.constant 0 : index
    %0 = vector.load %arg1[%c0, %c0_0] : memref<128x256xbf16, #tpu.memory_space<vmem>>, vector<128x256xbf16>
    %c0_1 = arith.constant 0 : index
    %c0_2 = arith.constant 0 : index
    %1 = vector.load %arg2[%c0_1, %c0_2] : memref<256x128xbf16, #tpu.memory_space<vmem>>, vector<256x128xbf16>
    %cst = arith.constant dense<0.000000e+00> : vector<128x128xf32>
    %2 = tpu.matmul %0, %1, %cst {dimension_numbers = #tpu.dot_dimension_numbers<[1], [0], [0], [1], [0, 0, 1, 1], [], []>} : vector<128x256xbf16>, vector<256x128xbf16>, vector<128x128xf32> -> vector<128x128xf32>
    %c0_3 = arith.constant 0 : index
    %c0_4 = arith.constant 0 : index
    %3 = vector.load %arg3[%c0_3, %c0_4] : memref<128x128xbf16, #tpu.memory_space<vmem>>, vector<128x128xbf16>
    %4 = arith.extf %3 : vector<128x128xbf16> to vector<128x128xf32>
    %5 = arith.addf %4, %2 : vector<128x128xf32>
    %6 = arith.truncf %5 : vector<128x128xf32> to vector<128x128xbf16>
    %c0_5 = arith.constant 0 : index
    %c0_6 = arith.constant 0 : index
    %7 = vector.load %arg4[%c0_5, %c0_6] : memref<128x128xbf16, #tpu.memory_space<vmem>>, vector<128x128xbf16>
    %cst_7 = arith.constant dense<0.000000e+00> : vector<128x128xf32>
    %8 = tpu.matmul %6, %7, %cst_7 {dimension_numbers = #tpu.dot_dimension_numbers<[1], [0], [0], [1], [0, 0, 1, 1], [], []>} : vector<128x128xbf16>, vector<128x128xbf16>, vector<128x128xf32> -> vector<128x128xf32>
    %c0_8 = arith.constant 0 : index
    %c0_9 = arith.constant 0 : index
    %9 = vector.load %arg5[%c0_8, %c0_9] : memref<1x128xf32, #tpu.memory_space<vmem>>, vector<1x128xf32>
    %10 = vector.broadcast %9 : vector<1x128xf32> to vector<128x128xf32>
    %11 = arith.addf %8, %10 : vector<128x128xf32>
    %cst_10 = arith.constant 0.000000e+00 : f32
    %12 = vector.broadcast %cst_10 : f32 to vector<128x128xf32>
    %13 = arith.maximumf %11, %12 : vector<128x128xf32>
    %14 = arith.truncf %13 : vector<128x128xf32> to vector<128x128xbf16>
    %c0_11 = arith.constant 0 : index
    %c0_12 = arith.constant 0 : index
    %15 = vector.load %arg6[%c0_11, %c0_12] : memref<128x128xbf16, #tpu.memory_space<vmem>>, vector<128x128xbf16>
    %cst_13 = arith.constant dense<0.000000e+00> : vector<128x128xf32>
    %16 = tpu.matmul %14, %15, %cst_13 {dimension_numbers = #tpu.dot_dimension_numbers<[1], [0], [0], [1], [0, 0, 1, 1], [], []>} : vector<128x128xbf16>, vector<128x128xbf16>, vector<128x128xf32> -> vector<128x128xf32>
    %c0_14 = arith.constant 0 : index
    %c0_15 = arith.constant 0 : index
    %17 = vector.load %arg7[%c0_14, %c0_15] : memref<1x128xf32, #tpu.memory_space<vmem>>, vector<1x128xf32>
    %18 = vector.broadcast %17 : vector<1x128xf32> to vector<128x128xf32>
    %19 = arith.addf %16, %18 : vector<128x128xf32>
    %cst_16 = arith.constant 0.000000e+00 : f32
    %20 = vector.broadcast %cst_16 : f32 to vector<128x128xf32>
    %21 = arith.maximumf %19, %20 : vector<128x128xf32>
    %c128_i32 = arith.constant 128 : i32
    %22 = arith.muli %arg0, %c128_i32 : i32
    %23 = tpu.iota {dimensions = array<i32: 0>} : vector<128x128xi32>
    %24 = vector.broadcast %22 : i32 to vector<128x128xi32>
    %25 = arith.addi %24, %23 : vector<128x128xi32>
    %c160_i32 = arith.constant 160 : i32
    %26 = vector.broadcast %c160_i32 : i32 to vector<128x128xi32>
    %27 = arith.cmpi slt, %25, %26 : vector<128x128xi32>
    %cst_17 = arith.constant 0.000000e+00 : f32
    %28 = vector.broadcast %cst_17 : f32 to vector<128x128xf32>
    %29 = arith.select %27, %21, %28 : vector<128x128xi1>, vector<128x128xf32>
    %c0_18 = arith.constant 0 : index
    %c0_19 = arith.constant 0 : index
    %30 = vector.load %arg8[%c0_18, %c0_19] : memref<128x128xf32, #tpu.memory_space<vmem>>, vector<128x128xf32>
    tpu.vector_store %arg8[%c0_18, %c0_19], %29 {strides = array<i32>} : memref<128x128xf32, #tpu.memory_space<vmem>>, vector<128x128xf32>,
    %cst_20 = arith.constant dense<0.000000e+00> : vector<128xf32>
    %31 = vector.multi_reduction <add>, %29, %cst_20 [0] : vector<128x128xf32> to vector<128xf32>
    %32 = vector.shape_cast %31 : vector<128xf32> to vector<1x128xf32>
    %33 = arith.mulf %29, %29 : vector<128x128xf32>
    %cst_21 = arith.constant dense<0.000000e+00> : vector<128xf32>
    %34 = vector.multi_reduction <add>, %33, %cst_21 [0] : vector<128x128xf32> to vector<128xf32>
    %35 = vector.shape_cast %34 : vector<128xf32> to vector<1x128xf32>
    %36 = tpu.iota {dimensions = array<i32: 0>} : vector<8x128xi32>
    %c0_i32 = arith.constant 0 : i32
    %37 = vector.broadcast %c0_i32 : i32 to vector<8x128xi32>
    %38 = arith.cmpi eq, %36, %37 : vector<8x128xi32>
    %cst_22 = arith.constant 0.000000e+00 : f32
    %39 = vector.shape_cast %32 : vector<1x128xf32> to vector<1x128xf32>
    %40 = vector.broadcast %39 : vector<1x128xf32> to vector<8x128xf32>
    %41 = vector.broadcast %cst_22 : f32 to vector<8x128xf32>
    %42 = arith.select %38, %40, %41 : vector<8x128xi1>, vector<8x128xf32>
    %c1_i32 = arith.constant 1 : i32
    %43 = vector.broadcast %c1_i32 : i32 to vector<8x128xi32>
    %44 = arith.cmpi eq, %36, %43 : vector<8x128xi32>
    %cst_23 = arith.constant 0.000000e+00 : f32
    %45 = vector.shape_cast %35 : vector<1x128xf32> to vector<1x128xf32>
    %46 = vector.broadcast %45 : vector<1x128xf32> to vector<8x128xf32>
    %47 = vector.broadcast %cst_23 : f32 to vector<8x128xf32>
    %48 = arith.select %44, %46, %47 : vector<8x128xi1>, vector<8x128xf32>
    %49 = arith.addf %42, %48 : vector<8x128xf32>
    %c0_24 = arith.constant 0 : index
    %c0_25 = arith.constant 0 : index
    %50 = vector.load %arg9[%c0_24, %c0_25] : memref<8x128xf32, #tpu.memory_space<vmem>>, vector<8x128xf32>
    tpu.vector_store %arg9[%c0_24, %c0_25], %49 {strides = array<i32>} : memref<8x128xf32, #tpu.memory_space<vmem>>, vector<8x128xf32>,
    return
  }
  func.func @transform_0(%arg0: i32) -> (i32, i32) {
    %c0_i32 = arith.constant 0 : i32
    %c0_i32_0 = arith.constant 0 : i32
    return %arg0, %c0_i32 : i32, i32
  }
  func.func @transform_1(%arg0: i32) -> (i32, i32) {
    %c0_i32 = arith.constant 0 : i32
    %c0_i32_0 = arith.constant 0 : i32
    %c0_i32_1 = arith.constant 0 : i32
    return %c0_i32, %c0_i32_0 : i32, i32
  }
  func.func @transform_2(%arg0: i32) -> (i32, i32) {
    %c0_i32 = arith.constant 0 : i32
    %c0_i32_0 = arith.constant 0 : i32
    return %arg0, %c0_i32 : i32, i32
  }
  func.func @transform_3(%arg0: i32) -> (i32, i32) {
    %c0_i32 = arith.constant 0 : i32
    %c0_i32_0 = arith.constant 0 : i32
    %c0_i32_1 = arith.constant 0 : i32
    return %c0_i32, %c0_i32_0 : i32, i32
  }
  func.func @transform_4(%arg0: i32) -> (i32, i32) {
    %c0_i32 = arith.constant 0 : i32
    %c0_i32_0 = arith.constant 0 : i32
    %c0_i32_1 = arith.constant 0 : i32
    return %c0_i32, %c0_i32_0 : i32, i32
  }
  func.func @transform_5(%arg0: i32) -> (i32, i32) {
    %c0_i32 = arith.constant 0 : i32
    %c0_i32_0 = arith.constant 0 : i32
    %c0_i32_1 = arith.constant 0 : i32
    return %c0_i32, %c0_i32_0 : i32, i32
  }
  func.func @transform_6(%arg0: i32) -> (i32, i32) {
    %c0_i32 = arith.constant 0 : i32
    %c0_i32_0 = arith.constant 0 : i32
    %c0_i32_1 = arith.constant 0 : i32
    return %c0_i32, %c0_i32_0 : i32, i32
  }
  func.func @transform_7(%arg0: i32) -> (i32, i32) {
    %c0_i32 = arith.constant 0 : i32
    %c0_i32_0 = arith.constant 0 : i32
    return %arg0, %c0_i32 : i32, i32
  }
  func.func @transform_8(%arg0: i32) -> (i32, i32) {
    %c0_i32 = arith.constant 0 : i32
    %c0_i32_0 = arith.constant 0 : i32
    return %arg0, %c0_i32 : i32, i32
  }
}

</mosaic_0001>

<bundles_post_ra>
// kernel: gin_encoder_forward.7
= control target key start
LH: loop header
LB: loop body
LE: loop exit
PB: predicated region body
PF: predicated region fallthrough
CT: control target
= control target key end

     0   :  { %s414_s12 = smov 0   ;;  %s465_s0 = inlined_call_operand.vmem [shape: f32[256,128], index: 0, kind: input, shape index: {}]   ;;  %s466_s1 = inlined_call_operand.vmem [shape: f32[1,128], index: 1, kind: input, shape index: {}]   ;;  %s467_s2 = inlined_call_operand.vmem [shape: f32[1,128], index: 2, kind: input, shape index: {}]   ;;  %s468_s3 = inlined_call_operand.vmem [shape: bf16[256,128], index: 3, kind: output, shape index: {}]  }
   0x1 LB: > { %s318_s13 = sadd.s32 4294967295, %s392_s12   ;;  %p322_p0 = scmp.ge.s32.totalorder %s392_s12, 1  ;;  %s392_s12 = sphi %s414_s12, %s13_s12  }
   0x2   : > { %p138_p1 = scmp.lt.s32.totalorder %s392_s12, 3 }
   0x4   : > { %p139_p2 = pnand %p322_p0, %p138_p1 }
   0x5   : > { %s323_s14 = sshll.u32 (!%p139_p2), %s318_s13, 4 }
   0x6   : > { %142 = sbr.rel (%p139_p2) target bundleno = 30 (0x1e), region = 32  ;;  %p163_p3 = scmp.lt.s32.totalorder (!%p139_p2), %s323_s14, 31 }
   0xb   : > { %s470_s14 = smov (!%p163_p3, %s323_s14), 31  ;;  %v384_v0 = vld [vmem:[%s466_s1] ss:$0 sm:$0xff] }
   0xc   : > { %s324_s17 = sshll.u32 %s470_s14, 3  ;;  %v385_v1 = vld [vmem:[%s467_s2] ss:$0 sm:$0xff]  ;;  %s326_s23 = sshll.u32 %s470_s14, 2 }
   0xd   : > { %s428_s20 = scalar_lea.vmem %s465_s0, %s324_s17  ;;  %s447_s26 = scalar_lea.vmem %s468_s3, %s326_s23 }
   0xe   : > { %v174_v2 = vld [vmem:[%s428_s20] sm:$0xff]  ;;  %v175_v3 = vld [vmem:[%s428_s20 + $0x8] sm:$0xff]  ;;  %v176_v4 = vld [vmem:[%s428_s20 + $0x10] sm:$0xff] }
   0xf   : > { %v194_v5 = vmul.f32 %v384_v0, %v174_v2  ;;  %v195_v6 = vmul.f32 %v384_v0, %v175_v3  ;;  %v177_v7 = vld [vmem:[%s428_s20 + $0x18] sm:$0xff]  ;;  %v196_v8 = vmul.f32 %v384_v0, %v176_v4  ;;  %v178_v9 = vld [vmem:[%s428_s20 + $0x20] sm:$0xff]  ;;  %v179_v10 = vld [vmem:[%s428_s20 + $0x28] sm:$0xff] }
  0x10   : > { %v197_v11 = vmul.f32 %v384_v0, %v177_v7  ;;  %v198_v12 = vmul.f32 %v384_v0, %v178_v9  ;;  %v199_v13 = vmul.f32 %v384_v0, %v179_v10  ;;  %v180_v14 = vld [vmem:[%s428_s20 + $0x30] sm:$0xff]  ;;  %v181_v15 = vld [vmem:[%s428_s20 + $0x38] sm:$0xff]  ;;  %v182_v16 = vld [vmem:[%s428_s20 + $0x40] sm:$0xff] }
  0x11   : > { %v214_v17 = vadd.f32 %v385_v1, %v194_v5  ;;  %v215_v18 = vadd.f32 %v385_v1, %v195_v6  ;;  %v216_v19 = vadd.f32 %v385_v1, %v196_v8  ;;  %v200_v20 = vmul.f32 %v384_v0, %v180_v14  ;;  %v183_v21 = vld [vmem:[%s428_s20 + $0x48] sm:$0xff]  ;;  %v184_v22 = vld [vmem:[%s428_s20 + $0x50] sm:$0xff]  ;;  %v185_v27 = vld [vmem:[%s428_s20 + $0x58] sm:$0xff] }
  0x12   : > { %v217_v23 = vadd.f32 %v385_v1, %v197_v11  ;;  %v218_v24 = vadd.f32 %v385_v1, %v198_v12  ;;  %v219_v25 = vadd.f32 %v385_v1, %v199_v13  ;;  %v201_v26 = vmul.f32 %v384_v0, %v181_v15  ;;  %v186_v28 = vld [vmem:[%s428_s20 + $0x60] sm:$0xff]  ;;  %v187_v33 = vld [vmem:[%s428_s20 + $0x68] sm:$0xff]  ;;  %v188_v34 = vld [vmem:[%s428_s20 + $0x70] sm:$0xff] }
  0x13   : > { %v332_v29 = vpack.c.bf16 %v215_v18, %v214_v17  ;;  %v220_v30 = vadd.f32 %v385_v1, %v200_v20  ;;  %v202_v31 = vmul.f32 %v384_v0, %v182_v16  ;;  %v203_v32 = vmul.f32 %v384_v0, %v183_v21  ;;  %v189_v39 = vld [vmem:[%s428_s20 + $0x78] sm:$0xff] }
  0x14   : > { %v337_v35 = vpack.c.bf16 %v217_v23, %v216_v19  ;;  %v342_v36 = vpack.c.bf16 %v219_v25, %v218_v24  ;;  %v221_v37 = vadd.f32 %v385_v1, %v201_v26  ;;  %v204_v38 = vmul.f32 %v384_v0, %v184_v22 }
  0x15   : > { %333 = vst [vmem:[%s447_s26] sm:$0xff] %v332_v29   ;;  %v222_v40 = vadd.f32 %v385_v1, %v202_v31  ;;  %v223_v41 = vadd.f32 %v385_v1, %v203_v32  ;;  %v205_v42 = vmul.f32 %v384_v0, %v185_v27  ;;  %v206_v43 = vmul.f32 %v384_v0, %v186_v28 }
  0x16   : > { %369 = vst [vmem:[%s447_s26 + $0x8] sm:$0xff] %v337_v35   ;;  %v347_v44 = vpack.c.bf16 %v221_v37, %v220_v30  ;;  %v224_v45 = vadd.f32 %v385_v1, %v204_v38  ;;  %v207_v46 = vmul.f32 %v384_v0, %v187_v33  ;;  %v208_v47 = vmul.f32 %v384_v0, %v188_v34 }
  0x17   : > { %370 = vst [vmem:[%s447_s26 + $0x10] sm:$0xff] %v342_v36   ;;  %v352_v48 = vpack.c.bf16 %v223_v41, %v222_v40  ;;  %v225_v49 = vadd.f32 %v385_v1, %v205_v42  ;;  %v226_v50 = vadd.f32 %v385_v1, %v206_v43  ;;  %v209_v51 = vmul.f32 %v384_v0, %v189_v39 }
  0x18   : > { %371 = vst [vmem:[%s447_s26 + $0x18] sm:$0xff] %v347_v44   ;;  %v227_v52 = vadd.f32 %v385_v1, %v207_v46  ;;  %v228_v53 = vadd.f32 %v385_v1, %v208_v47 }
  0x19   : > { %372 = vst [vmem:[%s447_s26 + $0x20] sm:$0xff] %v352_v48   ;;  %v357_v54 = vpack.c.bf16 %v225_v49, %v224_v45  ;;  %v229_v55 = vadd.f32 %v385_v1, %v209_v51 }
  0x1a   : > { %v362_v56 = vpack.c.bf16 %v227_v52, %v226_v50 }
  0x1b   : > { %373 = vst [vmem:[%s447_s26 + $0x28] sm:$0xff] %v357_v54   ;;  %v367_v57 = vpack.c.bf16 %v229_v55, %v228_v53 }
  0x1c   : > { %374 = vst [vmem:[%s447_s26 + $0x30] sm:$0xff] %v362_v56  }
  0x1d   : > { %375 = vst [vmem:[%s447_s26 + $0x38] sm:$0xff] %v367_v57  }
  0x1e PF: > { %s13_s12 = sadd.s32 1, %s392_s12  }
  0x1f   : > { %p10_p4 = scmp.ge.s32.totalorder %s13_s12, 4  }
  0x21   :  { %12 = sbr.rel (!%p10_p4) target bundleno = 1 (0x1), region = 62 }

// kernel: gin_encoder_forward.11
= control target key start
LH: loop header
LB: loop body
LE: loop exit
PB: predicated region body
PF: predicated region fallthrough
CT: control target
= control target key end

     0   :  { %s1493_s0 = inlined_call_operand.vmem [shape: f32[8,256], index: 0, kind: input, shape index: {}]   ;;  %s1494_s1 = inlined_call_operand.vmem [shape: f32[256,128], index: 1, kind: input, shape index: {}]   ;;  %s1495_s2 = inlined_call_operand.vmem [shape: f32[1,128], index: 2, kind: input, shape index: {}]   ;;  %s1496_s3 = inlined_call_operand.vmem [shape: f32[1,128], index: 3, kind: input, shape index: {}]   ;;  %s1497_s4 = inlined_call_operand.vmem [shape: f32[256,128], index: 4, kind: input, shape index: {}]   ;;  %s1498_s5 = inlined_call_operand.vmem [shape: f32[1,128], index: 5, kind: input, shape index: {}]   ;;  %s1499_s6 = inlined_call_operand.vmem [shape: f32[1,128], index: 6, kind: input, shape index: {}]   ;;  %s1500_s7 = inlined_call_operand.vmem [shape: f32[256,128], index: 7, kind: input, shape index: {}]   ;;  %s1501_s8 = inlined_call_operand.vmem [shape: f32[1,128], index: 8, kind: input, shape index: {}]   ;;  %s1502_s9 = inlined_call_operand.vmem [shape: f32[1,128], index: 9, kind: input, shape index: {}]   ;;  %s1503_s10 = inlined_call_operand.hbm [shape: f32[256,384], index: 10, kind: output, shape index: {0}]   ;;  %s1504_s11 = inlined_call_operand.vmem [shape: f32[2,8,384], index: 11, kind: output, shape index: {1}]  }
   0x1   :  { %1506 = sst [smem:[#allocation7_spill]] %s1493_s0 }
   0x2   :  { %1507 = sst [smem:[#allocation8_spill]] %s1494_s1 }
   0x3   :  { %1508 = sst [smem:[#allocation9_spill]] %s1501_s8 }
   0x4   :  { %17 = vsyncpa [#allocation3], 0 }
   0x5   :  { %19 = vsyncpa [#allocation3 + $0x1], 0  ;;  %s1083_s17 = smov 0   ;;  %s1085_s18 = smov 0  }
   0x6   :  { %s1087_s19 = smov 0   ;;  %s1089_s20 = smov 0  }
   0x7 LB: > { %1509 = sst [smem:[#allocation5_spill]] %s1015_s19  ;;  %s1104_s21 = sadd.s32 4294967295, %s1019_s20   ;;  %s1019_s20 = sphi %s1089_s20, %s1520_s20   ;;  %s1015_s19 = sphi %s1087_s19, %s1517_s19   ;;  %s1011_s18 = sphi %s1085_s18, %s1519_s18   ;;  %s1007_s17 = sphi %s1083_s17, %s1518_s17  }
   0x8   : > { %s890_s22 = sadd.s32 4294967294, %s1019_s20   ;;  %s1108_s23 = sadd.s32 1, %s1019_s20  }
   0x9   : > { %s262_s24 = sadd.s32 1, %s1015_s19  ;;  %s259_s25 = ssub.s32 %s1019_s20, %s1108_s23 }
   0xa   : > { %p272_p0 = scmp.ne.s32.totalorder %s1015_s19, %s1011_s18  ;;  %p260_p1 = scmp.eq.s32.totalorder %s259_s25, 0 }
   0xb   : > { %p273_p2 = scmp.eq.s32.totalorder %s1104_s21, 1  ;;  %p278_p3 = scmp.ne.s32.totalorder %s1011_s18, %s1007_s17 }
   0xc   : > { %p279_p4 = scmp.eq.s32.totalorder %s890_s22, 1  ;;  %p893_p7 = scmp.ge.s32.totalorder %s1019_s20, 1 }
   0xd   : > { %s1119_s26 = scalar_select %p260_p1, %s1015_s19, %s262_s24  }
   0xe   : > { %p1121_p5 = por %p273_p2, %p272_p0  ;;  %p1125_p6 = por %p279_p4, %p278_p3 }
   0xf   : > { %1510 = sst [smem:[#allocation6_spill]] %s1119_s26  ;;  %p375_p8 = scmp.lt.s32.totalorder %s1019_s20, 3 }
  0x11   : > { %p376_p9 = pnand %p893_p7, %p375_p8 }
  0x12   : > { %s895_s29 = sshll.u32 (!%p376_p9), %s1104_s21, 4  ;;  %s424_s30 = sand.u32 (!%p376_p9), 1, %s1011_s18  }
  0x13   : > { %379 = sbr.rel (%p376_p9) target bundleno = 199 (0xc7), region = 60  ;;  %p439_p10 = scmp.lt.s32.totalorder (!%p376_p9), %s895_s29, 31 }
  0x14   : > { %s1513_s8 = sld [smem:[#allocation9_spill]] (!%p376_p9)  ;;  %s1140_s14 = smul.u32 (!%p376_p9), 384, %s424_s30 }
  0x15   : > { %s1514_s1 = sld [smem:[#allocation8_spill]] (!%p376_p9)  ;;  %p434_p11 = scmp.lt.s32.totalorder (!%p376_p9), %s1104_s21, 1 }
  0x16   : > { %s1515_s0 = sld [smem:[#allocation7_spill]] (!%p376_p9)  ;;  %s909_s25 = smul.u32 (!%p376_p9), 384, %s1104_s21 }
  0x18   : > { %s1522_s29 = smov (!%p439_p10, %s895_s29), 31  ;;  %v1145_v1 = vld [vmem:[%s1495_s2] ss:$0 sm:$0xff]  ;;  %s760_s26 = scalar_lea.hbm %s1503_s10, %s909_s25 }
  0x19   : > { %s896_s15 = sshll.u32 %s1522_s29, 3  ;;  %v1150_v2 = vld [vmem:[%s1498_s5] ss:$0 sm:$0xff]  ;;  %s977_s25 = scalar_lea.hbm %s1503_s10, 768 }
  0x1a   : > { %v1136_v0 = vld [vmem:[%s1513_s8] ss:$0 sm:$0xff]  ;;  %s1155_s12 = scalar_lea.vmem %s1500_s7, %s896_s15  ;;  %s1183_s29 = scalar_lea.vmem %s1497_s4, %s896_s15 }
  0x1b   : > { %v1160_v3 = vld [vmem:[%s1502_s9] ss:$0 sm:$0xff]  ;;  %s1165_s22 = scalar_lea.vmem %s1514_s1, %s896_s15  ;;  %v664_v6 = vld [vmem:[%s1155_s12 + $0x78] sm:$0xff]  ;;  %v663_v7 = vld [vmem:[%s1155_s12 + $0x70] sm:$0xff]  ;;  %s1209_s15 = scalar_lea.vmem [#allocation2], %s1140_s14 }
  0x1c   : > { %v1170_v4 = vld [vmem:[%s1496_s3] ss:$0 sm:$0xff]  ;;  %v662_v8 = vld [vmem:[%s1155_s12 + $0x68] sm:$0xff]  ;;  %v684_v9 = vmul.f32 %v1136_v0, %v664_v6  ;;  %v683_v10 = vmul.f32 %v1136_v0, %v663_v7  ;;  %v478_v12 = vld [vmem:[%s1165_s22 + $0x78] sm:$0xff]  ;;  %s1357_s14 = scalar_select %p434_p11, %s1104_s21, 1 }
  0x1d   : > { %v1175_v5 = vld [vmem:[%s1499_s6] ss:$0 sm:$0xff]  ;;  %v682_v11 = vmul.f32 %v1136_v0, %v662_v8  ;;  %v571_v13 = vld [vmem:[%s1183_s29 + $0x78] sm:$0xff]  ;;  %v498_v15 = vmul.f32 %v1145_v1, %v478_v12  ;;  %v477_v17 = vld [vmem:[%s1165_s22 + $0x70] sm:$0xff]  ;;  %s761_s13 = sshll.u32 %s1209_s15, 4  ;;  %s743_s21 = scalar_lea.sflag [#allocation3], %s424_s30  ;;  %s762_s13 = int_to_ptr.vmem [resolvable:$true] %s761_s13 }
  0x1e   : > { %v661_v14 = vld [vmem:[%s1155_s12 + $0x60] sm:$0xff]  ;;  %v591_v16 = vmul.f32 %v1150_v2, %v571_v13  ;;  %v570_v18 = vld [vmem:[%s1183_s29 + $0x70] sm:$0xff]  ;;  %v660_v19 = vld [vmem:[%s1155_s12 + $0x58] sm:$0xff]  ;;  %v704_v20 = vadd.f32 %v1160_v3, %v684_v9  ;;  %v703_v21 = vadd.f32 %v1160_v3, %v683_v10  ;;  %v497_v23 = vmul.f32 %v1145_v1, %v477_v17 }
  0x1f   : > { %v681_v22 = vmul.f32 %v1136_v0, %v661_v14  ;;  %v476_v24 = vld [vmem:[%s1165_s22 + $0x68] sm:$0xff]  ;;  %v659_v26 = vld [vmem:[%s1155_s12 + $0x50] sm:$0xff]  ;;  %v702_v27 = vadd.f32 %v1160_v3, %v682_v11  ;;  %v518_v28 = vadd.f32 %v1170_v4, %v498_v15  ;;  %v590_v30 = vmul.f32 %v1150_v2, %v570_v18  ;;  %v475_v31 = vld [vmem:[%s1165_s22 + $0x60] sm:$0xff] }
  0x20   : > { %v569_v25 = vld [vmem:[%s1183_s29 + $0x68] sm:$0xff]  ;;  %v611_v29 = vadd.f32 %v1175_v5, %v591_v16  ;;  %720 = vst [vmem:[%s1209_s15 + $0x178] sm:$0xff] %v704_v20  ;;  %721 = vmatpush.msra.mxu2 %v704_v20  ;;  %v517_v32 = vadd.f32 %v1170_v4, %v497_v23  ;;  %v680_v33 = vmul.f32 %v1136_v0, %v660_v19  ;;  %v568_v35 = vld [vmem:[%s1183_s29 + $0x60] sm:$0xff]  ;;  %v474_v40 = vld [vmem:[%s1165_s22 + $0x58] sm:$0xff] }
  0x21   : > { %v496_v34 = vmul.f32 %v1145_v1, %v476_v24  ;;  %719 = vst [vmem:[%s1209_s15 + $0x160] sm:$0xff] %v703_v21  ;;  %535 = vmatpush.msra.mxu0 %v518_v28  ;;  %v610_v36 = vadd.f32 %v1175_v5, %v590_v30  ;;  %v589_v37 = vmul.f32 %v1150_v2, %v569_v25  ;;  %v658_v39 = vld [vmem:[%s1155_s12 + $0x48] sm:$0xff]  ;;  %v567_v44 = vld [vmem:[%s1183_s29 + $0x58] sm:$0xff]  ;;  %v657_v48 = vld [vmem:[%s1155_s12 + $0x40] sm:$0xff] }
  0x22   : > { %628 = vmatpush.msra.mxu1 %v611_v29  ;;  %v679_v38 = vmul.f32 %v1136_v0, %v659_v26  ;;  %722 = vmatpush.msra.mxu2 %v703_v21  ;;  %718 = vst [vmem:[%s1209_s15 + $0x148] sm:$0xff] %v702_v27  ;;  %v701_v41 = vadd.f32 %v1160_v3, %v681_v22  ;;  %v473_v49 = vld [vmem:[%s1165_s22 + $0x50] sm:$0xff]  ;;  %v656_v57 = vld [vmem:[%s1155_s12 + $0x38] sm:$0xff]  ;;  %v472_v58 = vld [vmem:[%s1165_s22 + $0x48] sm:$0xff] }
  0x23   : > { %v516_v42 = vadd.f32 %v1170_v4, %v496_v34  ;;  %v495_v43 = vmul.f32 %v1145_v1, %v475_v31  ;;  %534 = vst [vmem:[%s1209_s15 + $0x168] sm:$0xff] %v518_v28  ;;  %536 = vmatpush.msra.mxu0 %v517_v32  ;;  %v700_v45 = vadd.f32 %v1160_v3, %v680_v33  ;;  %v566_v53 = vld [vmem:[%s1183_s29 + $0x50] sm:$0xff]  ;;  %v565_v62 = vld [vmem:[%s1183_s29 + $0x48] sm:$0xff]  ;;  %v471_v9 = vld [vmem:[%s1165_s22 + $0x40] sm:$0xff] }
  0x24   : > { %629 = vmatpush.msra.mxu1 %v610_v36  ;;  %v609_v46 = vadd.f32 %v1175_v5, %v589_v37  ;;  %v588_v47 = vmul.f32 %v1150_v2, %v568_v35  ;;  %723 = vmatpush.msra.mxu2 %v702_v27  ;;  %627 = vst [vmem:[%s1209_s15 + $0x170] sm:$0xff] %v611_v29  ;;  %v655_v63 = vld [vmem:[%s1155_s12 + $0x30] sm:$0xff]  ;;  %v564_v13 = vld [vmem:[%s1183_s29 + $0x40] sm:$0xff]  ;;  %v654_v17 = vld [vmem:[%s1155_s12 + $0x28] sm:$0xff] }
  0x25   : > { %v515_v50 = vadd.f32 %v1170_v4, %v495_v43  ;;  %v678_v51 = vmul.f32 %v1136_v0, %v658_v39  ;;  %v494_v52 = vmul.f32 %v1145_v1, %v474_v40  ;;  %717 = vst [vmem:[%s1209_s15 + $0x130] sm:$0xff] %v701_v41  ;;  %537 = vmatpush.msra.mxu0 %v516_v42  ;;  %v470_v18 = vld [vmem:[%s1165_s22 + $0x38] sm:$0xff]  ;;  %v653_v26 = vld [vmem:[%s1155_s12 + $0x20] sm:$0xff]  ;;  %v469_v27 = vld [vmem:[%s1165_s22 + $0x30] sm:$0xff] }
  0x26   : > { %630 = vmatpush.msra.mxu1 %v609_v46  ;;  %v699_v54 = vadd.f32 %v1160_v3, %v679_v38  ;;  %v608_v55 = vadd.f32 %v1175_v5, %v588_v47  ;;  %v587_v56 = vmul.f32 %v1150_v2, %v567_v44  ;;  %724 = vmatpush.msra.mxu2 %v701_v41  ;;  %v563_v22 = vld [vmem:[%s1183_s29 + $0x38] sm:$0xff]  ;;  %v562_v31 = vld [vmem:[%s1183_s29 + $0x30] sm:$0xff]  ;;  %v561_v40 = vld [vmem:[%s1183_s29 + $0x28] sm:$0xff] }
  0x27   : > { %533 = vst [vmem:[%s1209_s15 + $0x150] sm:$0xff] %v517_v32  ;;  %v514_v59 = vadd.f32 %v1170_v4, %v494_v52  ;;  %v677_v60 = vmul.f32 %v1136_v0, %v657_v48  ;;  %v493_v61 = vmul.f32 %v1145_v1, %v473_v49  ;;  %538 = vmatpush.msra.mxu0 %v515_v50  ;;  %v652_v35 = vld [vmem:[%s1155_s12 + $0x18] sm:$0xff]  ;;  %v651_v41 = vld [vmem:[%s1155_s12 + $0x10] sm:$0xff]  ;;  %v560_v49 = vld [vmem:[%s1183_s29 + $0x20] sm:$0xff] }
  0x28   : > { %626 = vst [vmem:[%s1209_s15 + $0x158] sm:$0xff] %v610_v36  ;;  %631 = vmatpush.msra.mxu1 %v608_v55  ;;  %v698_v6 = vadd.f32 %v1160_v3, %v678_v51  ;;  %v607_v7 = vadd.f32 %v1175_v5, %v587_v56  ;;  %v586_v8 = vmul.f32 %v1150_v2, %v566_v53  ;;  %v468_v36 = vld [vmem:[%s1165_s22 + $0x28] sm:$0xff] }
  0x29   : > { %716 = vst [vmem:[%s1209_s15 + $0x118] sm:$0xff] %v700_v45  ;;  %725 = vmatpush.msra.mxu2 %v700_v45  ;;  %v1257_v10 = vadd.f32 %v1170_v4, %v493_v61  ;;  %v676_v11 = vmul.f32 %v1136_v0, %v656_v57  ;;  %v492_v12 = vmul.f32 %v1145_v1, %v472_v58  ;;  %v467_v45 = vld [vmem:[%s1165_s22 + $0x20] sm:$0xff]  ;;  %v650_v53 = vld [vmem:[%s1155_s12 + $0x8] sm:$0xff]  ;;  %v559_v58 = vld [vmem:[%s1183_s29 + $0x18] sm:$0xff] }
  0x2a   : > { %532 = vst [vmem:[%s1209_s15 + $0x138] sm:$0xff] %v516_v42  ;;  %539 = vmatpush.msra.mxu0 %v514_v59  ;;  %632 = vmatpush.msra.mxu1 %v607_v7  ;;  %v1264_v14 = vadd.f32 %v1175_v5, %v586_v8  ;;  %v585_v15 = vmul.f32 %v1150_v2, %v565_v62  ;;  %v649_v62 = vld [vmem:[%s1155_s12] sm:$0xff]  ;;  %s894_s12 = sshll.u32 %s1357_s14, 3 }
  0x2b   : > { %v675_v16 = vmul.f32 %v1136_v0, %v655_v63  ;;  %625 = vst [vmem:[%s1209_s15 + $0x140] sm:$0xff] %v609_v46  ;;  %726 = vmatpush.msra.mxu2 %v699_v54  ;;  %v697_v19 = vadd.f32 %v1160_v3, %v677_v60  ;;  %v1273_v20 = vadd.f32 %v1170_v4, %v492_v12  ;;  %v465_v63 = vld [vmem:[%s1165_s22 + $0x10] sm:$0xff]  ;;  %s437_s24 = scalar_lea.vmem %s1515_s0, %s894_s12 }
  0x2c   : > { %v491_v21 = vmul.f32 %v1145_v1, %v471_v9  ;;  %715 = vst [vmem:[%s1209_s15 + $0x100] sm:$0xff] %v699_v54  ;;  %540 = vmatpush.msra.mxu0 %v1257_v10  ;;  %633 = vmatpush.msra.mxu1 %v1264_v14  ;;  %v696_v23 = vadd.f32 %v1160_v3, %v676_v11  ;;  %v466_v54 = vld [vmem:[%s1165_s22 + $0x18] sm:$0xff]  ;;  %v558_v9 = vld [vmem:[%s1183_s29 + $0x10] sm:$0xff] }
  0x2d   : > { %v1282_v24 = vadd.f32 %v1175_v5, %v585_v15  ;;  %v584_v25 = vmul.f32 %v1150_v2, %v564_v13  ;;  %531 = vst [vmem:[%s1209_s15 + $0x120] sm:$0xff] %v515_v50  ;;  %727 = vmatpush.msra.mxu2 %v698_v6  ;;  %v674_v29 = vmul.f32 %v1136_v0, %v654_v17  ;;  %v464_v13 = vld [vmem:[%s1165_s22 + $0x8] sm:$0xff] }
  0x2e   : > { %v1289_v28 = vadd.f32 %v1170_v4, %v491_v21  ;;  %v490_v30 = vmul.f32 %v1145_v1, %v470_v18  ;;  %624 = vst [vmem:[%s1209_s15 + $0x128] sm:$0xff] %v608_v55  ;;  %541 = vmatpush.msra.mxu0 %v1273_v20  ;;  %v1298_v32 = vadd.f32 %v1160_v3, %v675_v16  ;;  %v463_v18 = vld [vmem:[%s1165_s22] sm:$0xff] }
  0x2f   : > { %634 = vmatpush.msra.mxu1 %v1282_v24  ;;  %v1301_v33 = vadd.f32 %v1175_v5, %v584_v25  ;;  %v583_v34 = vmul.f32 %v1150_v2, %v563_v22  ;;  %714 = vst [vmem:[%s1209_s15 + $0xe8] sm:$0xff] %v698_v6  ;;  %728 = vmatpush.msra.mxu2 %v697_v19 }
  0x30   : > { %v1308_v37 = vadd.f32 %v1170_v4, %v490_v30  ;;  %v673_v38 = vmul.f32 %v1136_v0, %v653_v26  ;;  %v489_v39 = vmul.f32 %v1145_v1, %v469_v27  ;;  %530 = vst [vmem:[%s1209_s15 + $0x108] sm:$0xff] %v514_v59  ;;  %542 = vmatpush.msra.mxu0 %v1289_v28 }
  0x31   : > { %635 = vmatpush.msra.mxu1 %v1301_v33  ;;  %v1319_v42 = vadd.f32 %v1160_v3, %v674_v29  ;;  %v1322_v43 = vadd.f32 %v1175_v5, %v583_v34  ;;  %v582_v44 = vmul.f32 %v1150_v2, %v562_v31  ;;  %623 = vst [vmem:[%s1209_s15 + $0x110] sm:$0xff] %v607_v7 }
  0x32   : > { %729 = vmatpush.msra.mxu2 %v696_v23  ;;  %v1328_v46 = vadd.f32 %v1170_v4, %v489_v39  ;;  %v672_v47 = vmul.f32 %v1136_v0, %v652_v35  ;;  %v488_v48 = vmul.f32 %v1145_v1, %v468_v36  ;;  %713 = vst [vmem:[%s1209_s15 + $0xd0] sm:$0xff] %v697_v19  ;;  %v556_v19 = vld [vmem:[%s1183_s29] sm:$0xff] }
  0x33   : > { %543 = vmatpush.msra.mxu0 %v1308_v37  ;;  %636 = vmatpush.msra.mxu1 %v1322_v43  ;;  %v1337_v50 = vadd.f32 %v1175_v5, %v582_v44  ;;  %v581_v51 = vmul.f32 %v1150_v2, %v561_v40  ;;  %v671_v52 = vmul.f32 %v1136_v0, %v651_v41 }
  0x34   : > { %529 = vst [vmem:[%s1209_s15 + $0xf0] sm:$0xff] %v1257_v10  ;;  %730 = vmatpush.msra.mxu2 %v1298_v32  ;;  %v1347_v55 = vadd.f32 %v1160_v3, %v673_v38  ;;  %v1350_v56 = vadd.f32 %v1170_v4, %v488_v48  ;;  %v487_v57 = vmul.f32 %v1145_v1, %v467_v45 }
  0x35   : > { %622 = vst [vmem:[%s1209_s15 + $0xf8] sm:$0xff] %v1264_v14  ;;  %544 = vmatpush.msra.mxu0 %v1328_v46  ;;  %637 = vmatpush.msra.mxu1 %v1337_v50  ;;  %v1364_v59 = vadd.f32 %v1160_v3, %v672_v47  ;;  %v1367_v60 = vadd.f32 %v1175_v5, %v581_v51  ;;  %v557_v14 = vld [vmem:[%s1183_s29 + $0x8] sm:$0xff]  ;;  %s763_s29 = sshll.u32 %s760_s26, 4  ;;  %s764_s29 = int_to_ptr.hbm [resolvable:$true] %s763_s29 }
  0x36   : > { %v580_v61 = vmul.f32 %v1150_v2, %v560_v49  ;;  %712 = vst [vmem:[%s1209_s15 + $0xb8] sm:$0xff] %v696_v23  ;;  %731 = vmatpush.msra.mxu2 %v1319_v42  ;;  %v1375_v6 = vadd.f32 %v1170_v4, %v487_v57  ;;  %v670_v7 = vmul.f32 %v1136_v0, %v650_v53  ;;  %s971_s12 = sshra.s32 %s764_s29, 4  ;;  %s972_s12 = int_to_ptr.hbm [resolvable:$true] %s971_s12 }
  0x37   : > { %v486_v8 = vmul.f32 %v1145_v1, %v466_v54  ;;  %528 = vst [vmem:[%s1209_s15 + $0xd8] sm:$0xff] %v1273_v20  ;;  %545 = vmatpush.msra.mxu0 %v1350_v56  ;;  %638 = vmatpush.msra.mxu1 %v1367_v60  ;;  %v691_v10 = vadd.f32 %v1160_v3, %v671_v52  ;;  %s973_s16 = scalar_lea.hbm %s972_s12, 384  ;;  %p978_p1 = scmp.lt.s32.totalorder %s972_s12, %s1503_s10 }
  0x38   : > { %v600_v11 = vadd.f32 %v1175_v5, %v580_v61  ;;  %v579_v12 = vmul.f32 %v1150_v2, %v559_v58  ;;  %621 = vst [vmem:[%s1209_s15 + $0xe0] sm:$0xff] %v1282_v24  ;;  %732 = vmatpush.msra.mxu2 %v1347_v55  ;;  %v669_v16 = vmul.f32 %v1136_v0, %v649_v62  ;;  %p974_p12 = scmp.ne.s32.totalorder %s972_s12, %s973_s16  ;;  %p979_p2 = scmp.lt.s32.totalorder %s977_s25, %s973_s16 }
  0x39   : > { %v506_v15 = vadd.f32 %v1170_v4, %v486_v8  ;;  %v485_v17 = vmul.f32 %v1145_v1, %v465_v63  ;;  %711 = vst [vmem:[%s1209_s15 + $0xa0] sm:$0xff] %v1298_v32  ;;  %546 = vmatpush.msra.mxu0 %v1375_v6  ;;  %v690_v20 = vadd.f32 %v1160_v3, %v670_v7 }
  0x3a   : > { %639 = vmatpush.msra.mxu1 %v600_v11  ;;  %v599_v21 = vadd.f32 %v1175_v5, %v579_v12  ;;  %v578_v22 = vmul.f32 %v1150_v2, %v558_v9  ;;  %527 = vst [vmem:[%s1209_s15 + $0xc0] sm:$0xff] %v1289_v28  ;;  %733 = vmatpush.msra.mxu2 %v1364_v59  ;;  %p975_p13 = pnand %p974_p12, %p1121_p5  ;;  %p980_p3 = por %p979_p2, %p978_p1 }
  0x3b   : > { %v505_v0 = vadd.f32 %v1170_v4, %v485_v17  ;;  %v484_v23 = vmul.f32 %v1145_v1, %v464_v13  ;;  %v577_v24 = vmul.f32 %v1150_v2, %v557_v14  ;;  %620 = vst [vmem:[%s1209_s15 + $0xc8] sm:$0xff] %v1301_v33  ;;  %547 = vmatpush.msra.mxu0 %v506_v15 }
  0x3c   : > { %640 = vmatpush.msra.mxu1 %v599_v21  ;;  %v598_v25 = vadd.f32 %v1175_v5, %v578_v22  ;;  %v483_v26 = vmul.f32 %v1145_v1, %v463_v18  ;;  %v576_v27 = vmul.f32 %v1150_v2, %v556_v19  ;;  %710 = vst [vmem:[%s1209_s15 + $0x88] sm:$0xff] %v1319_v42  ;;  %v462_v2 = vld [vmem:[%s437_s24] sm:$0xff]  ;;  %p976_p0 = pneg %p975_p13 }
  0x3d   : > { %734 = vmatpush.msra.mxu2 %v691_v10  ;;  %v689_v28 = vadd.f32 %v1160_v3, %v669_v16  ;;  %v504_v29 = vadd.f32 %v1170_v4, %v484_v23  ;;  %v597_v30 = vadd.f32 %v1175_v5, %v577_v24  ;;  %526 = vst [vmem:[%s1209_s15 + $0xa8] sm:$0xff] %v1308_v37 }
  0x3e   : > { %548 = vmatpush.msra.mxu0 %v505_v0  ;;  %641 = vmatpush.msra.mxu1 %v598_v25  ;;  %v503_v1 = vadd.f32 %v1170_v4, %v483_v26  ;;  %619 = vst [vmem:[%s1209_s15 + $0xb0] sm:$0xff] %v1322_v43  ;;  %v596_v3 = vadd.f32 %v1175_v5, %v576_v27  ;;  %p981_p4 = pnand %p980_p3, %p976_p0 }
  0x3f   : > { %735 = vmatpush.msra.mxu2 %v690_v20  ;;  %709 = vst [vmem:[%s1209_s15 + $0x70] sm:$0xff] %v1347_v55 }
  0x40   : > { %549 = vmatpush.msra.mxu0 %v504_v29  ;;  %642 = vmatpush.msra.mxu1 %v597_v30  ;;  %525 = vst [vmem:[%s1209_s15 + $0x90] sm:$0xff] %v1328_v46 }
  0x41   : > { %736 = vmatpush.msra.mxu2 %v689_v28  ;;  %618 = vst [vmem:[%s1209_s15 + $0x98] sm:$0xff] %v1337_v50 }
  0x42   : > { %737 = vmatmul.f32.vlgmr.msra.gmra.mxu2 %v462_v2  ;;  %550 = vmatpush.msra.mxu0 %v503_v1  ;;  %708 = vst [vmem:[%s1209_s15 + $0x58] sm:$0xff] %v1364_v59 }
  0x43   : > { %643 = vmatpush.msra.mxu1 %v596_v3  ;;  %551 = vmatmul.f32.vlgmr.msra.gmra.mxu0 %v462_v2  ;;  %524 = vst [vmem:[%s1209_s15 + $0x78] sm:$0xff] %v1350_v56 }
  0x44   : > { %644 = vmatmul.f32.vlgmr.msra.gmra.mxu1 %v462_v2  ;;  %617 = vst [vmem:[%s1209_s15 + $0x80] sm:$0xff] %v1367_v60 }
  0x45   : > { %707 = vst [vmem:[%s1209_s15 + $0x40] sm:$0xff] %v691_v10 }
  0x46   : > { %523 = vst [vmem:[%s1209_s15 + $0x60] sm:$0xff] %v1375_v6 }
  0x47   : > { %616 = vst [vmem:[%s1209_s15 + $0x68] sm:$0xff] %v600_v11 }
  0x48   : > { %706 = vst [vmem:[%s1209_s15 + $0x28] sm:$0xff] %v690_v20 }
  0x49   : > { %522 = vst [vmem:[%s1209_s15 + $0x48] sm:$0xff] %v506_v15 }
  0x4a   : > { %615 = vst [vmem:[%s1209_s15 + $0x50] sm:$0xff] %v599_v21 }
  0x4b   : > { %705 = vst [vmem:[%s1209_s15 + $0x10] sm:$0xff] %v689_v28 }
  0x4c   : > { %521 = vst [vmem:[%s1209_s15 + $0x30] sm:$0xff] %v505_v0 }
  0x4d   : > { %614 = vst [vmem:[%s1209_s15 + $0x38] sm:$0xff] %v598_v25 }
  0x4e   : > { %520 = vst [vmem:[%s1209_s15 + $0x18] sm:$0xff] %v504_v29 }
  0x4f   : > { %613 = vst [vmem:[%s1209_s15 + $0x20] sm:$0xff] %v597_v30 }
  0x50   : > { %519 = vst [vmem:[%s1209_s15] sm:$0xff] %v503_v1 }
  0x51   : > { %612 = vst [vmem:[%s1209_s15 + $0x8] sm:$0xff] %v596_v3 }
  0x52   : > { %984 = shalt.err (!%p981_p4)
}
  0x53   : > { %s1021_s30 = smov 384   ;;  %s1022_s15 = smov 24  }
  0x54   : > { %910 = dma.vmem_to_hbm [thread:$0]  (%p1121_p5), %s762_s13, 6144, %s764_s29, %s743_s21, %s1021_s30, %s1021_s30, %s1022_s15  }
  0x55   : > { %s908_s26 = smul.u32 24, %s1357_s14 }
  0x57   : > { %s461_s22 = scalar_lea.vmem %s1504_s11, %s908_s26 }
  0xc0   : > { %v552_v4 = vpop.f32.mrf.mxu0 }
  0xc1   : > { %555 = vst [vmem:[%s461_s22] sm:$0xff] %v552_v4  ;;  %v645_v5 = vpop.f32.mrf.mxu1 }
  0xc2   : > { %648 = vst [vmem:[%s461_s22 + $0x8] sm:$0xff] %v645_v5 }
  0xc5   : > { %v738_v31 = vpop.f32.mrf.mxu2 }
  0xc6   : > { %741 = vst [vmem:[%s461_s22 + $0x10] sm:$0xff] %v738_v31 }
  0xc7 PF: > { %p916_p7 = scmp.ge.s32.totalorder %s1019_s20, 2  ;;  %s781_s12 = sand.u32 1, %s1007_s17  }
  0xc8   : > { %s782_s27 = scalar_lea.sflag [#allocation3], %s781_s12 }
  0xc9   : > { %p913_p8 = pnand %p916_p7, %p1125_p6 }
  0xcb   : > { %p914_p5 = pneg %p913_p8 }
  0xcd   : > { %1002 = dma.done.wait (%p914_p5), %s782_s27, 6144  }
  0xce   : > { %1004 = vsyncadd (%p914_p5), %s782_s27, 4294961152  ;;  %s1516_s0 = sld [smem:[#allocation5_spill]]  ;;  %p22_p9 = scmp.ge.s32.totalorder %s1108_s23, 4  }
  0xcf   : > { %s1517_s19 = sld [smem:[#allocation6_spill]]  ;;  %s1518_s17 = smov %s1011_s18 }
  0xd0   : > { %s1520_s20 = smov %s1108_s23  ;;  %24 = sbr.rel (!%p22_p9) target bundleno = 7 (0x7), region = 116 }
  0xd4   : > { %s1519_s18 = smov %s1516_s0 }
  0xd5   :  { %796 = vsyncpa [#allocation3], 1 }
  0xd6   :  { %798 = vsyncpa [#allocation3 + $0x1], 1 }

// kernel: gin_encoder_forward.6
= control target key start
LH: loop header
LB: loop body
LE: loop exit
PB: predicated region body
PF: predicated region fallthrough
CT: control target
= control target key end

     0   :  { %s2334_s0 = inlined_call_operand.hbm [shape: bf16[256,256], index: 0, kind: input, shape index: {}]   ;;  %s2335_s1 = inlined_call_operand.hbm [shape: bf16[256,128], index: 1, kind: input, shape index: {}, may-alias: {1,2}]   ;;  %s2336_s2 = inlined_call_operand.hbm [shape: bf16[256,128], index: 2, kind: input, shape index: {}, may-alias: {1,2}]   ;;  %s2337_s3 = inlined_call_operand.hbm [shape: bf16[128,128], index: 3, kind: input, shape index: {}]   ;;  %s2338_s4 = inlined_call_operand.vmem [shape: f32[1,128], index: 4, kind: input, shape index: {}]   ;;  %s2339_s5 = inlined_call_operand.hbm [shape: bf16[128,128], index: 5, kind: input, shape index: {}]   ;;  %s2340_s6 = inlined_call_operand.vmem [shape: f32[1,128], index: 6, kind: input, shape index: {}]   ;;  %s2341_s7 = inlined_call_operand.vmem [shape: f32[256,128], index: 7, kind: output, shape index: {0}]   ;;  %s2342_s8 = inlined_call_operand.vmem [shape: f32[16,128], index: 8, kind: output, shape index: {1}]  }
   0x1   :  { %2348 = sst [smem:[#allocation17_spill]] %s2334_s0 }
   0x2   :  { %2349 = sst [smem:[#allocation18_spill]] %s2335_s1 }
   0x3   :  { %14 = vsyncpa [#allocation3], 0 }
   0x4   :  { %16 = vsyncpa [#allocation3 + $0x1], 0 }
   0x5   :  { %17 = vsyncpa [#allocation5], 0 }
   0x6   :  { %18 = vsyncpa [#allocation9], 0  ;;  %s2021_s27 = smov 0   ;;  %s2023_s28 = smov 0  }
   0x7   :  { %s2025_s29 = smov 0   ;;  %s2027_s30 = smov 0  }
   0x8 LB: > { %2350 = sst [smem:[#allocation15_spill]] %s1963_s29  ;;  %s2040_s9 = sadd.s32 4294967295, %s1967_s30   ;;  %s1967_s30 = sphi %s2027_s30, %s2364_s30   ;;  %s1963_s29 = sphi %s2025_s29, %s2361_s29   ;;  %s1959_s28 = sphi %s2023_s28, %s2363_s28   ;;  %s1955_s27 = sphi %s2021_s27, %s2362_s27  }
   0x9   : > { %p44_p0 = scmp.ne.s32.totalorder %s1959_s28, %s1955_s27  ;;  %p45_p1 = scmp.eq.s32.totalorder %s2040_s9, 0 }
   0xa   : > { %p1380_p2 = scmp.ge.s32.totalorder %s1967_s30, 1  ;;  %p238_p3 = scmp.lt.s32.totalorder %s1967_s30, 3 }
   0xb   : > { %p2048_p4 = por %p45_p1, %p44_p0  ;;  %s2352_s1 = sld [smem:[#allocation18_spill]] }
   0xc   : > { %p2055_p5 = pnand %p1380_p2, %p238_p3  ;;  %s1969_s15 = smov [#allocation4]  }
   0xd   : > { %s251_s16 = sshll.u32 %s1969_s15, 4  ;;  %s2068_s18 = sadd.s32 1, %s1967_s30   ;;  %s252_s16 = int_to_ptr.vmem [resolvable:$true] %s251_s16 }
   0xe   : > { %p1702_p6 = pneg %p2055_p5  ;;  %s2343_s19 = smov 64  }
   0xf   : > { %s2345_s20 = smov 4   ;;  %s28_s21 = ssub.s32 %s1967_s30, %s2068_s18 }
  0x10   : > { %p2063_p7 = pnand %p1702_p6, %p45_p1  ;;  %s31_s22 = sadd.s32 1, %s1963_s29 }
  0x11   : > { %s249_s13 = sshll.u32 %s2352_s1, 4  ;;  %p29_p8 = scmp.eq.s32.totalorder %s28_s21, 0  ;;  %s250_s13 = int_to_ptr.hbm [resolvable:$true] %s249_s13 }
  0x12   : > { %1705 = dma.hbm_to_vmem [thread:$0]  (!%p2063_p7), %s250_s13, 2048, %s252_s16, [#allocation5], %s2343_s19, %s2343_s19, %s2345_s20  }
  0x13   : > { %p38_p9 = scmp.ne.s32.totalorder %s1963_s29, %s1959_s28  ;;  %p39_p10 = scmp.eq.s32.totalorder %s1967_s30, 0 }
  0x14   : > { %p1722_p11 = scmp.lt.s32.totalorder %s1967_s30, 2  ;;  %s299_s24 = sand.u32 1, %s1967_s30  }
  0x15   : > { %s2083_s23 = scalar_select %p29_p8, %s1963_s29, %s31_s22  }
  0x16   : > { %p40_p12 = por %p39_p10, %p38_p9  ;;  %s301_s25 = sand.u32 1, %s1963_s29  }
  0x17   : > { %2355 = sst [smem:[#allocation16_spill]] %s2083_s23  ;;  %s1385_s26 = sshll.u32 %s301_s25, 7 }
  0x18   : > { %s1597_s27 = sshll.u32 %s1967_s30, 7  ;;  %s2356_s0 = sld [smem:[#allocation17_spill]] }
  0x19   : > { %s303_s13 = scalar_lea.vmem [#allocation2], %s1385_s26  ;;  %p2093_p13 = pnand %p1722_p11, %p40_p12 }
  0x1a   : > { %s312_s16 = sshll.u32 %s303_s13, 4  ;;  %s1389_s22 = sshll.u32 %s301_s25, 6  ;;  %s313_s16 = int_to_ptr.vmem [resolvable:$true] %s312_s16 }
  0x1b   : > { %s2097_s19 = scalar_lea.sflag [#allocation3], %s299_s24  ;;  %p1801_p2 = pneg %p2093_p13 }
  0x1e   : > { %s309_s15 = scalar_lea.hbm %s2356_s0, %s1597_s27  ;;  %s1804_s11 = scalar_lea.hbm %s2356_s0, 256 }
  0x1f   : > { %s310_s1 = sshll.u32 %s309_s15, 4  ;;  %s311_s1 = int_to_ptr.hbm [resolvable:$true] %s310_s1 }
  0x20   : > { %s1797_s20 = sshra.s32 %s311_s1, 4  ;;  %s1798_s20 = int_to_ptr.hbm [resolvable:$true] %s1797_s20 }
  0x21   : > { %s1799_s23 = scalar_lea.hbm %s1798_s20, 128  ;;  %p1805_p8 = scmp.lt.s32.totalorder %s1798_s20, %s2356_s0 }
  0x22   : > { %p1800_p0 = scmp.ne.s32.totalorder %s1798_s20, %s1799_s23  ;;  %p1806_p9 = scmp.lt.s32.totalorder %s1804_s11, %s1799_s23 }
  0x24   : > { %p1802_p3 = pnand %p1801_p2, %p1800_p0  ;;  %p1807_p10 = por %p1806_p9, %p1805_p8 }
  0x26   : > { %p1803_p6 = pneg %p1802_p3 }
  0x28   : > { %p1808_p11 = pnand %p1807_p10, %p1803_p6 }
  0x2a   : > { %1811 = shalt.err (!%p1808_p11)
}
  0x2b   : > { %s1972_s24 = smov 128   ;;  %s1973_s25 = smov 8  }
  0x2c   : > { %1715 = dma.hbm_to_vmem [thread:$0]  (!%p2093_p13), %s311_s1, 2048, %s313_s16, %s2097_s19, %s1972_s24, %s1972_s24, %s1973_s25  }
  0x2d   : > { %s326_s13 = scalar_lea.vmem [#allocation6], %s1389_s22  ;;  %s263_s20 = sshll.u32 %s2337_s3, 4  ;;  %s264_s20 = int_to_ptr.hbm [resolvable:$true] %s263_s20 }
  0x2e   : > { %s2113_s26 = sshll.u32 %s326_s13, 4  ;;  %s1974_s23 = smov [#allocation7]   ;;  %s335_s26 = int_to_ptr.vmem [resolvable:$true] %s2113_s26 }
  0x2f   : > { %s265_s11 = sshll.u32 %s1974_s23, 4  ;;  %s280_s0 = sshll.u32 %s2339_s5, 4  ;;  %s266_s11 = int_to_ptr.vmem [resolvable:$true] %s265_s11  ;;  %s281_s0 = int_to_ptr.hbm [resolvable:$true] %s280_s0 }
  0x30   : > { %s2358_s1 = smov 4   ;;  %s2359_s16 = smov 64  }
  0x31   : > { %1708 = dma.hbm_to_vmem [thread:$0]  (!%p2063_p7), %s264_s20, 1024, %s266_s11, [#allocation5], %s2359_s16, %s2359_s16, %s2358_s1  }
  0x32   : > { %s1598_s22 = sshll.u32 %s1967_s30, 6  ;;  %s1975_s24 = smov [#allocation8]  }
  0x33   : > { %s282_s29 = sshll.u32 %s1975_s24, 4  ;;  %s331_s27 = scalar_lea.hbm %s2336_s2, %s1598_s22  ;;  %s283_s29 = int_to_ptr.vmem [resolvable:$true] %s282_s29 }
  0x34   : > { %s332_s23 = sshll.u32 %s331_s27, 4  ;;  %s1894_s11 = scalar_lea.hbm %s2336_s2, 128  ;;  %s333_s23 = int_to_ptr.hbm [resolvable:$true] %s332_s23 }
  0x35   : > { %1711 = dma.hbm_to_vmem [thread:$0]  (!%p2063_p7), %s281_s0, 1024, %s283_s29, [#allocation9], %s2359_s16, %s2359_s16, %s2358_s1  }
  0x36   : > { %s1887_s12 = sshra.s32 %s333_s23, 4  ;;  %s1888_s12 = int_to_ptr.hbm [resolvable:$true] %s1887_s12 }
  0x37   : > { %s1889_s15 = scalar_lea.hbm %s1888_s12, 64  ;;  %p1895_p6 = scmp.lt.s32.totalorder %s1888_s12, %s2336_s2 }
  0x38   : > { %p1890_p12 = scmp.ne.s32.totalorder %s1888_s12, %s1889_s15  ;;  %p1896_p8 = scmp.lt.s32.totalorder %s1894_s11, %s1889_s15 }
  0x3a   : > { %p1892_p0 = pnand %p1890_p12, %p1801_p2  ;;  %p1897_p7 = por %p1896_p8, %p1895_p6 }
  0x3c   : > { %p1893_p3 = pneg %p1892_p0 }
  0x3e   : > { %p1898_p9 = pnand %p1897_p7, %p1893_p3 }
  0x40   : > { %1901 = shalt.err (!%p1898_p9)
}
  0x41   : > { %1718 = dma.hbm_to_vmem [thread:$0]  (!%p2093_p13), %s333_s23, 1024, %s335_s26, %s2097_s19, %s2359_s16, %s2359_s16, %s2358_s1  }
  0x42   : > { %346 = sbr.rel (%p2055_p5) target bundleno = 677 (0x2a5), region = 48  ;;  %s348_s0 = sand.u32 (!%p2055_p5), 1, %s2040_s9  }
  0x43   : > { %s350_s24 = sand.u32 (!%p2055_p5), 1, %s1959_s28   ;;  %s349_s25 = scalar_lea.sflag (!%p2055_p5), [#allocation3], %s348_s0 }
  0x44   : > { %s1393_s29 = sshll.u32 (!%p2055_p5), %s350_s24, 7 }
  0x45   : > { %s2155_s13 = scalar_lea.vmem (!%p2055_p5), [#allocation2], %s1393_s29 }
  0x47   : > { %1934 = dma.done.wait (%p2048_p4), %s349_s25, 2048  }
  0x48   : > { %1936 = vsyncadd (%p2048_p4), %s349_s25, 4294965248 }
  0x49   : > { %1938 = dma.done.wait (%p45_p1), [#allocation5], 2048  }
  0x4a   : > { %1940 = vsyncadd (%p45_p1), [#allocation5], 4294965248  ;;  %s1395_s14 = sshll.u32 %s350_s24, 6 }
  0x4b   : > { %s2165_s19 = scalar_lea.vmem [#allocation6], %s1395_s14 }
  0x4c   : > { %1942 = dma.done.wait (%p2048_p4), %s349_s25, 1024  }
  0x4d   : > { %1944 = vsyncadd (%p2048_p4), %s349_s25, 4294966272 }
  0x4e   : > { %1946 = dma.done.wait (%p45_p1), [#allocation5], 1024  }
  0x4f   : > { %1948 = vsyncadd (%p45_p1), [#allocation5], 4294966272 }
  0x50   : > { %1950 = dma.done.wait (%p45_p1), [#allocation9], 1024  }
  0x51   : > { %1952 = vsyncadd (%p45_p1), [#allocation9], 4294966272  ;;  %v1622_v0 = vld [vmem:[#allocation4 + $0x38] sm:$0xff]  ;;  %v1621_v2 = vld [vmem:[#allocation4 + $0x30] sm:$0xff]  ;;  %s1398_s26 = sshll.u32 %s2040_s9, 4  ;;  %s1593_s1 = sshll.u32 %s2040_s9, 7 }
  0x52   : > { %v1630_v1 = vld [vmem:[#allocation4 + $0x78] sm:$0xff]  ;;  %656 = vmatpush.bf16.msra.mxu0 %v1622_v0  ;;  %v1629_v3 = vld [vmem:[#allocation4 + $0x70] sm:$0xff]  ;;  %v1620_v4 = vld [vmem:[#allocation4 + $0x28] sm:$0xff]  ;;  %p423_p1 = scmp.lt.s32.totalorder %s1398_s26, 31  ;;  %p428_p4 = scmp.lt.s32.totalorder %s2040_s9, 1 }
  0x53   : > { %705 = vmatpush.bf16.msra.mxu1 %v1630_v1  ;;  %v1628_v5 = vld [vmem:[#allocation4 + $0x68] sm:$0xff]  ;;  %v1619_v6 = vld [vmem:[#allocation4 + $0x20] sm:$0xff]  ;;  %v1618_v8 = vld [vmem:[#allocation4 + $0x18] sm:$0xff] }
  0x54   : > { %v1627_v7 = vld [vmem:[#allocation4 + $0x60] sm:$0xff]  ;;  %v1626_v9 = vld [vmem:[#allocation4 + $0x58] sm:$0xff]  ;;  %v1617_v10 = vld [vmem:[#allocation4 + $0x10] sm:$0xff]  ;;  %s2366_s26 = smov (!%p423_p1, %s1398_s26), 31  ;;  %s2368_s9 = smov (!%p428_p4, %s2040_s9), 1 }
  0x55   : > { %v1625_v11 = vld [vmem:[#allocation4 + $0x50] sm:$0xff]  ;;  %v1616_v12 = vld [vmem:[#allocation4 + $0x8] sm:$0xff]  ;;  %v1615_v14 = vld [vmem:[#allocation4] sm:$0xff]  ;;  %s1399_s23 = sshll.u32 %s2366_s26, 3  ;;  %s1400_s20 = sshll.u32 %s2368_s9, 3 }
  0x56   : > { %657 = vmatpush.bf16.msra.mxu0 %v1621_v2  ;;  %v1624_v13 = vld [vmem:[#allocation4 + $0x48] sm:$0xff]  ;;  %v1623_v15 = vld [vmem:[#allocation4 + $0x40] sm:$0xff]  ;;  %v1411_v22 = vld [vmem:[%s2155_s13 + $0x10] sm:$0xf]  ;;  %s2240_s30 = scalar_lea.vmem %s2341_s7, %s1399_s23  ;;  %s431_s17 = scalar_lea.vmem %s2342_s8, %s1400_s20 }
  0x57   : > { %706 = vmatpush.bf16.msra.mxu1 %v1629_v3  ;;  %v1403_v16 = vld [vmem:[%s2155_s13] sm:$0xf]  ;;  %v1600_v17 = vld [vmem:[%s2155_s13 + $0x4] sm:$0xf0]  ;;  %v1599_v18 = vld [vmem:[%s2155_s13 + $0x4] sm:$0xf] }
  0x58   : > { %v1405_v19 = vld [vmem:[%s2155_s13 + $0x8] sm:$0xf0]  ;;  %v1404_v20 = vor.u32 %v1600_v17, %v1403_v16  ;;  %v1602_v23 = vld [vmem:[%s2155_s13 + $0x14] sm:$0xf0]  ;;  %v1601_v24 = vld [vmem:[%s2155_s13 + $0x14] sm:$0xf] }
  0x59   : > { %v1408_v21 = vor.u32 %v1599_v18, %v1405_v19  ;;  %v1413_v25 = vld [vmem:[%s2155_s13 + $0x18] sm:$0xf0]  ;;  %v1412_v26 = vor.u32 %v1602_v23, %v1411_v22  ;;  %v1419_v28 = vld [vmem:[%s2155_s13 + $0x20] sm:$0xf]  ;;  %v1604_v29 = vld [vmem:[%s2155_s13 + $0x24] sm:$0xf0] }
  0x5a   : > { %658 = vmatpush.bf16.msra.mxu0 %v1620_v4  ;;  %v1416_v27 = vor.u32 %v1601_v24, %v1413_v25  ;;  %v1603_v30 = vld [vmem:[%s2155_s13 + $0x24] sm:$0xf]  ;;  %v1421_v31 = vld [vmem:[%s2155_s13 + $0x28] sm:$0xf0]  ;;  %v1420_v32 = vor.u32 %v1604_v29, %v1419_v28  ;;  %v1427_v34 = vld [vmem:[%s2155_s13 + $0x30] sm:$0xf] }
  0x5b   : > { %707 = vmatpush.bf16.msra.mxu1 %v1628_v5  ;;  %v1424_v33 = vor.u32 %v1603_v30, %v1421_v31  ;;  %v1606_v35 = vld [vmem:[%s2155_s13 + $0x34] sm:$0xf0]  ;;  %v1605_v36 = vld [vmem:[%s2155_s13 + $0x34] sm:$0xf]  ;;  %v1429_v37 = vld [vmem:[%s2155_s13 + $0x38] sm:$0xf0] }
  0x5c   : > { %v1428_v38 = vor.u32 %v1606_v35, %v1427_v34  ;;  %v1432_v39 = vor.u32 %v1605_v36, %v1429_v37  ;;  %v1435_v40 = vld [vmem:[%s2155_s13 + $0x40] sm:$0xf]  ;;  %v1608_v41 = vld [vmem:[%s2155_s13 + $0x44] sm:$0xf0]  ;;  %v1607_v42 = vld [vmem:[%s2155_s13 + $0x44] sm:$0xf] }
  0x5d   : > { %v1437_v43 = vld [vmem:[%s2155_s13 + $0x48] sm:$0xf0]  ;;  %v1436_v44 = vor.u32 %v1608_v41, %v1435_v40  ;;  %v1638_v46 = vld [vmem:[#allocation7 + $0x38] sm:$0xff]  ;;  %v1443_v47 = vld [vmem:[%s2155_s13 + $0x50] sm:$0xf] }
  0x5e   : > { %659 = vmatpush.bf16.msra.mxu0 %v1619_v6  ;;  %v1440_v45 = vor.u32 %v1607_v42, %v1437_v43  ;;  %878 = vmatpush.bf16.msra.mxu2 %v1638_v46  ;;  %v1610_v48 = vld [vmem:[%s2155_s13 + $0x54] sm:$0xf0]  ;;  %v1609_v49 = vld [vmem:[%s2155_s13 + $0x54] sm:$0xf]  ;;  %v1445_v50 = vld [vmem:[%s2155_s13 + $0x58] sm:$0xf0] }
  0x5f   : > { %708 = vmatpush.bf16.msra.mxu1 %v1627_v7  ;;  %v1444_v51 = vor.u32 %v1610_v48, %v1443_v47  ;;  %v1448_v52 = vor.u32 %v1609_v49, %v1445_v50  ;;  %v1637_v53 = vld [vmem:[#allocation7 + $0x30] sm:$0xff]  ;;  %v1636_v54 = vld [vmem:[#allocation7 + $0x28] sm:$0xff]  ;;  %v1635_v55 = vld [vmem:[#allocation7 + $0x20] sm:$0xff] }
  0x60   : > { %v1451_v56 = vld [vmem:[%s2155_s13 + $0x60] sm:$0xf]  ;;  %v1612_v57 = vld [vmem:[%s2155_s13 + $0x64] sm:$0xf0]  ;;  %v1611_v58 = vld [vmem:[%s2155_s13 + $0x64] sm:$0xf] }
  0x61   : > { %v1453_v59 = vld [vmem:[%s2155_s13 + $0x68] sm:$0xf0]  ;;  %v1634_v60 = vld [vmem:[#allocation7 + $0x18] sm:$0xff]  ;;  %v1452_v61 = vor.u32 %v1612_v57, %v1451_v56  ;;  %v1633_v63 = vld [vmem:[#allocation7 + $0x10] sm:$0xff] }
  0x62   : > { %660 = vmatpush.bf16.msra.mxu0 %v1618_v8  ;;  %879 = vmatpush.bf16.msra.mxu2 %v1637_v53  ;;  %v1456_v62 = vor.u32 %v1611_v58, %v1453_v59  ;;  %v1632_v0 = vld [vmem:[#allocation7 + $0x8] sm:$0xff]  ;;  %v1631_v1 = vld [vmem:[#allocation7] sm:$0xff]  ;;  %v1459_v2 = vld [vmem:[%s2155_s13 + $0x70] sm:$0xf] }
  0x63   : > { %709 = vmatpush.bf16.msra.mxu1 %v1626_v9  ;;  %v1614_v3 = vld [vmem:[%s2155_s13 + $0x74] sm:$0xf0]  ;;  %v1613_v4 = vld [vmem:[%s2155_s13 + $0x74] sm:$0xf]  ;;  %v1461_v5 = vld [vmem:[%s2155_s13 + $0x78] sm:$0xf0] }
  0x64   : > { %v1460_v6 = vor.u32 %v1614_v3, %v1459_v2  ;;  %v1464_v7 = vor.u32 %v1613_v4, %v1461_v5  ;;  %v1679_v22 = vld [vmem:[%s2165_s19 + $0x8] sm:$0xff]   ;;  %v1680_v34 = vld [vmem:[%s2165_s19 + $0x10] sm:$0xff]   ;;  %v1681_v46 = vld [vmem:[%s2165_s19 + $0x18] sm:$0xff]  }
  0x65   : > { %v1653_v24 = vunpack.c.l.bf16 %v1679_v22  ;;  %v1654_v25 = vunpack.c.h.bf16 %v1679_v22  ;;  %v1657_v36 = vunpack.c.l.bf16 %v1680_v34  ;;  %v1658_v37 = vunpack.c.h.bf16 %v1680_v34  ;;  %v1682_v58 = vld [vmem:[%s2165_s19 + $0x20] sm:$0xff]   ;;  %v1642_v34 = vld [vmem:[#allocation8 + $0x18] sm:$0xff] }
  0x66   : > { %661 = vmatpush.bf16.msra.mxu0 %v1617_v10  ;;  %880 = vmatpush.bf16.msra.mxu2 %v1636_v54  ;;  %v1648_v10 = vld [vmem:[%s2165_s19] sm:$0xff]   ;;  %v1661_v48 = vunpack.c.l.bf16 %v1681_v46  ;;  %v1662_v49 = vunpack.c.h.bf16 %v1681_v46 }
  0x67   : > { %710 = vmatpush.bf16.msra.mxu1 %v1625_v11  ;;  %v1639_v46 = vld [vmem:[#allocation8] sm:$0xff] }
  0x6a   : > { %662 = vmatpush.bf16.msra.mxu0 %v1616_v12  ;;  %881 = vmatpush.bf16.msra.mxu2 %v1635_v55  ;;  %v1649_v12 = vunpack.c.l.bf16 %v1648_v10 }
  0x6b   : > { %711 = vmatpush.bf16.msra.mxu1 %v1624_v13  ;;  %v1650_v13 = vunpack.c.h.bf16 %v1648_v10 }
  0x6e   : > { %663 = vmatpush.bf16.msra.mxu0 %v1615_v14  ;;  %882 = vmatpush.bf16.msra.mxu2 %v1634_v60  ;;  %v1665_v60 = vunpack.c.l.bf16 %v1682_v58 }
  0x6f   : > { %712 = vmatpush.bf16.msra.mxu1 %v1623_v15 }
  0x71   : > { %664 = vmatmul.bf16.vlgmr.msra.gmra.mxu0 %v1404_v20 }
  0x72   : > { %713 = vmatmul.bf16.vlgmr.msra.gmra.mxu1 %v1408_v21  ;;  %883 = vmatpush.bf16.msra.mxu2 %v1633_v63 }
  0x76   : > { %884 = vmatpush.bf16.msra.mxu2 %v1632_v0 }
  0x7a   : > { %885 = vmatpush.bf16.msra.mxu2 %v1631_v1 }
  0x81   : > { %669 = vmatmul.bf16.gmra.mxu0 %v1412_v26 }
  0x82   : > { %718 = vmatmul.bf16.gmra.mxu1 %v1416_v27 }
  0x91   : > { %674 = vmatmul.bf16.gmra.mxu0 %v1420_v32 }
  0x92   : > { %723 = vmatmul.bf16.gmra.mxu1 %v1424_v33 }
  0xa1   : > { %679 = vmatmul.bf16.gmra.mxu0 %v1428_v38 }
  0xa2   : > { %728 = vmatmul.bf16.gmra.mxu1 %v1432_v39 }
  0xb1   : > { %684 = vmatmul.bf16.gmra.mxu0 %v1436_v44 }
  0xb2   : > { %733 = vmatmul.bf16.gmra.mxu1 %v1440_v45 }
  0xc1   : > { %689 = vmatmul.bf16.gmra.mxu0 %v1444_v51 }
  0xc2   : > { %738 = vmatmul.bf16.gmra.mxu1 %v1448_v52 }
  0xd1   : > { %694 = vmatmul.bf16.gmra.mxu0 %v1452_v61  ;;  %v1666_v61 = vunpack.c.h.bf16 %v1682_v58 }
  0xd2   : > { %743 = vmatmul.bf16.gmra.mxu1 %v1456_v62 }
  0xe1   : > { %699 = vmatmul.bf16.gmra.mxu0 %v1460_v6  ;;  %v1683_v6 = vld [vmem:[%s2165_s19 + $0x28] sm:$0xff]  }
  0xe2   : > { %748 = vmatmul.bf16.gmra.mxu1 %v1464_v7 }
  0xee   : > { %v665_v8 = vpop.f32.mrf.mxu0 }
  0xef   : > { %v714_v9 = vpop.f32.mrf.mxu1 }
  0xf0   : > { %v715_v11 = vadd.f32 %v714_v9, %v665_v8  ;;  %v1669_v8 = vunpack.c.l.bf16 %v1683_v6  ;;  %v1670_v9 = vunpack.c.h.bf16 %v1683_v6 }
  0xf2   : > { %v786_v17 = vadd.f32 %v1649_v12, %v715_v11 }
  0xf6   : > { %v667_v14 = vpop.f32.mrf.mxu0 }
  0xf7   : > { %v716_v15 = vpop.f32.mrf.mxu1 }
  0xf8   : > { %v717_v16 = vadd.f32 %v716_v15, %v667_v14 }
  0xfa   : > { %v787_v18 = vadd.f32 %v1650_v13, %v717_v16  ;;  %v1646_v16 = vld [vmem:[#allocation8 + $0x38] sm:$0xff] }
  0xfb   : > { %1019 = vmatpush.bf16.msra.mxu3 %v1646_v16 }
  0xfc   : > { %v802_v19 = vpack.c.bf16 %v787_v18, %v786_v17 }
  0xfe   : > { %886 = vmatmul.bf16.vlgmr.msra.gmra.mxu2 %v802_v19  ;;  %v670_v20 = vpop.f32.mrf.mxu0  ;;  %v1645_v19 = vld [vmem:[#allocation8 + $0x30] sm:$0xff] }
  0xff   : > { %v719_v21 = vpop.f32.mrf.mxu1  ;;  %1020 = vmatpush.bf16.msra.mxu3 %v1645_v19 }
 0x100   : > { %v720_v23 = vadd.f32 %v719_v21, %v670_v20  ;;  %v1684_v20 = vld [vmem:[%s2165_s19 + $0x30] sm:$0xff]   ;;  %v1644_v21 = vld [vmem:[#allocation8 + $0x28] sm:$0xff] }
 0x102   : > { %v788_v29 = vadd.f32 %v1653_v24, %v720_v23  ;;  %v1673_v23 = vunpack.c.l.bf16 %v1684_v20  ;;  %v1674_v24 = vunpack.c.h.bf16 %v1684_v20 }
 0x103   : > { %1021 = vmatpush.bf16.msra.mxu3 %v1644_v21 }
 0x106   : > { %v672_v26 = vpop.f32.mrf.mxu0 }
 0x107   : > { %v721_v27 = vpop.f32.mrf.mxu1 }
 0x108   : > { %v722_v28 = vadd.f32 %v721_v27, %v672_v26 }
 0x10a   : > { %v789_v30 = vadd.f32 %v1654_v25, %v722_v28  ;;  %v1643_v28 = vld [vmem:[#allocation8 + $0x20] sm:$0xff] }
 0x10b   : > { %1022 = vmatpush.bf16.msra.mxu3 %v1643_v28 }
 0x10c   : > { %v803_v31 = vpack.c.bf16 %v789_v30, %v788_v29 }
 0x10e   : > { %891 = vmatmul.bf16.gmra.mxu2 %v803_v31  ;;  %v675_v32 = vpop.f32.mrf.mxu0 }
 0x10f   : > { %v724_v33 = vpop.f32.mrf.mxu1  ;;  %1023 = vmatpush.bf16.msra.mxu3 %v1642_v34 }
 0x110   : > { %v725_v35 = vadd.f32 %v724_v33, %v675_v32 }
 0x112   : > { %v790_v41 = vadd.f32 %v1657_v36, %v725_v35  ;;  %v1685_v35 = vld [vmem:[%s2165_s19 + $0x38] sm:$0xff]   ;;  %v1641_v36 = vld [vmem:[#allocation8 + $0x10] sm:$0xff] }
 0x113   : > { %1024 = vmatpush.bf16.msra.mxu3 %v1641_v36 }
 0x116   : > { %v677_v38 = vpop.f32.mrf.mxu0 }
 0x117   : > { %v726_v39 = vpop.f32.mrf.mxu1 }
 0x118   : > { %v727_v40 = vadd.f32 %v726_v39, %v677_v38  ;;  %v1677_v38 = vunpack.c.l.bf16 %v1685_v35  ;;  %v1678_v39 = vunpack.c.h.bf16 %v1685_v35 }
 0x11a   : > { %v791_v42 = vadd.f32 %v1658_v37, %v727_v40 }
 0x11c   : > { %v804_v43 = vpack.c.bf16 %v791_v42, %v790_v41  ;;  %v1640_v42 = vld [vmem:[#allocation8 + $0x8] sm:$0xff] }
 0x11d   : > { %1025 = vmatpush.bf16.msra.mxu3 %v1640_v42 }
 0x11e   : > { %896 = vmatmul.bf16.gmra.mxu2 %v804_v43  ;;  %v680_v44 = vpop.f32.mrf.mxu0 }
 0x11f   : > { %v729_v45 = vpop.f32.mrf.mxu1 }
 0x120   : > { %v730_v47 = vadd.f32 %v729_v45, %v680_v44 }
 0x121   : > { %1026 = vmatpush.bf16.msra.mxu3 %v1639_v46 }
 0x122   : > { %v792_v53 = vadd.f32 %v1661_v48, %v730_v47 }
 0x126   : > { %v682_v50 = vpop.f32.mrf.mxu0 }
 0x127   : > { %v731_v51 = vpop.f32.mrf.mxu1 }
 0x128   : > { %v732_v52 = vadd.f32 %v731_v51, %v682_v50 }
 0x12a   : > { %v793_v54 = vadd.f32 %v1662_v49, %v732_v52  ;;  %v1765_v49 = vld [vmem:[%s2338_s4] ss:$0 sm:$0xff] }
 0x12c   : > { %v805_v55 = vpack.c.bf16 %v793_v54, %v792_v53 }
 0x12e   : > { %901 = vmatmul.bf16.gmra.mxu2 %v805_v55  ;;  %v685_v56 = vpop.f32.mrf.mxu0 }
 0x12f   : > { %v734_v57 = vpop.f32.mrf.mxu1 }
 0x130   : > { %v735_v59 = vadd.f32 %v734_v57, %v685_v56 }
 0x132   : > { %v794_v1 = vadd.f32 %v1665_v60, %v735_v59 }
 0x136   : > { %v687_v62 = vpop.f32.mrf.mxu0 }
 0x137   : > { %v736_v63 = vpop.f32.mrf.mxu1 }
 0x138   : > { %v737_v0 = vadd.f32 %v736_v63, %v687_v62 }
 0x13a   : > { %v795_v2 = vadd.f32 %v1666_v61, %v737_v0 }
 0x13c   : > { %v806_v3 = vpack.c.bf16 %v795_v2, %v794_v1 }
 0x13e   : > { %906 = vmatmul.bf16.gmra.mxu2 %v806_v3  ;;  %v690_v4 = vpop.f32.mrf.mxu0 }
 0x13f   : > { %v739_v5 = vpop.f32.mrf.mxu1 }
 0x140   : > { %v740_v7 = vadd.f32 %v739_v5, %v690_v4 }
 0x142   : > { %v796_v13 = vadd.f32 %v1669_v8, %v740_v7 }
 0x146   : > { %v692_v10 = vpop.f32.mrf.mxu0 }
 0x147   : > { %v741_v11 = vpop.f32.mrf.mxu1 }
 0x148   : > { %v742_v12 = vadd.f32 %v741_v11, %v692_v10 }
 0x14a   : > { %v797_v14 = vadd.f32 %v1670_v9, %v742_v12 }
 0x14c   : > { %v807_v15 = vpack.c.bf16 %v797_v14, %v796_v13 }
 0x14e   : > { %911 = vmatmul.bf16.gmra.mxu2 %v807_v15  ;;  %v695_v17 = vpop.f32.mrf.mxu0 }
 0x14f   : > { %v744_v18 = vpop.f32.mrf.mxu1 }
 0x150   : > { %v745_v22 = vadd.f32 %v744_v18, %v695_v17 }
 0x152   : > { %v798_v29 = vadd.f32 %v1673_v23, %v745_v22 }
 0x156   : > { %v697_v25 = vpop.f32.mrf.mxu0 }
 0x157   : > { %v746_v26 = vpop.f32.mrf.mxu1 }
 0x158   : > { %v747_v27 = vadd.f32 %v746_v26, %v697_v25 }
 0x15a   : > { %v799_v30 = vadd.f32 %v1674_v24, %v747_v27 }
 0x15c   : > { %v808_v31 = vpack.c.bf16 %v799_v30, %v798_v29 }
 0x15e   : > { %916 = vmatmul.bf16.gmra.mxu2 %v808_v31  ;;  %v700_v32 = vpop.f32.mrf.mxu0 }
 0x15f   : > { %v749_v33 = vpop.f32.mrf.mxu1 }
 0x160   : > { %v750_v37 = vadd.f32 %v749_v33, %v700_v32 }
 0x162   : > { %v800_v44 = vadd.f32 %v1677_v38, %v750_v37 }
 0x166   : > { %v702_v40 = vpop.f32.mrf.mxu0 }
 0x167   : > { %v751_v41 = vpop.f32.mrf.mxu1 }
 0x168   : > { %v752_v43 = vadd.f32 %v751_v41, %v702_v40  ;;  %v1085_v41 = vlaneseq }
 0x16a   : > { %v801_v45 = vadd.f32 %v1678_v39, %v752_v43  ;;  %v2224_v42 = vshrl.u32 %v1085_v41, 7  ;;  %v2226_v43 = vstv %s1593_s1 }
 0x16c   : > { %v809_v47 = vpack.c.bf16 %v801_v45, %v800_v44  ;;  %v2231_v44 = vld [vmem:[%s2340_s6] ss:$0 sm:$0xff]  ;;  %v1103_v45 = vadd.s32 %v2226_v43, %v2224_v42 }
 0x16e   : > { %921 = vmatmul.bf16.gmra.mxu2 %v809_v47  ;;  %vm1119_vm0 = vcmp.lt.s32.totalorder %v1103_v45, 160 }
 0x181   : > { %v887_v48 = vpop.f32.mrf.mxu2 }
 0x182   : > { %v888_v50 = vadd.f32 %v1765_v49, %v887_v48  ;;  %v1087_v48 = vadd.s32 8, %v2224_v42 }
 0x184   : > { %v927_v53 = vmax.f32 %v888_v50, 0.0 }
 0x189   : > { %v889_v51 = vpop.f32.mrf.mxu2 }
 0x18a   : > { %v890_v52 = vadd.f32 %v1765_v49, %v889_v51  ;;  %v1104_v51 = vadd.s32 %v2226_v43, %v1087_v48  ;;  %v1095_v48 = vadd.s32 72, %v2224_v42 }
 0x18c   : > { %v928_v54 = vmax.f32 %v890_v52, 0.0  ;;  %vm1120_vm1 = vcmp.lt.s32.totalorder %v1104_v51, 160  ;;  %v1112_v51 = vadd.s32 %v2226_v43, %v1095_v48 }
 0x18e   : > { %v943_v55 = vpack.c.bf16 %v928_v54, %v927_v53  ;;  %v1088_v54 = vadd.s32 16, %v2224_v42  ;;  %vm1128_vm9 = vcmp.lt.s32.totalorder %v1112_v51, 160 }
 0x190   : > { %1027 = vmatmul.bf16.vlgmr.msra.gmra.mxu3 %v943_v55 }
 0x191   : > { %v892_v56 = vpop.f32.mrf.mxu2 }
 0x192   : > { %v893_v57 = vadd.f32 %v1765_v49, %v892_v56 }
 0x194   : > { %v929_v60 = vmax.f32 %v893_v57, 0.0 }
 0x199   : > { %v894_v58 = vpop.f32.mrf.mxu2 }
 0x19a   : > { %v895_v59 = vadd.f32 %v1765_v49, %v894_v58 }
 0x19c   : > { %v930_v61 = vmax.f32 %v895_v59, 0.0 }
 0x19e   : > { %v944_v62 = vpack.c.bf16 %v930_v61, %v929_v60  ;;  %v1105_v60 = vadd.s32 %v2226_v43, %v1088_v54  ;;  %v1096_v54 = vadd.s32 80, %v2224_v42 }
 0x1a0   : > { %1032 = vmatmul.bf16.gmra.mxu3 %v944_v62  ;;  %vm1121_vm2 = vcmp.lt.s32.totalorder %v1105_v60, 160  ;;  %v1097_v60 = vadd.s32 88, %v2224_v42 }
 0x1a1   : > { %v897_v63 = vpop.f32.mrf.mxu2 }
 0x1a2   : > { %v898_v0 = vadd.f32 %v1765_v49, %v897_v63 }
 0x1a4   : > { %v931_v3 = vmax.f32 %v898_v0, 0.0  ;;  %v1089_v0 = vadd.s32 24, %v2224_v42 }
 0x1a9   : > { %v899_v1 = vpop.f32.mrf.mxu2 }
 0x1aa   : > { %v900_v2 = vadd.f32 %v1765_v49, %v899_v1 }
 0x1ac   : > { %v932_v4 = vmax.f32 %v900_v2, 0.0 }
 0x1ae   : > { %v945_v5 = vpack.c.bf16 %v932_v4, %v931_v3 }
 0x1b0   : > { %1037 = vmatmul.bf16.gmra.mxu3 %v945_v5  ;;  %v1106_v5 = vadd.s32 %v2226_v43, %v1089_v0 }
 0x1b1   : > { %v902_v6 = vpop.f32.mrf.mxu2 }
 0x1b2   : > { %v903_v7 = vadd.f32 %v1765_v49, %v902_v6  ;;  %vm1122_vm3 = vcmp.lt.s32.totalorder %v1106_v5, 160 }
 0x1b4   : > { %v933_v10 = vmax.f32 %v903_v7, 0.0 }
 0x1b9   : > { %v904_v8 = vpop.f32.mrf.mxu2 }
 0x1ba   : > { %v905_v9 = vadd.f32 %v1765_v49, %v904_v8 }
 0x1bc   : > { %v934_v11 = vmax.f32 %v905_v9, 0.0  ;;  %v1090_v9 = vadd.s32 32, %v2224_v42 }
 0x1be   : > { %v946_v12 = vpack.c.bf16 %v934_v11, %v933_v10 }
 0x1c0   : > { %1042 = vmatmul.bf16.gmra.mxu3 %v946_v12 }
 0x1c1   : > { %v907_v13 = vpop.f32.mrf.mxu2 }
 0x1c2   : > { %v908_v14 = vadd.f32 %v1765_v49, %v907_v13 }
 0x1c4   : > { %v935_v17 = vmax.f32 %v908_v14, 0.0  ;;  %v1107_v14 = vadd.s32 %v2226_v43, %v1090_v9 }
 0x1c6   : > { %vm1123_vm4 = vcmp.lt.s32.totalorder %v1107_v14, 160 }
 0x1c9   : > { %v909_v15 = vpop.f32.mrf.mxu2 }
 0x1ca   : > { %v910_v16 = vadd.f32 %v1765_v49, %v909_v15 }
 0x1cc   : > { %v936_v18 = vmax.f32 %v910_v16, 0.0 }
 0x1ce   : > { %v947_v19 = vpack.c.bf16 %v936_v18, %v935_v17  ;;  %v1091_v18 = vadd.s32 40, %v2224_v42 }
 0x1d0   : > { %1047 = vmatmul.bf16.gmra.mxu3 %v947_v19 }
 0x1d1   : > { %v912_v20 = vpop.f32.mrf.mxu2 }
 0x1d2   : > { %v913_v21 = vadd.f32 %v1765_v49, %v912_v20 }
 0x1d4   : > { %v937_v24 = vmax.f32 %v913_v21, 0.0 }
 0x1d9   : > { %v914_v22 = vpop.f32.mrf.mxu2 }
 0x1da   : > { %v915_v23 = vadd.f32 %v1765_v49, %v914_v22 }
 0x1dc   : > { %v938_v25 = vmax.f32 %v915_v23, 0.0  ;;  %v1108_v23 = vadd.s32 %v2226_v43, %v1091_v18 }
 0x1de   : > { %v948_v26 = vpack.c.bf16 %v938_v25, %v937_v24  ;;  %vm1124_vm5 = vcmp.lt.s32.totalorder %v1108_v23, 160 }
 0x1e0   : > { %1052 = vmatmul.bf16.gmra.mxu3 %v948_v26 }
 0x1e1   : > { %v917_v27 = vpop.f32.mrf.mxu2 }
 0x1e2   : > { %v918_v28 = vadd.f32 %v1765_v49, %v917_v27  ;;  %v1092_v27 = vadd.s32 48, %v2224_v42 }
 0x1e4   : > { %v939_v31 = vmax.f32 %v918_v28, 0.0 }
 0x1e9   : > { %v919_v29 = vpop.f32.mrf.mxu2 }
 0x1ea   : > { %v920_v30 = vadd.f32 %v1765_v49, %v919_v29 }
 0x1ec   : > { %v940_v32 = vmax.f32 %v920_v30, 0.0  ;;  %v1109_v30 = vadd.s32 %v2226_v43, %v1092_v27 }
 0x1ee   : > { %v949_v33 = vpack.c.bf16 %v940_v32, %v939_v31  ;;  %vm1125_vm6 = vcmp.lt.s32.totalorder %v1109_v30, 160 }
 0x1f0   : > { %1057 = vmatmul.bf16.gmra.mxu3 %v949_v33  ;;  %v1093_v33 = vadd.s32 56, %v2224_v42 }
 0x1f1   : > { %v922_v34 = vpop.f32.mrf.mxu2 }
 0x1f2   : > { %v923_v35 = vadd.f32 %v1765_v49, %v922_v34 }
 0x1f4   : > { %v941_v38 = vmax.f32 %v923_v35, 0.0 }
 0x1f9   : > { %v924_v36 = vpop.f32.mrf.mxu2 }
 0x1fa   : > { %v925_v37 = vadd.f32 %v1765_v49, %v924_v36  ;;  %v1110_v36 = vadd.s32 %v2226_v43, %v1093_v33 }
 0x1fc   : > { %v942_v39 = vmax.f32 %v925_v37, 0.0  ;;  %vm1126_vm7 = vcmp.lt.s32.totalorder %v1110_v36, 160 }
 0x1fe   : > { %v950_v40 = vpack.c.bf16 %v942_v39, %v941_v38  ;;  %v1094_v39 = vadd.s32 64, %v2224_v42 }
 0x200   : > { %1062 = vmatmul.bf16.gmra.mxu3 %v950_v40  ;;  %v1111_v45 = vadd.s32 %v2226_v43, %v1094_v39 }
 0x202   : > { %vm1127_vm8 = vcmp.lt.s32.totalorder %v1111_v45, 160 }
 0x213   : > { %v1028_v46 = vpop.f32.mrf.mxu3 }
 0x214   : > { %v1029_v47 = vadd.f32 %v2231_v44, %v1028_v46 }
 0x216   : > { %v1068_v49 = vmax.f32 %v1029_v47, 0.0 }
 0x218   : > { %v1135_v50 = vsel %vm1119_vm0, %v1068_v49, 0.0  ;;  %vm1225_vm0 = vcmp.eq.s32.totalorder %v2224_v42, 0 }
 0x219   : > { %1151 = vst [vmem:[%s2240_s30] sm:$0xff] %v1135_v50  ;;  %v1188_v57 = vmul.f32 %v1135_v50, %v1135_v50 }
 0x21b   : > { %v1030_v52 = vpop.f32.mrf.mxu3 }
 0x21c   : > { %v1031_v53 = vadd.f32 %v2231_v44, %v1030_v52 }
 0x21e   : > { %v1069_v55 = vmax.f32 %v1031_v53, 0.0 }
 0x220   : > { %v1136_v56 = vsel %vm1120_vm1, %v1069_v55, 0.0  ;;  %vm1227_vm1 = vcmp.eq.s32.totalorder %v2224_v42, 1 }
 0x221   : > { %1152 = vst [vmem:[%s2240_s30 + $0x8] sm:$0xff] %v1136_v56  ;;  %v1167_v58 = vadd.f32 %v1136_v56, %v1135_v50  ;;  %v1189_v59 = vmul.f32 %v1136_v56, %v1136_v56 }
 0x223   : > { %v1204_v61 = vadd.f32 %v1189_v59, %v1188_v57  ;;  %v1033_v62 = vpop.f32.mrf.mxu3  ;;  %v1113_v57 = vadd.s32 %v2226_v43, %v1096_v54 }
 0x224   : > { %v1034_v63 = vadd.f32 %v2231_v44, %v1033_v62 }
 0x225   : > { %vm1129_vm10 = vcmp.lt.s32.totalorder %v1113_v57, 160 }
 0x226   : > { %v1070_v1 = vmax.f32 %v1034_v63, 0.0  ;;  %v1114_v63 = vadd.s32 %v2226_v43, %v1097_v60 }
 0x228   : > { %v1137_v2 = vsel %vm1121_vm2, %v1070_v1, 0.0  ;;  %vm1130_vm11 = vcmp.lt.s32.totalorder %v1114_v63, 160 }
 0x229   : > { %1153 = vst [vmem:[%s2240_s30 + $0x10] sm:$0xff] %v1137_v2  ;;  %v1168_v3 = vadd.f32 %v1167_v58, %v1137_v2  ;;  %v1190_v4 = vmul.f32 %v1137_v2, %v1137_v2  ;;  %v1098_v2 = vadd.s32 96, %v2224_v42 }
 0x22b   : > { %v1205_v6 = vadd.f32 %v1204_v61, %v1190_v4  ;;  %v1035_v7 = vpop.f32.mrf.mxu3  ;;  %v1115_v5 = vadd.s32 %v2226_v43, %v1098_v2 }
 0x22c   : > { %v1036_v8 = vadd.f32 %v2231_v44, %v1035_v7 }
 0x22d   : > { %vm1131_vm12 = vcmp.lt.s32.totalorder %v1115_v5, 160 }
 0x22e   : > { %v1071_v10 = vmax.f32 %v1036_v8, 0.0  ;;  %v1099_v8 = vadd.s32 104, %v2224_v42 }
 0x230   : > { %v1138_v11 = vsel %vm1122_vm3, %v1071_v10, 0.0 }
 0x231   : > { %1154 = vst [vmem:[%s2240_s30 + $0x18] sm:$0xff] %v1138_v11  ;;  %v1169_v12 = vadd.f32 %v1168_v3, %v1138_v11  ;;  %v1191_v13 = vmul.f32 %v1138_v11, %v1138_v11  ;;  %v1116_v11 = vadd.s32 %v2226_v43, %v1099_v8 }
 0x233   : > { %v1206_v15 = vadd.f32 %v1205_v6, %v1191_v13  ;;  %v1038_v16 = vpop.f32.mrf.mxu3  ;;  %vm1132_vm13 = vcmp.lt.s32.totalorder %v1116_v11, 160 }
 0x234   : > { %v1039_v17 = vadd.f32 %v2231_v44, %v1038_v16 }
 0x236   : > { %v1072_v19 = vmax.f32 %v1039_v17, 0.0  ;;  %v1100_v17 = vadd.s32 112, %v2224_v42 }
 0x238   : > { %v1139_v20 = vsel %vm1123_vm4, %v1072_v19, 0.0 }
 0x239   : > { %1155 = vst [vmem:[%s2240_s30 + $0x20] sm:$0xff] %v1139_v20  ;;  %v2259_v21 = vadd.f32 %v1169_v12, %v1139_v20  ;;  %v1192_v22 = vmul.f32 %v1139_v20, %v1139_v20 }
 0x23b   : > { %v2262_v24 = vadd.f32 %v1206_v15, %v1192_v22  ;;  %v1040_v25 = vpop.f32.mrf.mxu3 }
 0x23c   : > { %v1041_v26 = vadd.f32 %v2231_v44, %v1040_v25 }
 0x23e   : > { %v1073_v28 = vmax.f32 %v1041_v26, 0.0 }
 0x240   : > { %v2266_v29 = vsel %vm1124_vm5, %v1073_v28, 0.0  ;;  %v1117_v28 = vadd.s32 %v2226_v43, %v1100_v17 }
 0x241   : > { %1156 = vst [vmem:[%s2240_s30 + $0x28] sm:$0xff] %v2266_v29  ;;  %v1193_v12 = vmul.f32 %v2266_v29, %v2266_v29  ;;  %v1171_v16 = vadd.f32 %v2259_v21, %v2266_v29 }
 0x242   : > { %vm1133_vm14 = vcmp.lt.s32.totalorder %v1117_v28, 160 }
 0x243   : > { %v1043_v31 = vpop.f32.mrf.mxu3  ;;  %v1208_v18 = vadd.f32 %v2262_v24, %v1193_v12 }
 0x244   : > { %v1044_v32 = vadd.f32 %v2231_v44, %v1043_v31 }
 0x246   : > { %v1074_v34 = vmax.f32 %v1044_v32, 0.0 }
 0x248   : > { %v1141_v35 = vsel %vm1125_vm6, %v1074_v34, 0.0 }
 0x249   : > { %1157 = vst [vmem:[%s2240_s30 + $0x30] sm:$0xff] %v1141_v35  ;;  %v1194_v14 = vmul.f32 %v1141_v35, %v1141_v35  ;;  %v1172_v22 = vadd.f32 %v1171_v16, %v1141_v35  ;;  %v1101_v35 = vadd.s32 120, %v2224_v42 }
 0x24b   : > { %v1045_v37 = vpop.f32.mrf.mxu3  ;;  %v1209_v23 = vadd.f32 %v1208_v18, %v1194_v14 }
 0x24c   : > { %v1046_v38 = vadd.f32 %v2231_v44, %v1045_v37 }
 0x24e   : > { %v1075_v40 = vmax.f32 %v1046_v38, 0.0 }
 0x250   : > { %v1142_v41 = vsel %vm1126_vm7, %v1075_v40, 0.0 }
 0x251   : > { %1158 = vst [vmem:[%s2240_s30 + $0x38] sm:$0xff] %v1142_v41  ;;  %v1195_v19 = vmul.f32 %v1142_v41, %v1142_v41  ;;  %v1173_v27 = vadd.f32 %v1172_v22, %v1142_v41 }
 0x253   : > { %v1048_v46 = vpop.f32.mrf.mxu3  ;;  %v1210_v30 = vadd.f32 %v1209_v23, %v1195_v19 }
 0x254   : > { %v1049_v47 = vadd.f32 %v2231_v44, %v1048_v46 }
 0x256   : > { %v1076_v49 = vmax.f32 %v1049_v47, 0.0  ;;  %v1118_v47 = vadd.s32 %v2226_v43, %v1101_v35 }
 0x258   : > { %v1143_v50 = vsel %vm1127_vm8, %v1076_v49, 0.0  ;;  %vm1134_vm15 = vcmp.lt.s32.totalorder %v1118_v47, 160 }
 0x259   : > { %1159 = vst [vmem:[%s2240_s30 + $0x40] sm:$0xff] %v1143_v50  ;;  %v1196_v25 = vmul.f32 %v1143_v50, %v1143_v50  ;;  %v1174_v31 = vadd.f32 %v1173_v27, %v1143_v50 }
 0x25b   : > { %v1050_v52 = vpop.f32.mrf.mxu3  ;;  %v1211_v29 = vadd.f32 %v1210_v30, %v1196_v25 }
 0x25c   : > { %v1051_v53 = vadd.f32 %v2231_v44, %v1050_v52 }
 0x25e   : > { %v1077_v55 = vmax.f32 %v1051_v53, 0.0 }
 0x260   : > { %v1144_v56 = vsel %vm1128_vm9, %v1077_v55, 0.0 }
 0x261   : > { %1160 = vst [vmem:[%s2240_s30 + $0x48] sm:$0xff] %v1144_v56  ;;  %v1197_v32 = vmul.f32 %v1144_v56, %v1144_v56  ;;  %v1175_v34 = vadd.f32 %v1174_v31, %v1144_v56 }
 0x263   : > { %v1053_v58 = vpop.f32.mrf.mxu3  ;;  %v1212_v37 = vadd.f32 %v1211_v29, %v1197_v32 }
 0x264   : > { %v1054_v59 = vadd.f32 %v2231_v44, %v1053_v58 }
 0x266   : > { %v1078_v61 = vmax.f32 %v1054_v59, 0.0 }
 0x268   : > { %v1145_v62 = vsel %vm1129_vm10, %v1078_v61, 0.0 }
 0x269   : > { %1161 = vst [vmem:[%s2240_s30 + $0x50] sm:$0xff] %v1145_v62  ;;  %v1198_v24 = vmul.f32 %v1145_v62, %v1145_v62  ;;  %v1176_v38 = vadd.f32 %v1175_v34, %v1145_v62 }
 0x26b   : > { %v1055_v0 = vpop.f32.mrf.mxu3  ;;  %v1213_v41 = vadd.f32 %v1212_v37, %v1198_v24 }
 0x26c   : > { %v1056_v1 = vadd.f32 %v2231_v44, %v1055_v0 }
 0x26e   : > { %v1079_v3 = vmax.f32 %v1056_v1, 0.0 }
 0x270   : > { %v1146_v4 = vsel %vm1130_vm11, %v1079_v3, 0.0 }
 0x271   : > { %1162 = vst [vmem:[%s2240_s30 + $0x58] sm:$0xff] %v1146_v4  ;;  %v1199_v39 = vmul.f32 %v1146_v4, %v1146_v4  ;;  %v1177_v45 = vadd.f32 %v1176_v38, %v1146_v4 }
 0x273   : > { %v1058_v6 = vpop.f32.mrf.mxu3  ;;  %v1214_v48 = vadd.f32 %v1213_v41, %v1199_v39 }
 0x274   : > { %v1059_v7 = vadd.f32 %v2231_v44, %v1058_v6 }
 0x276   : > { %v1080_v9 = vmax.f32 %v1059_v7, 0.0 }
 0x278   : > { %v1147_v10 = vsel %vm1131_vm12, %v1080_v9, 0.0 }
 0x279   : > { %1163 = vst [vmem:[%s2240_s30 + $0x60] sm:$0xff] %v1147_v10  ;;  %v1200_v46 = vmul.f32 %v1147_v10, %v1147_v10  ;;  %v1178_v49 = vadd.f32 %v1177_v45, %v1147_v10 }
 0x27b   : > { %v1060_v13 = vpop.f32.mrf.mxu3  ;;  %v1215_v53 = vadd.f32 %v1214_v48, %v1200_v46 }
 0x27c   : > { %v1061_v15 = vadd.f32 %v2231_v44, %v1060_v13 }
 0x27e   : > { %v1081_v20 = vmax.f32 %v1061_v15, 0.0 }
 0x280   : > { %v1148_v26 = vsel %vm1132_vm13, %v1081_v20, 0.0 }
 0x281   : > { %1164 = vst [vmem:[%s2240_s30 + $0x68] sm:$0xff] %v1148_v26  ;;  %v1201_v50 = vmul.f32 %v1148_v26, %v1148_v26  ;;  %v1179_v54 = vadd.f32 %v1178_v49, %v1148_v26 }
 0x283   : > { %v1063_v21 = vpop.f32.mrf.mxu3  ;;  %v1216_v57 = vadd.f32 %v1215_v53, %v1201_v50 }
 0x284   : > { %v1064_v33 = vadd.f32 %v2231_v44, %v1063_v21 }
 0x286   : > { %v1082_v36 = vmax.f32 %v1064_v33, 0.0 }
 0x288   : > { %v1149_v40 = vsel %vm1133_vm14, %v1082_v36, 0.0 }
 0x289   : > { %1165 = vst [vmem:[%s2240_s30 + $0x70] sm:$0xff] %v1149_v40  ;;  %v1202_v55 = vmul.f32 %v1149_v40, %v1149_v40  ;;  %v1180_v58 = vadd.f32 %v1179_v54, %v1149_v40 }
 0x28b   : > { %v1065_v51 = vpop.f32.mrf.mxu3  ;;  %v1217_v60 = vadd.f32 %v1216_v57, %v1202_v55 }
 0x28c   : > { %v1066_v52 = vadd.f32 %v2231_v44, %v1065_v51 }
 0x28e   : > { %v1083_v56 = vmax.f32 %v1066_v52, 0.0 }
 0x290   : > { %v1150_v59 = vsel %vm1134_vm15, %v1083_v56, 0.0 }
 0x291   : > { %1166 = vst [vmem:[%s2240_s30 + $0x78] sm:$0xff] %v1150_v59  ;;  %v1181_v61 = vadd.f32 %v1180_v58, %v1150_v59  ;;  %v1203_v43 = vmul.f32 %v1150_v59, %v1150_v59 }
 0x293   : > { %v1182_v62 = vrot.slane %v1181_v61, 4  ;;  %v1218_v63 = vadd.f32 %v1217_v60, %v1203_v43 }
 0x295   : > { %v1183_v0 = vadd.f32 %v1182_v62, %v1181_v61  ;;  %v1219_v1 = vrot.slane %v1218_v63, 4 }
 0x297   : > { %v1184_v44 = vrot.slane %v1183_v0, 2  ;;  %v1220_v2 = vadd.f32 %v1219_v1, %v1218_v63 }
 0x299   : > { %v1185_v3 = vadd.f32 %v1184_v44, %v1183_v0  ;;  %v1221_v4 = vrot.slane %v1220_v2, 2 }
 0x29b   : > { %v1186_v5 = vrot.slane %v1185_v3, 1  ;;  %v1222_v6 = vadd.f32 %v1221_v4, %v1220_v2 }
 0x29d   : > { %v1187_v7 = vadd.f32 %v1186_v5, %v1185_v3  ;;  %v1223_v8 = vrot.slane %v1222_v6, 1 }
 0x29f   : > { %v1224_v9 = vadd.f32 %v1223_v8, %v1222_v6  ;;  %v1226_v10 = vsel %vm1225_vm0, %v1187_v7, 0.0 }
 0x2a1   : > { %v1228_v11 = vsel %vm1227_vm1, %v1224_v9, 0.0 }
 0x2a2   : > { %v1229_v12 = vadd.f32 %v1228_v11, %v1226_v10 }
 0x2a4   : > { %1230 = vst [vmem:[%s431_s17] sm:$0xff] %v1229_v12 }
 0x2a5 PF: > { %s2360_s0 = sld [smem:[#allocation15_spill]]  ;;  %p21_p5 = scmp.ge.s32.totalorder %s2068_s18, 4  }
 0x2a6   : > { %s2361_s29 = sld [smem:[#allocation16_spill]]  ;;  %s2362_s27 = smov %s1959_s28 }
 0x2a7   : > { %s2364_s30 = smov %s2068_s18  ;;  %23 = sbr.rel (!%p21_p5) target bundleno = 8 (0x8), region = 123 }
 0x2ab   : > { %s2363_s28 = smov %s2360_s0 }
 0x2ac   :  { %1267 = vsyncpa [#allocation3], 1 }
 0x2ad   :  { %1269 = vsyncpa [#allocation3 + $0x1], 1 }
 0x2ae   :  { %1270 = vsyncpa [#allocation5], 1 }
 0x2af   :  { %1271 = vsyncpa [#allocation9], 1 }

// kernel: gin_encoder_forward.8
= control target key start
LH: loop header
LB: loop body
LE: loop exit
PB: predicated region body
PF: predicated region fallthrough
CT: control target
= control target key end

     0   :  { %s1602_s27 = smov 0   ;;  %s1871_s0 = inlined_call_operand.vmem [shape: bf16[256,256], index: 0, kind: input, shape index: {}]   ;;  %s1872_s1 = inlined_call_operand.vmem [shape: bf16[256,128], index: 1, kind: input, shape index: {}, may-alias: {1,2}]   ;;  %s1873_s2 = inlined_call_operand.vmem [shape: bf16[256,128], index: 2, kind: input, shape index: {}, may-alias: {1,2}]   ;;  %s1874_s3 = inlined_call_operand.vmem [shape: bf16[128,128], index: 3, kind: input, shape index: {}]   ;;  %s1875_s4 = inlined_call_operand.vmem [shape: f32[1,128], index: 4, kind: input, shape index: {}]   ;;  %s1876_s5 = inlined_call_operand.vmem [shape: bf16[128,128], index: 5, kind: input, shape index: {}]   ;;  %s1877_s6 = inlined_call_operand.vmem [shape: f32[1,128], index: 6, kind: input, shape index: {}]   ;;  %s1878_s7 = inlined_call_operand.vmem [shape: f32[256,128], index: 7, kind: output, shape index: {0}]   ;;  %s1879_s8 = inlined_call_operand.vmem [shape: f32[16,128], index: 8, kind: output, shape index: {1}]  }
   0x1 LB: > { %s1608_s28 = sadd.s32 4294967295, %s1555_s27   ;;  %p1247_p0 = scmp.ge.s32.totalorder %s1555_s27, 1  ;;  %s1555_s27 = sphi %s1602_s27, %s19_s27  }
   0x2   : > { %p278_p1 = scmp.lt.s32.totalorder %s1555_s27, 3 }
   0x4   : > { %p279_p2 = pnand %p1247_p0, %p278_p1 }
   0x5   : > { %s1248_s19 = sshll.u32 (!%p279_p2), %s1608_s28, 4  ;;  %p341_p4 = scmp.lt.s32.totalorder (!%p279_p2), %s1608_s28, 1 }
   0x6   : > { %282 = sbr.rel (%p279_p2) target bundleno = 607 (0x25f), region = 48  ;;  %p323_p3 = scmp.lt.s32.totalorder (!%p279_p2), %s1248_s19, 31 }
   0xb   : > { %v1475_v0 = vld [vmem:[%s1872_s1 + $0x38] sm:$0xff]  ;;  %v1474_v2 = vld [vmem:[%s1872_s1 + $0x30] sm:$0xff]  ;;  %v1473_v4 = vld [vmem:[%s1872_s1 + $0x28] sm:$0xff]  ;;  %s1881_s19 = smov (!%p323_p3, %s1248_s19), 31 }
   0xc   : > { %v1483_v1 = vld [vmem:[%s1872_s1 + $0x78] sm:$0xff]  ;;  %569 = vmatpush.bf16.msra.mxu0 %v1475_v0  ;;  %v1482_v3 = vld [vmem:[%s1872_s1 + $0x70] sm:$0xff]  ;;  %v1481_v5 = vld [vmem:[%s1872_s1 + $0x68] sm:$0xff]  ;;  %s1451_s12 = sshll.u32 %s1881_s19, 3  ;;  %s1252_s24 = sshll.u32 %s1881_s19, 2 }
   0xd   : > { %618 = vmatpush.bf16.msra.mxu1 %v1483_v1  ;;  %v1472_v6 = vld [vmem:[%s1872_s1 + $0x20] sm:$0xff]  ;;  %v1471_v8 = vld [vmem:[%s1872_s1 + $0x18] sm:$0xff]  ;;  %v1470_v10 = vld [vmem:[%s1872_s1 + $0x10] sm:$0xff]  ;;  %s1663_s20 = scalar_lea.vmem %s1871_s0, %s1451_s12  ;;  %s1731_s29 = scalar_lea.vmem %s1873_s2, %s1252_s24 }
   0xe   : > { %v1480_v7 = vld [vmem:[%s1872_s1 + $0x60] sm:$0xff]  ;;  %v1479_v9 = vld [vmem:[%s1872_s1 + $0x58] sm:$0xff]  ;;  %v1478_v11 = vld [vmem:[%s1872_s1 + $0x50] sm:$0xff]  ;;  %s1787_s13 = scalar_lea.vmem %s1878_s7, %s1451_s12 }
   0xf   : > { %v1469_v12 = vld [vmem:[%s1872_s1 + $0x8] sm:$0xff]  ;;  %v1468_v14 = vld [vmem:[%s1872_s1] sm:$0xff]  ;;  %v1266_v22 = vld [vmem:[%s1663_s20 + $0x10] sm:$0xf] }
  0x10   : > { %570 = vmatpush.bf16.msra.mxu0 %v1474_v2  ;;  %v1477_v13 = vld [vmem:[%s1872_s1 + $0x48] sm:$0xff]  ;;  %v1476_v15 = vld [vmem:[%s1872_s1 + $0x40] sm:$0xff]  ;;  %v1455_v23 = vld [vmem:[%s1663_s20 + $0x14] sm:$0xf0] }
  0x11   : > { %619 = vmatpush.bf16.msra.mxu1 %v1482_v3  ;;  %v1258_v16 = vld [vmem:[%s1663_s20] sm:$0xf]  ;;  %v1453_v17 = vld [vmem:[%s1663_s20 + $0x4] sm:$0xf0]  ;;  %v1452_v18 = vld [vmem:[%s1663_s20 + $0x4] sm:$0xf]  ;;  %v1267_v26 = vor.u32 %v1455_v23, %v1266_v22 }
  0x12   : > { %v1260_v19 = vld [vmem:[%s1663_s20 + $0x8] sm:$0xf0]  ;;  %v1259_v20 = vor.u32 %v1453_v17, %v1258_v16  ;;  %v1454_v24 = vld [vmem:[%s1663_s20 + $0x14] sm:$0xf]  ;;  %v1268_v25 = vld [vmem:[%s1663_s20 + $0x18] sm:$0xf0] }
  0x13   : > { %v1263_v21 = vor.u32 %v1452_v18, %v1260_v19  ;;  %v1271_v27 = vor.u32 %v1454_v24, %v1268_v25  ;;  %v1274_v28 = vld [vmem:[%s1663_s20 + $0x20] sm:$0xf]  ;;  %v1457_v29 = vld [vmem:[%s1663_s20 + $0x24] sm:$0xf0]  ;;  %v1456_v30 = vld [vmem:[%s1663_s20 + $0x24] sm:$0xf] }
  0x14   : > { %571 = vmatpush.bf16.msra.mxu0 %v1473_v4  ;;  %v1276_v31 = vld [vmem:[%s1663_s20 + $0x28] sm:$0xf0]  ;;  %v1275_v32 = vor.u32 %v1457_v29, %v1274_v28  ;;  %v1282_v34 = vld [vmem:[%s1663_s20 + $0x30] sm:$0xf]  ;;  %v1459_v35 = vld [vmem:[%s1663_s20 + $0x34] sm:$0xf0] }
  0x15   : > { %620 = vmatpush.bf16.msra.mxu1 %v1481_v5  ;;  %v1279_v33 = vor.u32 %v1456_v30, %v1276_v31  ;;  %v1458_v36 = vld [vmem:[%s1663_s20 + $0x34] sm:$0xf]  ;;  %v1284_v37 = vld [vmem:[%s1663_s20 + $0x38] sm:$0xf0]  ;;  %v1283_v38 = vor.u32 %v1459_v35, %v1282_v34  ;;  %v1290_v40 = vld [vmem:[%s1663_s20 + $0x40] sm:$0xf] }
  0x16   : > { %v1287_v39 = vor.u32 %v1458_v36, %v1284_v37  ;;  %v1461_v41 = vld [vmem:[%s1663_s20 + $0x44] sm:$0xf0]  ;;  %v1460_v42 = vld [vmem:[%s1663_s20 + $0x44] sm:$0xf]  ;;  %v1292_v43 = vld [vmem:[%s1663_s20 + $0x48] sm:$0xf0] }
  0x17   : > { %v1291_v44 = vor.u32 %v1461_v41, %v1290_v40  ;;  %v1295_v45 = vor.u32 %v1460_v42, %v1292_v43  ;;  %v1491_v46 = vld [vmem:[%s1874_s3 + $0x38] sm:$0xff]  ;;  %v1298_v47 = vld [vmem:[%s1663_s20 + $0x50] sm:$0xf]  ;;  %v1462_v49 = vld [vmem:[%s1663_s20 + $0x54] sm:$0xf] }
  0x18   : > { %572 = vmatpush.bf16.msra.mxu0 %v1472_v6  ;;  %791 = vmatpush.bf16.msra.mxu2 %v1491_v46  ;;  %v1463_v48 = vld [vmem:[%s1663_s20 + $0x54] sm:$0xf0]  ;;  %v1300_v50 = vld [vmem:[%s1663_s20 + $0x58] sm:$0xf0]  ;;  %v1490_v53 = vld [vmem:[%s1874_s3 + $0x30] sm:$0xff] }
  0x19   : > { %621 = vmatpush.bf16.msra.mxu1 %v1480_v7  ;;  %v1299_v51 = vor.u32 %v1463_v48, %v1298_v47  ;;  %v1303_v52 = vor.u32 %v1462_v49, %v1300_v50  ;;  %v1489_v54 = vld [vmem:[%s1874_s3 + $0x28] sm:$0xff]  ;;  %v1488_v55 = vld [vmem:[%s1874_s3 + $0x20] sm:$0xff]  ;;  %v1487_v60 = vld [vmem:[%s1874_s3 + $0x18] sm:$0xff] }
  0x1a   : > { %v1306_v56 = vld [vmem:[%s1663_s20 + $0x60] sm:$0xf]  ;;  %v1465_v57 = vld [vmem:[%s1663_s20 + $0x64] sm:$0xf0]  ;;  %v1464_v58 = vld [vmem:[%s1663_s20 + $0x64] sm:$0xf] }
  0x1b   : > { %v1308_v59 = vld [vmem:[%s1663_s20 + $0x68] sm:$0xf0]  ;;  %v1307_v61 = vor.u32 %v1465_v57, %v1306_v56  ;;  %v1486_v63 = vld [vmem:[%s1874_s3 + $0x10] sm:$0xff]  ;;  %v1484_v1 = vld [vmem:[%s1874_s3] sm:$0xff] }
  0x1c   : > { %573 = vmatpush.bf16.msra.mxu0 %v1471_v8  ;;  %792 = vmatpush.bf16.msra.mxu2 %v1490_v53  ;;  %v1311_v62 = vor.u32 %v1464_v58, %v1308_v59  ;;  %v1485_v0 = vld [vmem:[%s1874_s3 + $0x8] sm:$0xff]  ;;  %v1314_v2 = vld [vmem:[%s1663_s20 + $0x70] sm:$0xf]  ;;  %v1467_v3 = vld [vmem:[%s1663_s20 + $0x74] sm:$0xf0] }
  0x1d   : > { %622 = vmatpush.bf16.msra.mxu1 %v1479_v9  ;;  %v1466_v4 = vld [vmem:[%s1663_s20 + $0x74] sm:$0xf]  ;;  %v1316_v5 = vld [vmem:[%s1663_s20 + $0x78] sm:$0xf0]  ;;  %v1315_v6 = vor.u32 %v1467_v3, %v1314_v2  ;;  %v1532_v22 = vld [vmem:[%s1731_s29 + $0x8] sm:$0xff]   ;;  %s1448_s20 = sshll.u32 %s1608_s28, 7 }
  0x1e   : > { %v1319_v7 = vor.u32 %v1466_v4, %v1316_v5  ;;  %v1506_v24 = vunpack.c.l.bf16 %v1532_v22  ;;  %v1507_v25 = vunpack.c.h.bf16 %v1532_v22  ;;  %v1533_v34 = vld [vmem:[%s1731_s29 + $0x10] sm:$0xff]   ;;  %v1534_v46 = vld [vmem:[%s1731_s29 + $0x18] sm:$0xff]   ;;  %v1535_v58 = vld [vmem:[%s1731_s29 + $0x20] sm:$0xff]   ;;  %s1883_s28 = smov (!%p341_p4, %s1608_s28), 1 }
  0x1f   : > { %v1510_v36 = vunpack.c.l.bf16 %v1533_v34  ;;  %v1511_v37 = vunpack.c.h.bf16 %v1533_v34  ;;  %v1514_v48 = vunpack.c.l.bf16 %v1534_v46  ;;  %v1515_v49 = vunpack.c.h.bf16 %v1534_v46  ;;  %v1495_v34 = vld [vmem:[%s1876_s5 + $0x18] sm:$0xff]  ;;  %v1492_v46 = vld [vmem:[%s1876_s5] sm:$0xff]  ;;  %s1255_s19 = sshll.u32 %s1883_s28, 3 }
  0x20   : > { %574 = vmatpush.bf16.msra.mxu0 %v1470_v10  ;;  %793 = vmatpush.bf16.msra.mxu2 %v1489_v54  ;;  %v1501_v10 = vld [vmem:[%s1731_s29] sm:$0xff]   ;;  %s344_s15 = scalar_lea.vmem %s1879_s8, %s1255_s19 }
  0x21   : > { %623 = vmatpush.bf16.msra.mxu1 %v1478_v11 }
  0x24   : > { %575 = vmatpush.bf16.msra.mxu0 %v1469_v12  ;;  %794 = vmatpush.bf16.msra.mxu2 %v1488_v55  ;;  %v1502_v12 = vunpack.c.l.bf16 %v1501_v10 }
  0x25   : > { %624 = vmatpush.bf16.msra.mxu1 %v1477_v13  ;;  %v1503_v13 = vunpack.c.h.bf16 %v1501_v10 }
  0x28   : > { %576 = vmatpush.bf16.msra.mxu0 %v1468_v14  ;;  %795 = vmatpush.bf16.msra.mxu2 %v1487_v60  ;;  %v1518_v60 = vunpack.c.l.bf16 %v1535_v58 }
  0x29   : > { %625 = vmatpush.bf16.msra.mxu1 %v1476_v15 }
  0x2b   : > { %577 = vmatmul.bf16.vlgmr.msra.gmra.mxu0 %v1259_v20 }
  0x2c   : > { %626 = vmatmul.bf16.vlgmr.msra.gmra.mxu1 %v1263_v21  ;;  %796 = vmatpush.bf16.msra.mxu2 %v1486_v63 }
  0x30   : > { %797 = vmatpush.bf16.msra.mxu2 %v1485_v0 }
  0x34   : > { %798 = vmatpush.bf16.msra.mxu2 %v1484_v1 }
  0x3b   : > { %582 = vmatmul.bf16.gmra.mxu0 %v1267_v26 }
  0x3c   : > { %631 = vmatmul.bf16.gmra.mxu1 %v1271_v27 }
  0x4b   : > { %587 = vmatmul.bf16.gmra.mxu0 %v1275_v32 }
  0x4c   : > { %636 = vmatmul.bf16.gmra.mxu1 %v1279_v33 }
  0x5b   : > { %592 = vmatmul.bf16.gmra.mxu0 %v1283_v38 }
  0x5c   : > { %641 = vmatmul.bf16.gmra.mxu1 %v1287_v39 }
  0x6b   : > { %597 = vmatmul.bf16.gmra.mxu0 %v1291_v44 }
  0x6c   : > { %646 = vmatmul.bf16.gmra.mxu1 %v1295_v45 }
  0x7b   : > { %602 = vmatmul.bf16.gmra.mxu0 %v1299_v51 }
  0x7c   : > { %651 = vmatmul.bf16.gmra.mxu1 %v1303_v52 }
  0x8b   : > { %607 = vmatmul.bf16.gmra.mxu0 %v1307_v61  ;;  %v1519_v61 = vunpack.c.h.bf16 %v1535_v58 }
  0x8c   : > { %656 = vmatmul.bf16.gmra.mxu1 %v1311_v62 }
  0x9b   : > { %612 = vmatmul.bf16.gmra.mxu0 %v1315_v6  ;;  %v1536_v6 = vld [vmem:[%s1731_s29 + $0x28] sm:$0xff]  }
  0x9c   : > { %661 = vmatmul.bf16.gmra.mxu1 %v1319_v7 }
  0xa8   : > { %v578_v8 = vpop.f32.mrf.mxu0 }
  0xa9   : > { %v627_v9 = vpop.f32.mrf.mxu1 }
  0xaa   : > { %v628_v11 = vadd.f32 %v627_v9, %v578_v8  ;;  %v1522_v8 = vunpack.c.l.bf16 %v1536_v6  ;;  %v1523_v9 = vunpack.c.h.bf16 %v1536_v6 }
  0xac   : > { %v699_v17 = vadd.f32 %v1502_v12, %v628_v11 }
  0xb0   : > { %v580_v14 = vpop.f32.mrf.mxu0 }
  0xb1   : > { %v629_v15 = vpop.f32.mrf.mxu1 }
  0xb2   : > { %v630_v16 = vadd.f32 %v629_v15, %v580_v14 }
  0xb4   : > { %v700_v18 = vadd.f32 %v1503_v13, %v630_v16  ;;  %v1499_v16 = vld [vmem:[%s1876_s5 + $0x38] sm:$0xff] }
  0xb5   : > { %932 = vmatpush.bf16.msra.mxu3 %v1499_v16 }
  0xb6   : > { %v715_v19 = vpack.c.bf16 %v700_v18, %v699_v17 }
  0xb8   : > { %799 = vmatmul.bf16.vlgmr.msra.gmra.mxu2 %v715_v19  ;;  %v583_v20 = vpop.f32.mrf.mxu0  ;;  %v1498_v19 = vld [vmem:[%s1876_s5 + $0x30] sm:$0xff] }
  0xb9   : > { %v632_v21 = vpop.f32.mrf.mxu1  ;;  %933 = vmatpush.bf16.msra.mxu3 %v1498_v19 }
  0xba   : > { %v633_v23 = vadd.f32 %v632_v21, %v583_v20  ;;  %v1537_v20 = vld [vmem:[%s1731_s29 + $0x30] sm:$0xff]   ;;  %v1497_v21 = vld [vmem:[%s1876_s5 + $0x28] sm:$0xff] }
  0xbc   : > { %v701_v29 = vadd.f32 %v1506_v24, %v633_v23  ;;  %v1526_v23 = vunpack.c.l.bf16 %v1537_v20  ;;  %v1527_v24 = vunpack.c.h.bf16 %v1537_v20 }
  0xbd   : > { %934 = vmatpush.bf16.msra.mxu3 %v1497_v21 }
  0xc0   : > { %v585_v26 = vpop.f32.mrf.mxu0 }
  0xc1   : > { %v634_v27 = vpop.f32.mrf.mxu1 }
  0xc2   : > { %v635_v28 = vadd.f32 %v634_v27, %v585_v26 }
  0xc4   : > { %v702_v30 = vadd.f32 %v1507_v25, %v635_v28  ;;  %v1496_v28 = vld [vmem:[%s1876_s5 + $0x20] sm:$0xff] }
  0xc5   : > { %935 = vmatpush.bf16.msra.mxu3 %v1496_v28 }
  0xc6   : > { %v716_v31 = vpack.c.bf16 %v702_v30, %v701_v29 }
  0xc8   : > { %804 = vmatmul.bf16.gmra.mxu2 %v716_v31  ;;  %v588_v32 = vpop.f32.mrf.mxu0 }
  0xc9   : > { %v637_v33 = vpop.f32.mrf.mxu1  ;;  %936 = vmatpush.bf16.msra.mxu3 %v1495_v34 }
  0xca   : > { %v638_v35 = vadd.f32 %v637_v33, %v588_v32 }
  0xcc   : > { %v703_v41 = vadd.f32 %v1510_v36, %v638_v35  ;;  %v1538_v35 = vld [vmem:[%s1731_s29 + $0x38] sm:$0xff]   ;;  %v1494_v36 = vld [vmem:[%s1876_s5 + $0x10] sm:$0xff] }
  0xcd   : > { %937 = vmatpush.bf16.msra.mxu3 %v1494_v36 }
  0xd0   : > { %v590_v38 = vpop.f32.mrf.mxu0 }
  0xd1   : > { %v639_v39 = vpop.f32.mrf.mxu1 }
  0xd2   : > { %v640_v40 = vadd.f32 %v639_v39, %v590_v38  ;;  %v1530_v38 = vunpack.c.l.bf16 %v1538_v35  ;;  %v1531_v39 = vunpack.c.h.bf16 %v1538_v35 }
  0xd4   : > { %v704_v42 = vadd.f32 %v1511_v37, %v640_v40 }
  0xd6   : > { %v717_v43 = vpack.c.bf16 %v704_v42, %v703_v41  ;;  %v1493_v42 = vld [vmem:[%s1876_s5 + $0x8] sm:$0xff] }
  0xd7   : > { %938 = vmatpush.bf16.msra.mxu3 %v1493_v42 }
  0xd8   : > { %809 = vmatmul.bf16.gmra.mxu2 %v717_v43  ;;  %v593_v44 = vpop.f32.mrf.mxu0 }
  0xd9   : > { %v642_v45 = vpop.f32.mrf.mxu1 }
  0xda   : > { %v643_v47 = vadd.f32 %v642_v45, %v593_v44 }
  0xdb   : > { %939 = vmatpush.bf16.msra.mxu3 %v1492_v46 }
  0xdc   : > { %v705_v53 = vadd.f32 %v1514_v48, %v643_v47 }
  0xe0   : > { %v595_v50 = vpop.f32.mrf.mxu0 }
  0xe1   : > { %v644_v51 = vpop.f32.mrf.mxu1 }
  0xe2   : > { %v645_v52 = vadd.f32 %v644_v51, %v595_v50 }
  0xe4   : > { %v706_v54 = vadd.f32 %v1515_v49, %v645_v52  ;;  %v1547_v49 = vld [vmem:[%s1875_s4] ss:$0 sm:$0xff] }
  0xe6   : > { %v718_v55 = vpack.c.bf16 %v706_v54, %v705_v53 }
  0xe8   : > { %814 = vmatmul.bf16.gmra.mxu2 %v718_v55  ;;  %v598_v56 = vpop.f32.mrf.mxu0 }
  0xe9   : > { %v647_v57 = vpop.f32.mrf.mxu1 }
  0xea   : > { %v648_v59 = vadd.f32 %v647_v57, %v598_v56 }
  0xec   : > { %v707_v1 = vadd.f32 %v1518_v60, %v648_v59 }
  0xf0   : > { %v600_v62 = vpop.f32.mrf.mxu0 }
  0xf1   : > { %v649_v63 = vpop.f32.mrf.mxu1 }
  0xf2   : > { %v650_v0 = vadd.f32 %v649_v63, %v600_v62 }
  0xf4   : > { %v708_v2 = vadd.f32 %v1519_v61, %v650_v0 }
  0xf6   : > { %v719_v3 = vpack.c.bf16 %v708_v2, %v707_v1 }
  0xf8   : > { %819 = vmatmul.bf16.gmra.mxu2 %v719_v3  ;;  %v603_v4 = vpop.f32.mrf.mxu0 }
  0xf9   : > { %v652_v5 = vpop.f32.mrf.mxu1 }
  0xfa   : > { %v653_v7 = vadd.f32 %v652_v5, %v603_v4 }
  0xfc   : > { %v709_v13 = vadd.f32 %v1522_v8, %v653_v7 }
 0x100   : > { %v605_v10 = vpop.f32.mrf.mxu0 }
 0x101   : > { %v654_v11 = vpop.f32.mrf.mxu1 }
 0x102   : > { %v655_v12 = vadd.f32 %v654_v11, %v605_v10 }
 0x104   : > { %v710_v14 = vadd.f32 %v1523_v9, %v655_v12 }
 0x106   : > { %v720_v15 = vpack.c.bf16 %v710_v14, %v709_v13 }
 0x108   : > { %824 = vmatmul.bf16.gmra.mxu2 %v720_v15  ;;  %v608_v17 = vpop.f32.mrf.mxu0 }
 0x109   : > { %v657_v18 = vpop.f32.mrf.mxu1 }
 0x10a   : > { %v658_v22 = vadd.f32 %v657_v18, %v608_v17 }
 0x10c   : > { %v711_v29 = vadd.f32 %v1526_v23, %v658_v22 }
 0x110   : > { %v610_v25 = vpop.f32.mrf.mxu0 }
 0x111   : > { %v659_v26 = vpop.f32.mrf.mxu1 }
 0x112   : > { %v660_v27 = vadd.f32 %v659_v26, %v610_v25 }
 0x114   : > { %v712_v30 = vadd.f32 %v1527_v24, %v660_v27 }
 0x116   : > { %v721_v31 = vpack.c.bf16 %v712_v30, %v711_v29 }
 0x118   : > { %829 = vmatmul.bf16.gmra.mxu2 %v721_v31  ;;  %v613_v32 = vpop.f32.mrf.mxu0 }
 0x119   : > { %v662_v33 = vpop.f32.mrf.mxu1 }
 0x11a   : > { %v663_v37 = vadd.f32 %v662_v33, %v613_v32 }
 0x11c   : > { %v713_v44 = vadd.f32 %v1530_v38, %v663_v37 }
 0x120   : > { %v615_v40 = vpop.f32.mrf.mxu0 }
 0x121   : > { %v664_v41 = vpop.f32.mrf.mxu1 }
 0x122   : > { %v665_v43 = vadd.f32 %v664_v41, %v615_v40  ;;  %v998_v41 = vlaneseq }
 0x124   : > { %v714_v45 = vadd.f32 %v1531_v39, %v665_v43  ;;  %v1769_v42 = vshrl.u32 %v998_v41, 7  ;;  %v1771_v43 = vstv %s1448_s20 }
 0x126   : > { %v722_v47 = vpack.c.bf16 %v714_v45, %v713_v44  ;;  %v1776_v44 = vld [vmem:[%s1877_s6] ss:$0 sm:$0xff]  ;;  %v1016_v45 = vadd.s32 %v1771_v43, %v1769_v42 }
 0x128   : > { %834 = vmatmul.bf16.gmra.mxu2 %v722_v47  ;;  %vm1032_vm0 = vcmp.lt.s32.totalorder %v1016_v45, 160 }
 0x13b   : > { %v800_v48 = vpop.f32.mrf.mxu2 }
 0x13c   : > { %v801_v50 = vadd.f32 %v1547_v49, %v800_v48  ;;  %v1000_v48 = vadd.s32 8, %v1769_v42 }
 0x13e   : > { %v840_v53 = vmax.f32 %v801_v50, 0.0 }
 0x143   : > { %v802_v51 = vpop.f32.mrf.mxu2 }
 0x144   : > { %v803_v52 = vadd.f32 %v1547_v49, %v802_v51  ;;  %v1017_v51 = vadd.s32 %v1771_v43, %v1000_v48  ;;  %v1008_v48 = vadd.s32 72, %v1769_v42 }
 0x146   : > { %v841_v54 = vmax.f32 %v803_v52, 0.0  ;;  %vm1033_vm1 = vcmp.lt.s32.totalorder %v1017_v51, 160  ;;  %v1025_v51 = vadd.s32 %v1771_v43, %v1008_v48 }
 0x148   : > { %v856_v55 = vpack.c.bf16 %v841_v54, %v840_v53  ;;  %v1001_v54 = vadd.s32 16, %v1769_v42  ;;  %vm1041_vm9 = vcmp.lt.s32.totalorder %v1025_v51, 160 }
 0x14a   : > { %940 = vmatmul.bf16.vlgmr.msra.gmra.mxu3 %v856_v55 }
 0x14b   : > { %v805_v56 = vpop.f32.mrf.mxu2 }
 0x14c   : > { %v806_v57 = vadd.f32 %v1547_v49, %v805_v56 }
 0x14e   : > { %v842_v60 = vmax.f32 %v806_v57, 0.0 }
 0x153   : > { %v807_v58 = vpop.f32.mrf.mxu2 }
 0x154   : > { %v808_v59 = vadd.f32 %v1547_v49, %v807_v58 }
 0x156   : > { %v843_v61 = vmax.f32 %v808_v59, 0.0 }
 0x158   : > { %v857_v62 = vpack.c.bf16 %v843_v61, %v842_v60  ;;  %v1018_v60 = vadd.s32 %v1771_v43, %v1001_v54  ;;  %v1009_v54 = vadd.s32 80, %v1769_v42 }
 0x15a   : > { %945 = vmatmul.bf16.gmra.mxu3 %v857_v62  ;;  %vm1034_vm2 = vcmp.lt.s32.totalorder %v1018_v60, 160  ;;  %v1010_v60 = vadd.s32 88, %v1769_v42 }
 0x15b   : > { %v810_v63 = vpop.f32.mrf.mxu2 }
 0x15c   : > { %v811_v0 = vadd.f32 %v1547_v49, %v810_v63 }
 0x15e   : > { %v844_v3 = vmax.f32 %v811_v0, 0.0  ;;  %v1002_v0 = vadd.s32 24, %v1769_v42 }
 0x163   : > { %v812_v1 = vpop.f32.mrf.mxu2 }
 0x164   : > { %v813_v2 = vadd.f32 %v1547_v49, %v812_v1 }
 0x166   : > { %v845_v4 = vmax.f32 %v813_v2, 0.0 }
 0x168   : > { %v858_v5 = vpack.c.bf16 %v845_v4, %v844_v3 }
 0x16a   : > { %950 = vmatmul.bf16.gmra.mxu3 %v858_v5  ;;  %v1019_v5 = vadd.s32 %v1771_v43, %v1002_v0 }
 0x16b   : > { %v815_v6 = vpop.f32.mrf.mxu2 }
 0x16c   : > { %v816_v7 = vadd.f32 %v1547_v49, %v815_v6  ;;  %vm1035_vm3 = vcmp.lt.s32.totalorder %v1019_v5, 160 }
 0x16e   : > { %v846_v10 = vmax.f32 %v816_v7, 0.0 }
 0x173   : > { %v817_v8 = vpop.f32.mrf.mxu2 }
 0x174   : > { %v818_v9 = vadd.f32 %v1547_v49, %v817_v8 }
 0x176   : > { %v847_v11 = vmax.f32 %v818_v9, 0.0  ;;  %v1003_v9 = vadd.s32 32, %v1769_v42 }
 0x178   : > { %v859_v12 = vpack.c.bf16 %v847_v11, %v846_v10 }
 0x17a   : > { %955 = vmatmul.bf16.gmra.mxu3 %v859_v12 }
 0x17b   : > { %v820_v13 = vpop.f32.mrf.mxu2 }
 0x17c   : > { %v821_v14 = vadd.f32 %v1547_v49, %v820_v13 }
 0x17e   : > { %v848_v17 = vmax.f32 %v821_v14, 0.0  ;;  %v1020_v14 = vadd.s32 %v1771_v43, %v1003_v9 }
 0x180   : > { %vm1036_vm4 = vcmp.lt.s32.totalorder %v1020_v14, 160 }
 0x183   : > { %v822_v15 = vpop.f32.mrf.mxu2 }
 0x184   : > { %v823_v16 = vadd.f32 %v1547_v49, %v822_v15 }
 0x186   : > { %v849_v18 = vmax.f32 %v823_v16, 0.0 }
 0x188   : > { %v860_v19 = vpack.c.bf16 %v849_v18, %v848_v17  ;;  %v1004_v18 = vadd.s32 40, %v1769_v42 }
 0x18a   : > { %960 = vmatmul.bf16.gmra.mxu3 %v860_v19 }
 0x18b   : > { %v825_v20 = vpop.f32.mrf.mxu2 }
 0x18c   : > { %v826_v21 = vadd.f32 %v1547_v49, %v825_v20 }
 0x18e   : > { %v850_v24 = vmax.f32 %v826_v21, 0.0 }
 0x193   : > { %v827_v22 = vpop.f32.mrf.mxu2 }
 0x194   : > { %v828_v23 = vadd.f32 %v1547_v49, %v827_v22 }
 0x196   : > { %v851_v25 = vmax.f32 %v828_v23, 0.0  ;;  %v1021_v23 = vadd.s32 %v1771_v43, %v1004_v18 }
 0x198   : > { %v861_v26 = vpack.c.bf16 %v851_v25, %v850_v24  ;;  %vm1037_vm5 = vcmp.lt.s32.totalorder %v1021_v23, 160 }
 0x19a   : > { %965 = vmatmul.bf16.gmra.mxu3 %v861_v26 }
 0x19b   : > { %v830_v27 = vpop.f32.mrf.mxu2 }
 0x19c   : > { %v831_v28 = vadd.f32 %v1547_v49, %v830_v27  ;;  %v1005_v27 = vadd.s32 48, %v1769_v42 }
 0x19e   : > { %v852_v31 = vmax.f32 %v831_v28, 0.0 }
 0x1a3   : > { %v832_v29 = vpop.f32.mrf.mxu2 }
 0x1a4   : > { %v833_v30 = vadd.f32 %v1547_v49, %v832_v29 }
 0x1a6   : > { %v853_v32 = vmax.f32 %v833_v30, 0.0  ;;  %v1022_v30 = vadd.s32 %v1771_v43, %v1005_v27 }
 0x1a8   : > { %v862_v33 = vpack.c.bf16 %v853_v32, %v852_v31  ;;  %vm1038_vm6 = vcmp.lt.s32.totalorder %v1022_v30, 160 }
 0x1aa   : > { %970 = vmatmul.bf16.gmra.mxu3 %v862_v33  ;;  %v1006_v33 = vadd.s32 56, %v1769_v42 }
 0x1ab   : > { %v835_v34 = vpop.f32.mrf.mxu2 }
 0x1ac   : > { %v836_v35 = vadd.f32 %v1547_v49, %v835_v34 }
 0x1ae   : > { %v854_v38 = vmax.f32 %v836_v35, 0.0 }
 0x1b3   : > { %v837_v36 = vpop.f32.mrf.mxu2 }
 0x1b4   : > { %v838_v37 = vadd.f32 %v1547_v49, %v837_v36  ;;  %v1023_v36 = vadd.s32 %v1771_v43, %v1006_v33 }
 0x1b6   : > { %v855_v39 = vmax.f32 %v838_v37, 0.0  ;;  %vm1039_vm7 = vcmp.lt.s32.totalorder %v1023_v36, 160 }
 0x1b8   : > { %v863_v40 = vpack.c.bf16 %v855_v39, %v854_v38  ;;  %v1007_v39 = vadd.s32 64, %v1769_v42 }
 0x1ba   : > { %975 = vmatmul.bf16.gmra.mxu3 %v863_v40  ;;  %v1024_v45 = vadd.s32 %v1771_v43, %v1007_v39 }
 0x1bc   : > { %vm1040_vm8 = vcmp.lt.s32.totalorder %v1024_v45, 160 }
 0x1cd   : > { %v941_v46 = vpop.f32.mrf.mxu3 }
 0x1ce   : > { %v942_v47 = vadd.f32 %v1776_v44, %v941_v46 }
 0x1d0   : > { %v981_v49 = vmax.f32 %v942_v47, 0.0 }
 0x1d2   : > { %v1048_v50 = vsel %vm1032_vm0, %v981_v49, 0.0  ;;  %vm1138_vm0 = vcmp.eq.s32.totalorder %v1769_v42, 0 }
 0x1d3   : > { %1064 = vst [vmem:[%s1787_s13] sm:$0xff] %v1048_v50  ;;  %v1101_v57 = vmul.f32 %v1048_v50, %v1048_v50 }
 0x1d5   : > { %v943_v52 = vpop.f32.mrf.mxu3 }
 0x1d6   : > { %v944_v53 = vadd.f32 %v1776_v44, %v943_v52 }
 0x1d8   : > { %v982_v55 = vmax.f32 %v944_v53, 0.0 }
 0x1da   : > { %v1049_v56 = vsel %vm1033_vm1, %v982_v55, 0.0  ;;  %vm1140_vm1 = vcmp.eq.s32.totalorder %v1769_v42, 1 }
 0x1db   : > { %1065 = vst [vmem:[%s1787_s13 + $0x8] sm:$0xff] %v1049_v56  ;;  %v1080_v58 = vadd.f32 %v1049_v56, %v1048_v50  ;;  %v1102_v59 = vmul.f32 %v1049_v56, %v1049_v56 }
 0x1dd   : > { %v1117_v61 = vadd.f32 %v1102_v59, %v1101_v57  ;;  %v946_v62 = vpop.f32.mrf.mxu3  ;;  %v1026_v57 = vadd.s32 %v1771_v43, %v1009_v54 }
 0x1de   : > { %v947_v63 = vadd.f32 %v1776_v44, %v946_v62 }
 0x1df   : > { %vm1042_vm10 = vcmp.lt.s32.totalorder %v1026_v57, 160 }
 0x1e0   : > { %v983_v1 = vmax.f32 %v947_v63, 0.0  ;;  %v1027_v63 = vadd.s32 %v1771_v43, %v1010_v60 }
 0x1e2   : > { %v1050_v2 = vsel %vm1034_vm2, %v983_v1, 0.0  ;;  %vm1043_vm11 = vcmp.lt.s32.totalorder %v1027_v63, 160 }
 0x1e3   : > { %1066 = vst [vmem:[%s1787_s13 + $0x10] sm:$0xff] %v1050_v2  ;;  %v1081_v3 = vadd.f32 %v1080_v58, %v1050_v2  ;;  %v1103_v4 = vmul.f32 %v1050_v2, %v1050_v2  ;;  %v1011_v2 = vadd.s32 96, %v1769_v42 }
 0x1e5   : > { %v1118_v6 = vadd.f32 %v1117_v61, %v1103_v4  ;;  %v948_v7 = vpop.f32.mrf.mxu3  ;;  %v1028_v5 = vadd.s32 %v1771_v43, %v1011_v2 }
 0x1e6   : > { %v949_v8 = vadd.f32 %v1776_v44, %v948_v7 }
 0x1e7   : > { %vm1044_vm12 = vcmp.lt.s32.totalorder %v1028_v5, 160 }
 0x1e8   : > { %v984_v10 = vmax.f32 %v949_v8, 0.0  ;;  %v1012_v8 = vadd.s32 104, %v1769_v42 }
 0x1ea   : > { %v1051_v11 = vsel %vm1035_vm3, %v984_v10, 0.0 }
 0x1eb   : > { %1067 = vst [vmem:[%s1787_s13 + $0x18] sm:$0xff] %v1051_v11  ;;  %v1082_v12 = vadd.f32 %v1081_v3, %v1051_v11  ;;  %v1104_v13 = vmul.f32 %v1051_v11, %v1051_v11  ;;  %v1029_v11 = vadd.s32 %v1771_v43, %v1012_v8 }
 0x1ed   : > { %v1119_v15 = vadd.f32 %v1118_v6, %v1104_v13  ;;  %v951_v16 = vpop.f32.mrf.mxu3  ;;  %vm1045_vm13 = vcmp.lt.s32.totalorder %v1029_v11, 160 }
 0x1ee   : > { %v952_v17 = vadd.f32 %v1776_v44, %v951_v16 }
 0x1f0   : > { %v985_v19 = vmax.f32 %v952_v17, 0.0  ;;  %v1013_v17 = vadd.s32 112, %v1769_v42 }
 0x1f2   : > { %v1052_v20 = vsel %vm1036_vm4, %v985_v19, 0.0 }
 0x1f3   : > { %1068 = vst [vmem:[%s1787_s13 + $0x20] sm:$0xff] %v1052_v20  ;;  %v1806_v21 = vadd.f32 %v1082_v12, %v1052_v20  ;;  %v1105_v22 = vmul.f32 %v1052_v20, %v1052_v20 }
 0x1f5   : > { %v1809_v24 = vadd.f32 %v1119_v15, %v1105_v22  ;;  %v953_v25 = vpop.f32.mrf.mxu3 }
 0x1f6   : > { %v954_v26 = vadd.f32 %v1776_v44, %v953_v25 }
 0x1f8   : > { %v986_v28 = vmax.f32 %v954_v26, 0.0 }
 0x1fa   : > { %v1813_v29 = vsel %vm1037_vm5, %v986_v28, 0.0  ;;  %v1030_v28 = vadd.s32 %v1771_v43, %v1013_v17 }
 0x1fb   : > { %1069 = vst [vmem:[%s1787_s13 + $0x28] sm:$0xff] %v1813_v29  ;;  %v1106_v12 = vmul.f32 %v1813_v29, %v1813_v29  ;;  %v1084_v16 = vadd.f32 %v1806_v21, %v1813_v29 }
 0x1fc   : > { %vm1046_vm14 = vcmp.lt.s32.totalorder %v1030_v28, 160 }
 0x1fd   : > { %v956_v31 = vpop.f32.mrf.mxu3  ;;  %v1121_v18 = vadd.f32 %v1809_v24, %v1106_v12 }
 0x1fe   : > { %v957_v32 = vadd.f32 %v1776_v44, %v956_v31 }
 0x200   : > { %v987_v34 = vmax.f32 %v957_v32, 0.0 }
 0x202   : > { %v1054_v35 = vsel %vm1038_vm6, %v987_v34, 0.0 }
 0x203   : > { %1070 = vst [vmem:[%s1787_s13 + $0x30] sm:$0xff] %v1054_v35  ;;  %v1107_v14 = vmul.f32 %v1054_v35, %v1054_v35  ;;  %v1085_v22 = vadd.f32 %v1084_v16, %v1054_v35  ;;  %v1014_v35 = vadd.s32 120, %v1769_v42 }
 0x205   : > { %v958_v37 = vpop.f32.mrf.mxu3  ;;  %v1122_v23 = vadd.f32 %v1121_v18, %v1107_v14 }
 0x206   : > { %v959_v38 = vadd.f32 %v1776_v44, %v958_v37 }
 0x208   : > { %v988_v40 = vmax.f32 %v959_v38, 0.0 }
 0x20a   : > { %v1055_v41 = vsel %vm1039_vm7, %v988_v40, 0.0 }
 0x20b   : > { %1071 = vst [vmem:[%s1787_s13 + $0x38] sm:$0xff] %v1055_v41  ;;  %v1108_v19 = vmul.f32 %v1055_v41, %v1055_v41  ;;  %v1086_v27 = vadd.f32 %v1085_v22, %v1055_v41 }
 0x20d   : > { %v961_v46 = vpop.f32.mrf.mxu3  ;;  %v1123_v30 = vadd.f32 %v1122_v23, %v1108_v19 }
 0x20e   : > { %v962_v47 = vadd.f32 %v1776_v44, %v961_v46 }
 0x210   : > { %v989_v49 = vmax.f32 %v962_v47, 0.0  ;;  %v1031_v47 = vadd.s32 %v1771_v43, %v1014_v35 }
 0x212   : > { %v1056_v50 = vsel %vm1040_vm8, %v989_v49, 0.0  ;;  %vm1047_vm15 = vcmp.lt.s32.totalorder %v1031_v47, 160 }
 0x213   : > { %1072 = vst [vmem:[%s1787_s13 + $0x40] sm:$0xff] %v1056_v50  ;;  %v1109_v25 = vmul.f32 %v1056_v50, %v1056_v50  ;;  %v1087_v31 = vadd.f32 %v1086_v27, %v1056_v50 }
 0x215   : > { %v963_v52 = vpop.f32.mrf.mxu3  ;;  %v1124_v29 = vadd.f32 %v1123_v30, %v1109_v25 }
 0x216   : > { %v964_v53 = vadd.f32 %v1776_v44, %v963_v52 }
 0x218   : > { %v990_v55 = vmax.f32 %v964_v53, 0.0 }
 0x21a   : > { %v1057_v56 = vsel %vm1041_vm9, %v990_v55, 0.0 }
 0x21b   : > { %1073 = vst [vmem:[%s1787_s13 + $0x48] sm:$0xff] %v1057_v56  ;;  %v1110_v32 = vmul.f32 %v1057_v56, %v1057_v56  ;;  %v1088_v34 = vadd.f32 %v1087_v31, %v1057_v56 }
 0x21d   : > { %v966_v58 = vpop.f32.mrf.mxu3  ;;  %v1125_v37 = vadd.f32 %v1124_v29, %v1110_v32 }
 0x21e   : > { %v967_v59 = vadd.f32 %v1776_v44, %v966_v58 }
 0x220   : > { %v991_v61 = vmax.f32 %v967_v59, 0.0 }
 0x222   : > { %v1058_v62 = vsel %vm1042_vm10, %v991_v61, 0.0 }
 0x223   : > { %1074 = vst [vmem:[%s1787_s13 + $0x50] sm:$0xff] %v1058_v62  ;;  %v1111_v24 = vmul.f32 %v1058_v62, %v1058_v62  ;;  %v1089_v38 = vadd.f32 %v1088_v34, %v1058_v62 }
 0x225   : > { %v968_v0 = vpop.f32.mrf.mxu3  ;;  %v1126_v41 = vadd.f32 %v1125_v37, %v1111_v24 }
 0x226   : > { %v969_v1 = vadd.f32 %v1776_v44, %v968_v0 }
 0x228   : > { %v992_v3 = vmax.f32 %v969_v1, 0.0 }
 0x22a   : > { %v1059_v4 = vsel %vm1043_vm11, %v992_v3, 0.0 }
 0x22b   : > { %1075 = vst [vmem:[%s1787_s13 + $0x58] sm:$0xff] %v1059_v4  ;;  %v1112_v39 = vmul.f32 %v1059_v4, %v1059_v4  ;;  %v1090_v45 = vadd.f32 %v1089_v38, %v1059_v4 }
 0x22d   : > { %v971_v6 = vpop.f32.mrf.mxu3  ;;  %v1127_v48 = vadd.f32 %v1126_v41, %v1112_v39 }
 0x22e   : > { %v972_v7 = vadd.f32 %v1776_v44, %v971_v6 }
 0x230   : > { %v993_v9 = vmax.f32 %v972_v7, 0.0 }
 0x232   : > { %v1060_v10 = vsel %vm1044_vm12, %v993_v9, 0.0 }
 0x233   : > { %1076 = vst [vmem:[%s1787_s13 + $0x60] sm:$0xff] %v1060_v10  ;;  %v1113_v46 = vmul.f32 %v1060_v10, %v1060_v10  ;;  %v1091_v49 = vadd.f32 %v1090_v45, %v1060_v10 }
 0x235   : > { %v973_v13 = vpop.f32.mrf.mxu3  ;;  %v1128_v53 = vadd.f32 %v1127_v48, %v1113_v46 }
 0x236   : > { %v974_v15 = vadd.f32 %v1776_v44, %v973_v13 }
 0x238   : > { %v994_v20 = vmax.f32 %v974_v15, 0.0 }
 0x23a   : > { %v1061_v26 = vsel %vm1045_vm13, %v994_v20, 0.0 }
 0x23b   : > { %1077 = vst [vmem:[%s1787_s13 + $0x68] sm:$0xff] %v1061_v26  ;;  %v1114_v50 = vmul.f32 %v1061_v26, %v1061_v26  ;;  %v1092_v54 = vadd.f32 %v1091_v49, %v1061_v26 }
 0x23d   : > { %v976_v21 = vpop.f32.mrf.mxu3  ;;  %v1129_v57 = vadd.f32 %v1128_v53, %v1114_v50 }
 0x23e   : > { %v977_v33 = vadd.f32 %v1776_v44, %v976_v21 }
 0x240   : > { %v995_v36 = vmax.f32 %v977_v33, 0.0 }
 0x242   : > { %v1062_v40 = vsel %vm1046_vm14, %v995_v36, 0.0 }
 0x243   : > { %1078 = vst [vmem:[%s1787_s13 + $0x70] sm:$0xff] %v1062_v40  ;;  %v1115_v55 = vmul.f32 %v1062_v40, %v1062_v40  ;;  %v1093_v58 = vadd.f32 %v1092_v54, %v1062_v40 }
 0x245   : > { %v978_v51 = vpop.f32.mrf.mxu3  ;;  %v1130_v60 = vadd.f32 %v1129_v57, %v1115_v55 }
 0x246   : > { %v979_v52 = vadd.f32 %v1776_v44, %v978_v51 }
 0x248   : > { %v996_v56 = vmax.f32 %v979_v52, 0.0 }
 0x24a   : > { %v1063_v59 = vsel %vm1047_vm15, %v996_v56, 0.0 }
 0x24b   : > { %1079 = vst [vmem:[%s1787_s13 + $0x78] sm:$0xff] %v1063_v59  ;;  %v1094_v61 = vadd.f32 %v1093_v58, %v1063_v59  ;;  %v1116_v43 = vmul.f32 %v1063_v59, %v1063_v59 }
 0x24d   : > { %v1095_v62 = vrot.slane %v1094_v61, 4  ;;  %v1131_v63 = vadd.f32 %v1130_v60, %v1116_v43 }
 0x24f   : > { %v1096_v0 = vadd.f32 %v1095_v62, %v1094_v61  ;;  %v1132_v1 = vrot.slane %v1131_v63, 4 }
 0x251   : > { %v1097_v44 = vrot.slane %v1096_v0, 2  ;;  %v1133_v2 = vadd.f32 %v1132_v1, %v1131_v63 }
 0x253   : > { %v1098_v3 = vadd.f32 %v1097_v44, %v1096_v0  ;;  %v1134_v4 = vrot.slane %v1133_v2, 2 }
 0x255   : > { %v1099_v5 = vrot.slane %v1098_v3, 1  ;;  %v1135_v6 = vadd.f32 %v1134_v4, %v1133_v2 }
 0x257   : > { %v1100_v7 = vadd.f32 %v1099_v5, %v1098_v3  ;;  %v1136_v8 = vrot.slane %v1135_v6, 1 }
 0x259   : > { %v1137_v9 = vadd.f32 %v1136_v8, %v1135_v6  ;;  %v1139_v10 = vsel %vm1138_vm0, %v1100_v7, 0.0 }
 0x25b   : > { %v1141_v11 = vsel %vm1140_vm1, %v1137_v9, 0.0 }
 0x25c   : > { %v1142_v12 = vadd.f32 %v1141_v11, %v1139_v10 }
 0x25e   : > { %1143 = vst [vmem:[%s344_s15] sm:$0xff] %v1142_v12 }
 0x25f PF: > { %s19_s27 = sadd.s32 1, %s1555_s27  }
 0x260   : > { %p16_p5 = scmp.ge.s32.totalorder %s19_s27, 4  }
 0x262   :  { %18 = sbr.rel (!%p16_p5) target bundleno = 1 (0x1), region = 93 }

</bundles_post_ra>
